<compile_context>
chip_gen: v6e
topology: v6e:2x2x1
jax: 0.10.0
libtpu: 0.0.40
codegen_flags: <defaults>
</compile_context>

<pallas_src>
import jax
import jax.numpy as jnp
from jax.experimental import pallas as pl
from jax.experimental.pallas import tpu as pltpu


def _make_kernel(KH, KW, Wp, Q, stride):
    taps = [(kh, kw) for kh in range(KH) for kw in range(KW)]

    def kernel(scal_ref, x_ref, w_ref, alpha_ref, bias_ref, o_ref, acc_ref):
        # scal_ref : SMEM f32[1] = [1 / scale_filter]
        # x_ref    : (1, Rp, C)  bf16 flattened padded NHWC image (row r = h*Wp + w)
        # w_ref    : (KH*KW, C, OCp) bf16
        # alpha_ref, bias_ref : (1, OCp) f32 ; bias = round(beta * scale_out) (precomputed)
        # o_ref    : (1, Q, OCp) bf16 ; acc_ref : VMEM (Q, OCp) f32 accumulator
        for t, (kh, kw) in enumerate(taps):
            d = kh * Wp + kw                               # static row offset of this tap
            if stride == 1:
                win = x_ref[0, pl.ds(d, Q), :]             # contiguous tap rows
            else:
                win = x_ref[0, pl.ds(d, Q, stride), :]     # strided tap rows (s > 1 fallback)
            contrib = jnp.dot(win, w_ref[t], preferred_element_type=jnp.float32)
            if t == 0:
                acc_ref[...] = contrib
            else:
                acc_ref[...] += contrib

        inv_scale = scal_ref[0]
        y = jnp.round(acc_ref[...] * inv_scale)            # round(conv / scale_filter)
        y = jnp.round(alpha_ref[...] * y) + bias_ref[...]  # BN (outer round is identity on ints)
        # int8 saturation + ReLU fused: relu(clip(y, -128, 127)) == clip(y, 0, 127)
        o_ref[0] = jnp.clip(y, 0.0, 127.0).astype(o_ref.dtype)

    return kernel


def basic_conv2d_forward(x, weight, alpha, beta, scale_filter, scale_out,
                         stride=1, padding=0):
    """x: (N, C, H, W) f32 (int-valued); weight: (OC, C, KH, KW). Returns NCHW f32."""
    N, C, H, W = x.shape
    OC, _, KH, KW = weight.shape
    s = int(stride)

    Hp, Wp = H + 2 * padding, W + 2 * padding
    OH = (Hp - KH) // s + 1
    OW = (Wp - KW) // s + 1
    OCp = ((OC + 127) // 128) * 128                 # lane-dense output channels
    T = KH * KW

    # --- input: NCHW -> NHWC (bf16, exact for int8-range values), pad, flatten spatial ---
    xb = x.astype(jnp.bfloat16)
    x_nhwc = jnp.pad(jnp.transpose(xb, (0, 2, 3, 1)),
                     ((0, 0), (padding, padding), (padding, padding), (0, 0)))
    R = Hp * Wp
    Q = OH * Wp                                     # rows per image incl. wrap-around cols
    max_row = s * (Q - 1) + (KH - 1) * Wp + (KW - 1)
    Rp = ((max(R, max_row + 1) + 7) // 8) * 8       # extra zero rows keep tap slices in bounds
    x_rows = x_nhwc.reshape(N, R, C)
    if Rp > R:
        x_rows = jnp.pad(x_rows, ((0, 0), (0, Rp - R), (0, 0)))

    # --- weights: (OC, C, KH, KW) -> (KH*KW, C, OCp) bf16, resident across the grid ---
    w = jnp.transpose(weight, (2, 3, 1, 0)).reshape(T, C, OC)
    w = jnp.pad(w, ((0, 0), (0, 0), (0, OCp - OC))).astype(jnp.bfloat16)

    alpha_p = jnp.pad(alpha.astype(jnp.float32).reshape(1, OC), ((0, 0), (0, OCp - OC)))
    # beta_out = round(beta * scale_out) is tile/grid invariant: hoist out of the kernel.
    bias_p = jnp.pad(jnp.round(beta.astype(jnp.float32) * jnp.float32(scale_out)
                               ).reshape(1, OC), ((0, 0), (0, OCp - OC)))
    # NOTE: multiply-by-reciprocal may differ from the divide by 1 ulp pre-round.
    inv_scale = jnp.asarray([1.0 / float(scale_filter)], dtype=jnp.float32)

    kernel = _make_kernel(KH, KW, Wp, Q, s)

    out = pl.pallas_call(
        kernel,
        out_shape=jax.ShapeDtypeStruct((N, Q, OCp), jnp.bfloat16),
        grid=(N,),
        in_specs=[
            pl.BlockSpec(memory_space=pltpu.MemorySpace.SMEM),      # [1/scale_filter]
            pl.BlockSpec((1, Rp, C), lambda n: (n, 0, 0)),          # one image per grid step
            pl.BlockSpec((T, C, OCp), lambda n: (0, 0, 0)),         # weights (resident)
            pl.BlockSpec((1, OCp), lambda n: (0, 0)),               # alpha
            pl.BlockSpec((1, OCp), lambda n: (0, 0)),               # round(beta*scale_out)
        ],
        out_specs=pl.BlockSpec((1, Q, OCp), lambda n: (n, 0, 0)),
        scratch_shapes=[pltpu.VMEM((Q, OCp), jnp.float32)],         # f32 accumulator
        compiler_params=pltpu.CompilerParams(
            dimension_semantics=("parallel",),
            vmem_limit_bytes=48 * 1024 * 1024),
    )(inv_scale, x_rows, w, alpha_p, bias_p)

    # Drop wrap-around columns & OC padding, NHWC->NCHW, back to f32 (one fused XLA pass).
    out = out.reshape(N, OH, Wp, OCp)[:, :, :OW, :OC]
    return jnp.transpose(out, (0, 3, 1, 2)).astype(jnp.float32)


def _reference(x, weight, alpha, beta, scale_filter, scale_out, stride, padding):
    """Pure-JAX reference of the same forward path (same reciprocal-multiply formulation)."""
    conv = jax.lax.conv_general_dilated(
        x, weight, window_strides=(stride, stride),
        padding=[(padding, padding), (padding, padding)],
        dimension_numbers=("NCHW", "OIHW", "NCHW"),
        preferred_element_type=jnp.float32)
    inv = jnp.float32(1.0 / float(scale_filter))
    y = jnp.round(conv * inv)
    a = alpha.astype(jnp.float32)[None, :, None, None]
    b = jnp.round(beta.astype(jnp.float32) * jnp.float32(scale_out))[None, :, None, None]
    y = jnp.round(a * y) + b
    return jnp.maximum(jnp.clip(y, -128.0, 127.0), 0.0)


if __name__ == "__main__":
    key = jax.random.PRNGKey(0)
    k1, k2, k3, k4 = jax.random.split(key, 4)

    # small, module-consistent shapes: batch=2, in_ch=4, out_ch=8, 16x16, 3x3, pad=1
    N, Cin, Cout, H, W, KS = 2, 4, 8, 16, 16, 3
    stride, padding = 1, 1

    # quantized integer-valued activations / weights stored as float32
    x = jnp.round(jax.random.uniform(k1, (N, Cin, H, W), minval=-10.0, maxval=10.0)).astype(jnp.float32)
    weight = jnp.round(jax.random.uniform(k2, (Cout, Cin, KS, KS), minval=-5.0, maxval=5.0)).astype(jnp.float32)
    alpha = jax.random.uniform(k3, (Cout,), minval=0.01, maxval=0.2).astype(jnp.float32)
    beta = jax.random.uniform(k4, (Cout,), minval=-2.0, maxval=2.0).astype(jnp.float32)
    scale_filter = 0.05   # scale_dict[filter_key]
    scale_out = 4.0       # scale_feature[filter_count + 1]

    y = basic_conv2d_forward(x, weight, alpha, beta, scale_filter, scale_out,
                             stride=stride, padding=padding)
    jax.block_until_ready(y)
    assert y.shape == (N, Cout, H, W)

    y_ref = _reference(x, weight, alpha, beta, scale_filter, scale_out, stride, padding)
    assert bool(jnp.allclose(y, y_ref, atol=1e-3)), "Pallas kernel mismatch vs JAX reference"

    print("KERNEL_OK")
</pallas_src>

<mosaic_0001>
module attributes {stable_mosaic.version = 11 : i64} {
  func.func @kernel(%arg0: i32, %arg1: memref<1xf32, #tpu.memory_space<smem>>, %arg2: memref<1x328x4xbf16, #tpu.memory_space<vmem>>, %arg3: memref<9x4x128xbf16, #tpu.memory_space<vmem>>, %arg4: memref<1x128xf32, #tpu.memory_space<vmem>>, %arg5: memref<1x128xf32, #tpu.memory_space<vmem>>, %arg6: memref<1x288x128xbf16, #tpu.memory_space<vmem>>, %arg7: memref<288x128xf32, #tpu.memory_space<vmem>>) attributes {dimension_semantics = [#tpu.dimension_semantics<parallel>], iteration_bounds = array<i64: 2>, scalar_prefetch = 0 : i64, scratch_operands = 1 : i64, tpu.core_type = #tpu.core_type<tc>, window_params = [{transform_indices = @transform_0, window_bounds = array<i64: 1>}, {transform_indices = @transform_1, window_bounds = array<i64: 1, 328, 4>}, {pipeline_mode = #tpu.pipeline_mode<synchronous>, transform_indices = @transform_2, window_bounds = array<i64: 9, 4, 128>}, {pipeline_mode = #tpu.pipeline_mode<synchronous>, transform_indices = @transform_3, window_bounds = array<i64: 1, 128>}, {pipeline_mode = #tpu.pipeline_mode<synchronous>, transform_indices = @transform_4, window_bounds = array<i64: 1, 128>}, {transform_indices = @transform_5, window_bounds = array<i64: 1, 288, 128>}]} {
    %c0 = arith.constant 0 : index
    %c0_0 = arith.constant 0 : index
    %c0_1 = arith.constant 0 : index
    %0 = vector.load %arg2[%c0, %c0_0, %c0_1] : memref<1x328x4xbf16, #tpu.memory_space<vmem>>, vector<1x288x4xbf16>
    %1 = vector.shape_cast %0 : vector<1x288x4xbf16> to vector<288x4xbf16>
    %c0_2 = arith.constant 0 : index
    %c0_3 = arith.constant 0 : index
    %c0_4 = arith.constant 0 : index
    %2 = vector.load %arg3[%c0_2, %c0_3, %c0_4] : memref<9x4x128xbf16, #tpu.memory_space<vmem>>, vector<1x4x128xbf16>
    %3 = vector.shape_cast %2 : vector<1x4x128xbf16> to vector<4x128xbf16>
    %cst = arith.constant dense<0.000000e+00> : vector<288x128xf32>
    %4 = tpu.matmul %1, %3, %cst {dimension_numbers = #tpu.dot_dimension_numbers<[1], [0], [0], [1], [0, 0, 1, 1], [], []>} : vector<288x4xbf16>, vector<4x128xbf16>, vector<288x128xf32> -> vector<288x128xf32>
    %c0_5 = arith.constant 0 : index
    %c0_6 = arith.constant 0 : index
    %5 = vector.load %arg7[%c0_5, %c0_6] : memref<288x128xf32, #tpu.memory_space<vmem>>, vector<288x128xf32>
    tpu.vector_store %arg7[%c0_5, %c0_6], %4 {strides = array<i32>} : memref<288x128xf32, #tpu.memory_space<vmem>>, vector<288x128xf32>,
    %c0_7 = arith.constant 0 : index
    %c1 = arith.constant 1 : index
    %c0_8 = arith.constant 0 : index
    %6 = vector.load %arg2[%c0_7, %c1, %c0_8] : memref<1x328x4xbf16, #tpu.memory_space<vmem>>, vector<1x288x4xbf16>
    %7 = vector.shape_cast %6 : vector<1x288x4xbf16> to vector<288x4xbf16>
    %c1_9 = arith.constant 1 : index
    %c0_10 = arith.constant 0 : index
    %c0_11 = arith.constant 0 : index
    %8 = vector.load %arg3[%c1_9, %c0_10, %c0_11] : memref<9x4x128xbf16, #tpu.memory_space<vmem>>, vector<1x4x128xbf16>
    %9 = vector.shape_cast %8 : vector<1x4x128xbf16> to vector<4x128xbf16>
    %cst_12 = arith.constant dense<0.000000e+00> : vector<288x128xf32>
    %10 = tpu.matmul %7, %9, %cst_12 {dimension_numbers = #tpu.dot_dimension_numbers<[1], [0], [0], [1], [0, 0, 1, 1], [], []>} : vector<288x4xbf16>, vector<4x128xbf16>, vector<288x128xf32> -> vector<288x128xf32>
    %c0_13 = arith.constant 0 : index
    %c0_14 = arith.constant 0 : index
    %11 = vector.load %arg7[%c0_13, %c0_14] : memref<288x128xf32, #tpu.memory_space<vmem>>, vector<288x128xf32>
    %12 = arith.addf %11, %10 : vector<288x128xf32>
    %c0_15 = arith.constant 0 : index
    %c0_16 = arith.constant 0 : index
    %13 = vector.load %arg7[%c0_15, %c0_16] : memref<288x128xf32, #tpu.memory_space<vmem>>, vector<288x128xf32>
    tpu.vector_store %arg7[%c0_15, %c0_16], %12 {strides = array<i32>} : memref<288x128xf32, #tpu.memory_space<vmem>>, vector<288x128xf32>,
    %c0_17 = arith.constant 0 : index
    %c2 = arith.constant 2 : index
    %c0_18 = arith.constant 0 : index
    %14 = vector.load %arg2[%c0_17, %c2, %c0_18] : memref<1x328x4xbf16, #tpu.memory_space<vmem>>, vector<1x288x4xbf16>
    %15 = vector.shape_cast %14 : vector<1x288x4xbf16> to vector<288x4xbf16>
    %c2_19 = arith.constant 2 : index
    %c0_20 = arith.constant 0 : index
    %c0_21 = arith.constant 0 : index
    %16 = vector.load %arg3[%c2_19, %c0_20, %c0_21] : memref<9x4x128xbf16, #tpu.memory_space<vmem>>, vector<1x4x128xbf16>
    %17 = vector.shape_cast %16 : vector<1x4x128xbf16> to vector<4x128xbf16>
    %cst_22 = arith.constant dense<0.000000e+00> : vector<288x128xf32>
    %18 = tpu.matmul %15, %17, %cst_22 {dimension_numbers = #tpu.dot_dimension_numbers<[1], [0], [0], [1], [0, 0, 1, 1], [], []>} : vector<288x4xbf16>, vector<4x128xbf16>, vector<288x128xf32> -> vector<288x128xf32>
    %c0_23 = arith.constant 0 : index
    %c0_24 = arith.constant 0 : index
    %19 = vector.load %arg7[%c0_23, %c0_24] : memref<288x128xf32, #tpu.memory_space<vmem>>, vector<288x128xf32>
    %20 = arith.addf %19, %18 : vector<288x128xf32>
    %c0_25 = arith.constant 0 : index
    %c0_26 = arith.constant 0 : index
    %21 = vector.load %arg7[%c0_25, %c0_26] : memref<288x128xf32, #tpu.memory_space<vmem>>, vector<288x128xf32>
    tpu.vector_store %arg7[%c0_25, %c0_26], %20 {strides = array<i32>} : memref<288x128xf32, #tpu.memory_space<vmem>>, vector<288x128xf32>,
    %c0_27 = arith.constant 0 : index
    %c18 = arith.constant 18 : index
    %c0_28 = arith.constant 0 : index
    %22 = vector.load %arg2[%c0_27, %c18, %c0_28] : memref<1x328x4xbf16, #tpu.memory_space<vmem>>, vector<1x288x4xbf16>
    %23 = vector.shape_cast %22 : vector<1x288x4xbf16> to vector<288x4xbf16>
    %c3 = arith.constant 3 : index
    %c0_29 = arith.constant 0 : index
    %c0_30 = arith.constant 0 : index
    %24 = vector.load %arg3[%c3, %c0_29, %c0_30] : memref<9x4x128xbf16, #tpu.memory_space<vmem>>, vector<1x4x128xbf16>
    %25 = vector.shape_cast %24 : vector<1x4x128xbf16> to vector<4x128xbf16>
    %cst_31 = arith.constant dense<0.000000e+00> : vector<288x128xf32>
    %26 = tpu.matmul %23, %25, %cst_31 {dimension_numbers = #tpu.dot_dimension_numbers<[1], [0], [0], [1], [0, 0, 1, 1], [], []>} : vector<288x4xbf16>, vector<4x128xbf16>, vector<288x128xf32> -> vector<288x128xf32>
    %c0_32 = arith.constant 0 : index
    %c0_33 = arith.constant 0 : index
    %27 = vector.load %arg7[%c0_32, %c0_33] : memref<288x128xf32, #tpu.memory_space<vmem>>, vector<288x128xf32>
    %28 = arith.addf %27, %26 : vector<288x128xf32>
    %c0_34 = arith.constant 0 : index
    %c0_35 = arith.constant 0 : index
    %29 = vector.load %arg7[%c0_34, %c0_35] : memref<288x128xf32, #tpu.memory_space<vmem>>, vector<288x128xf32>
    tpu.vector_store %arg7[%c0_34, %c0_35], %28 {strides = array<i32>} : memref<288x128xf32, #tpu.memory_space<vmem>>, vector<288x128xf32>,
    %c0_36 = arith.constant 0 : index
    %c19 = arith.constant 19 : index
    %c0_37 = arith.constant 0 : index
    %30 = vector.load %arg2[%c0_36, %c19, %c0_37] : memref<1x328x4xbf16, #tpu.memory_space<vmem>>, vector<1x288x4xbf16>
    %31 = vector.shape_cast %30 : vector<1x288x4xbf16> to vector<288x4xbf16>
    %c4 = arith.constant 4 : index
    %c0_38 = arith.constant 0 : index
    %c0_39 = arith.constant 0 : index
    %32 = vector.load %arg3[%c4, %c0_38, %c0_39] : memref<9x4x128xbf16, #tpu.memory_space<vmem>>, vector<1x4x128xbf16>
    %33 = vector.shape_cast %32 : vector<1x4x128xbf16> to vector<4x128xbf16>
    %cst_40 = arith.constant dense<0.000000e+00> : vector<288x128xf32>
    %34 = tpu.matmul %31, %33, %cst_40 {dimension_numbers = #tpu.dot_dimension_numbers<[1], [0], [0], [1], [0, 0, 1, 1], [], []>} : vector<288x4xbf16>, vector<4x128xbf16>, vector<288x128xf32> -> vector<288x128xf32>
    %c0_41 = arith.constant 0 : index
    %c0_42 = arith.constant 0 : index
    %35 = vector.load %arg7[%c0_41, %c0_42] : memref<288x128xf32, #tpu.memory_space<vmem>>, vector<288x128xf32>
    %36 = arith.addf %35, %34 : vector<288x128xf32>
    %c0_43 = arith.constant 0 : index
    %c0_44 = arith.constant 0 : index
    %37 = vector.load %arg7[%c0_43, %c0_44] : memref<288x128xf32, #tpu.memory_space<vmem>>, vector<288x128xf32>
    tpu.vector_store %arg7[%c0_43, %c0_44], %36 {strides = array<i32>} : memref<288x128xf32, #tpu.memory_space<vmem>>, vector<288x128xf32>,
    %c0_45 = arith.constant 0 : index
    %c20 = arith.constant 20 : index
    %c0_46 = arith.constant 0 : index
    %38 = vector.load %arg2[%c0_45, %c20, %c0_46] : memref<1x328x4xbf16, #tpu.memory_space<vmem>>, vector<1x288x4xbf16>
    %39 = vector.shape_cast %38 : vector<1x288x4xbf16> to vector<288x4xbf16>
    %c5 = arith.constant 5 : index
    %c0_47 = arith.constant 0 : index
    %c0_48 = arith.constant 0 : index
    %40 = vector.load %arg3[%c5, %c0_47, %c0_48] : memref<9x4x128xbf16, #tpu.memory_space<vmem>>, vector<1x4x128xbf16>
    %41 = vector.shape_cast %40 : vector<1x4x128xbf16> to vector<4x128xbf16>
    %cst_49 = arith.constant dense<0.000000e+00> : vector<288x128xf32>
    %42 = tpu.matmul %39, %41, %cst_49 {dimension_numbers = #tpu.dot_dimension_numbers<[1], [0], [0], [1], [0, 0, 1, 1], [], []>} : vector<288x4xbf16>, vector<4x128xbf16>, vector<288x128xf32> -> vector<288x128xf32>
    %c0_50 = arith.constant 0 : index
    %c0_51 = arith.constant 0 : index
    %43 = vector.load %arg7[%c0_50, %c0_51] : memref<288x128xf32, #tpu.memory_space<vmem>>, vector<288x128xf32>
    %44 = arith.addf %43, %42 : vector<288x128xf32>
    %c0_52 = arith.constant 0 : index
    %c0_53 = arith.constant 0 : index
    %45 = vector.load %arg7[%c0_52, %c0_53] : memref<288x128xf32, #tpu.memory_space<vmem>>, vector<288x128xf32>
    tpu.vector_store %arg7[%c0_52, %c0_53], %44 {strides = array<i32>} : memref<288x128xf32, #tpu.memory_space<vmem>>, vector<288x128xf32>,
    %c0_54 = arith.constant 0 : index
    %c36 = arith.constant 36 : index
    %c0_55 = arith.constant 0 : index
    %46 = vector.load %arg2[%c0_54, %c36, %c0_55] : memref<1x328x4xbf16, #tpu.memory_space<vmem>>, vector<1x288x4xbf16>
    %47 = vector.shape_cast %46 : vector<1x288x4xbf16> to vector<288x4xbf16>
    %c6 = arith.constant 6 : index
    %c0_56 = arith.constant 0 : index
    %c0_57 = arith.constant 0 : index
    %48 = vector.load %arg3[%c6, %c0_56, %c0_57] : memref<9x4x128xbf16, #tpu.memory_space<vmem>>, vector<1x4x128xbf16>
    %49 = vector.shape_cast %48 : vector<1x4x128xbf16> to vector<4x128xbf16>
    %cst_58 = arith.constant dense<0.000000e+00> : vector<288x128xf32>
    %50 = tpu.matmul %47, %49, %cst_58 {dimension_numbers = #tpu.dot_dimension_numbers<[1], [0], [0], [1], [0, 0, 1, 1], [], []>} : vector<288x4xbf16>, vector<4x128xbf16>, vector<288x128xf32> -> vector<288x128xf32>
    %c0_59 = arith.constant 0 : index
    %c0_60 = arith.constant 0 : index
    %51 = vector.load %arg7[%c0_59, %c0_60] : memref<288x128xf32, #tpu.memory_space<vmem>>, vector<288x128xf32>
    %52 = arith.addf %51, %50 : vector<288x128xf32>
    %c0_61 = arith.constant 0 : index
    %c0_62 = arith.constant 0 : index
    %53 = vector.load %arg7[%c0_61, %c0_62] : memref<288x128xf32, #tpu.memory_space<vmem>>, vector<288x128xf32>
    tpu.vector_store %arg7[%c0_61, %c0_62], %52 {strides = array<i32>} : memref<288x128xf32, #tpu.memory_space<vmem>>, vector<288x128xf32>,
    %c0_63 = arith.constant 0 : index
    %c37 = arith.constant 37 : index
    %c0_64 = arith.constant 0 : index
    %54 = vector.load %arg2[%c0_63, %c37, %c0_64] : memref<1x328x4xbf16, #tpu.memory_space<vmem>>, vector<1x288x4xbf16>
    %55 = vector.shape_cast %54 : vector<1x288x4xbf16> to vector<288x4xbf16>
    %c7 = arith.constant 7 : index
    %c0_65 = arith.constant 0 : index
    %c0_66 = arith.constant 0 : index
    %56 = vector.load %arg3[%c7, %c0_65, %c0_66] : memref<9x4x128xbf16, #tpu.memory_space<vmem>>, vector<1x4x128xbf16>
    %57 = vector.shape_cast %56 : vector<1x4x128xbf16> to vector<4x128xbf16>
    %cst_67 = arith.constant dense<0.000000e+00> : vector<288x128xf32>
    %58 = tpu.matmul %55, %57, %cst_67 {dimension_numbers = #tpu.dot_dimension_numbers<[1], [0], [0], [1], [0, 0, 1, 1], [], []>} : vector<288x4xbf16>, vector<4x128xbf16>, vector<288x128xf32> -> vector<288x128xf32>
    %c0_68 = arith.constant 0 : index
    %c0_69 = arith.constant 0 : index
    %59 = vector.load %arg7[%c0_68, %c0_69] : memref<288x128xf32, #tpu.memory_space<vmem>>, vector<288x128xf32>
    %60 = arith.addf %59, %58 : vector<288x128xf32>
    %c0_70 = arith.constant 0 : index
    %c0_71 = arith.constant 0 : index
    %61 = vector.load %arg7[%c0_70, %c0_71] : memref<288x128xf32, #tpu.memory_space<vmem>>, vector<288x128xf32>
    tpu.vector_store %arg7[%c0_70, %c0_71], %60 {strides = array<i32>} : memref<288x128xf32, #tpu.memory_space<vmem>>, vector<288x128xf32>,
    %c0_72 = arith.constant 0 : index
    %c38 = arith.constant 38 : index
    %c0_73 = arith.constant 0 : index
    %62 = vector.load %arg2[%c0_72, %c38, %c0_73] : memref<1x328x4xbf16, #tpu.memory_space<vmem>>, vector<1x288x4xbf16>
    %63 = vector.shape_cast %62 : vector<1x288x4xbf16> to vector<288x4xbf16>
    %c8 = arith.constant 8 : index
    %c0_74 = arith.constant 0 : index
    %c0_75 = arith.constant 0 : index
    %64 = vector.load %arg3[%c8, %c0_74, %c0_75] : memref<9x4x128xbf16, #tpu.memory_space<vmem>>, vector<1x4x128xbf16>
    %65 = vector.shape_cast %64 : vector<1x4x128xbf16> to vector<4x128xbf16>
    %cst_76 = arith.constant dense<0.000000e+00> : vector<288x128xf32>
    %66 = tpu.matmul %63, %65, %cst_76 {dimension_numbers = #tpu.dot_dimension_numbers<[1], [0], [0], [1], [0, 0, 1, 1], [], []>} : vector<288x4xbf16>, vector<4x128xbf16>, vector<288x128xf32> -> vector<288x128xf32>
    %c0_77 = arith.constant 0 : index
    %c0_78 = arith.constant 0 : index
    %67 = vector.load %arg7[%c0_77, %c0_78] : memref<288x128xf32, #tpu.memory_space<vmem>>, vector<288x128xf32>
    %68 = arith.addf %67, %66 : vector<288x128xf32>
    %c0_79 = arith.constant 0 : index
    %c0_80 = arith.constant 0 : index
    %69 = vector.load %arg7[%c0_79, %c0_80] : memref<288x128xf32, #tpu.memory_space<vmem>>, vector<288x128xf32>
    tpu.vector_store %arg7[%c0_79, %c0_80], %68 {strides = array<i32>} : memref<288x128xf32, #tpu.memory_space<vmem>>, vector<288x128xf32>,
    %c0_81 = arith.constant 0 : index
    %70 = memref.load %arg1[%c0_81] : memref<1xf32, #tpu.memory_space<smem>>
    %c0_82 = arith.constant 0 : index
    %c0_83 = arith.constant 0 : index
    %71 = vector.load %arg7[%c0_82, %c0_83] : memref<288x128xf32, #tpu.memory_space<vmem>>, vector<288x128xf32>
    %72 = vector.broadcast %70 : f32 to vector<288x128xf32>
    %73 = arith.mulf %71, %72 : vector<288x128xf32>
    %74 = math.roundeven %73 : vector<288x128xf32>
    %c0_84 = arith.constant 0 : index
    %c0_85 = arith.constant 0 : index
    %75 = vector.load %arg4[%c0_84, %c0_85] : memref<1x128xf32, #tpu.memory_space<vmem>>, vector<1x128xf32>
    %76 = vector.broadcast %75 : vector<1x128xf32> to vector<288x128xf32>
    %77 = arith.mulf %76, %74 : vector<288x128xf32>
    %78 = math.roundeven %77 : vector<288x128xf32>
    %c0_86 = arith.constant 0 : index
    %c0_87 = arith.constant 0 : index
    %79 = vector.load %arg5[%c0_86, %c0_87] : memref<1x128xf32, #tpu.memory_space<vmem>>, vector<1x128xf32>
    %80 = vector.broadcast %79 : vector<1x128xf32> to vector<288x128xf32>
    %81 = arith.addf %78, %80 : vector<288x128xf32>
    %cst_88 = arith.constant 0.000000e+00 : f32
    %cst_89 = arith.constant 1.270000e+02 : f32
    %82 = vector.broadcast %cst_88 : f32 to vector<288x128xf32>
    %83 = arith.maximumf %82, %81 : vector<288x128xf32>
    %84 = vector.broadcast %cst_89 : f32 to vector<288x128xf32>
    %85 = arith.minimumf %84, %83 : vector<288x128xf32>
    %86 = arith.truncf %85 : vector<288x128xf32> to vector<288x128xbf16>
    %c0_90 = arith.constant 0 : index
    %c0_91 = arith.constant 0 : index
    %c0_92 = arith.constant 0 : index
    %87 = vector.load %arg6[%c0_90, %c0_91, %c0_92] : memref<1x288x128xbf16, #tpu.memory_space<vmem>>, vector<1x288x128xbf16>
    %88 = vector.shape_cast %87 : vector<1x288x128xbf16> to vector<288x128xbf16>
    %89 = vector.shape_cast %86 : vector<288x128xbf16> to vector<1x288x128xbf16>
    tpu.vector_store %arg6[%c0_90, %c0_91, %c0_92], %89 {strides = array<i32>} : memref<1x288x128xbf16, #tpu.memory_space<vmem>>, vector<1x288x128xbf16>,
    return
  }
  func.func @transform_0(%arg0: i32) -> i32 {
    %c0_i32 = arith.constant 0 : i32
    %c0_i32_0 = arith.constant 0 : i32
    return %c0_i32 : i32
  }
  func.func @transform_1(%arg0: i32) -> (i32, i32, i32) {
    %c0_i32 = arith.constant 0 : i32
    %c0_i32_0 = arith.constant 0 : i32
    %c0_i32_1 = arith.constant 0 : i32
    return %arg0, %c0_i32, %c0_i32_0 : i32, i32, i32
  }
  func.func @transform_2(%arg0: i32) -> (i32, i32, i32) {
    %c0_i32 = arith.constant 0 : i32
    %c0_i32_0 = arith.constant 0 : i32
    %c0_i32_1 = arith.constant 0 : i32
    %c0_i32_2 = arith.constant 0 : i32
    return %c0_i32, %c0_i32_0, %c0_i32_1 : i32, i32, i32
  }
  func.func @transform_3(%arg0: i32) -> (i32, i32) {
    %c0_i32 = arith.constant 0 : i32
    %c0_i32_0 = arith.constant 0 : i32
    %c0_i32_1 = arith.constant 0 : i32
    return %c0_i32, %c0_i32_0 : i32, i32
  }
  func.func @transform_4(%arg0: i32) -> (i32, i32) {
    %c0_i32 = arith.constant 0 : i32
    %c0_i32_0 = arith.constant 0 : i32
    %c0_i32_1 = arith.constant 0 : i32
    return %c0_i32, %c0_i32_0 : i32, i32
  }
  func.func @transform_5(%arg0: i32) -> (i32, i32, i32) {
    %c0_i32 = arith.constant 0 : i32
    %c0_i32_0 = arith.constant 0 : i32
    %c0_i32_1 = arith.constant 0 : i32
    return %arg0, %c0_i32, %c0_i32_0 : i32, i32, i32
  }
}

</mosaic_0001>

<bundles_post_ra>
// kernel: tpu_custom_call.1
= control target key start
LH: loop header
LB: loop body
LE: loop exit
PB: predicated region body
PF: predicated region fallthrough
CT: control target
= control target key end

     0   :  { %s9132_s0 = inlined_call_operand.<no memory space> [shape: f32[1], index: 0, kind: input, shape index: {}]   ;;  %s9133_s1 = inlined_call_operand.vmem [shape: bf16[2,328,4], index: 1, kind: input, shape index: {}]   ;;  %s9134_s2 = inlined_call_operand.vmem [shape: bf16[9,4,128], index: 2, kind: input, shape index: {}]   ;;  %s9135_s3 = inlined_call_operand.vmem [shape: f32[1,128], index: 3, kind: input, shape index: {}]   ;;  %s9136_s4 = inlined_call_operand.vmem [shape: f32[1,128], index: 4, kind: input, shape index: {}]   ;;  %s9137_s5 = inlined_call_operand.hbm [shape: bf16[2,288,128], index: 5, kind: output, shape index: {}]  }
   0x1   :  { %10 = sst [smem:[#allocation3]] %s9132_s0 }
   0x2   :  { %11 = vsyncpa [#allocation5], 0 }
   0x3   :  { %13 = vsyncpa [#allocation5 + $0x1], 0  ;;  %s7599_s20 = smov 0   ;;  %s7601_s21 = smov 0  }
   0x4   :  { %s7603_s22 = smov 0   ;;  %s7605_s23 = smov 0  }
   0x5 LB: > { %s7620_s0 = sadd.s32 4294967295, %s7561_s23   ;;  %s5655_s24 = sadd.s32 4294967294, %s7561_s23   ;;  %s7561_s23 = sphi %s7605_s23, %s9213_s23   ;;  %s7557_s22 = sphi %s7603_s22, %s9212_s22   ;;  %s7553_s21 = sphi %s7601_s21, %s9211_s21   ;;  %s7549_s20 = sphi %s7599_s20, %s9210_s20  }
   0x6   : > { %s7624_s25 = sadd.s32 1, %s7561_s23   ;;  %s136_s26 = sadd.s32 1, %s7557_s22 }
   0x7   : > { %s133_s27 = ssub.s32 %s7561_s23, %s7624_s25  ;;  %p146_p0 = scmp.ne.s32.totalorder %s7557_s22, %s7553_s21 }
   0x8   : > { %p134_p1 = scmp.eq.s32.totalorder %s133_s27, 0  ;;  %p147_p2 = scmp.eq.s32.totalorder %s7620_s0, 1 }
   0x9   : > { %p152_p3 = scmp.ne.s32.totalorder %s7553_s21, %s7549_s20  ;;  %p153_p4 = scmp.eq.s32.totalorder %s5655_s24, 1 }
   0xa   : > { %s7635_s28 = scalar_select %p134_p1, %s7557_s22, %s136_s26  }
   0xb   : > { %p7637_p5 = por %p147_p2, %p146_p0  ;;  %p7641_p6 = por %p153_p4, %p152_p3 }
   0xc   : > { %p5658_p7 = scmp.ge.s32.totalorder %s7561_s23, 1  ;;  %p191_p8 = scmp.lt.s32.totalorder %s7561_s23, 3 }
   0xe   : > { %p192_p9 = pnand %p5658_p7, %p191_p8 }
  0x10   : > { %195 = sbr.rel (%p192_p9) target bundleno = 721 (0x2d1), region = 40 }
  0x15   : > { %v261_v0 = vld [vmem:[%s9134_s2] sm:$0x3]  ;;  %vm407_vm0 = vcmask 1041408   ;;  %p219_p10 = scmp.lt.s32.totalorder %s7620_s0, 1  ;;  %v5734_v2 = vld [vmem:[%s9134_s2 + $0x4] sm:$0x3] }
  0x16   : > { %6699 = vmatprep.subr.msk.bf16.mxu0 %vm407_vm0, %v261_v0  ;;  %6700 = vmatprep.subr.msk.bf16.mxu1 %vm407_vm0, %v261_v0  ;;  %v409_v1 = vsel %vm407_vm0, %v261_v0, 0  ;;  %v5696_v3 = vld [vmem:[%s9134_s2 + $0x2] sm:$0x3]  ;;  %vm352_vm1 = vcmask 31744   ;;  %v1472_v7 = vsel %vm407_vm0, %v5734_v2, 0  ;;  %vm1379_vm3 = vcmask 1046528  }
  0x17   : > { %6356 = vmatpush3.bf16.msra.mxu0 %v409_v1  ;;  %6698 = vmatpush3.bf16.msra.mxu1 %v409_v1  ;;  %s220_s12 = scalar_select %p219_p10, %s7620_s0, 1  ;;  %v7676_v8 = vld [vmem:[%s9134_s2 + $0x6] sm:$0x3]  ;;  %v960_v10 = vsel %vm407_vm0, %v5696_v3, 0  ;;  %v7684_v11 = vld [vmem:[%s9134_s2 + $0x8] sm:$0x3] }
  0x18   : > { %6702 = vmatprep.subr.msk.bf16.mxu0 %vm407_vm0, %v5734_v2  ;;  %6701 = vmatprep.subr.msk.bf16.mxu1 %vm407_vm0, %v5696_v3  ;;  %vm756_vm2 = vsmask.f32 7424  ;;  %v7736_v57 = vld [vmem:[%s9134_s2 + $0xa] sm:$0x3]  ;;  %v1983_v58 = vsel %vm407_vm0, %v7676_v8, 0  ;;  %vm3047_vm5 = vcmask 1045504  }
  0x19   : > { %s6710_s13 = smul.u32 164, %s220_s12  ;;  %vm2402_vm4 = vsmask.f32 6400  ;;  %vm4070_vm6 = vsmask.f32 5376  ;;  %vm4715_vm7 = vcmask 1044480  }
  0x1a   : > { %s5095_s12 = sld [smem:[#allocation3]]  ;;  %s216_s17 = sand.u32 1, %s7553_s21  }
  0x1b   : > { %s7666_s16 = scalar_lea.vmem %s9133_s1, %s6710_s13  ;;  %s8710_s18 = smul.u32 144, %s216_s17 }
  0x1c   : > { %v7329_v4 = vld [vmem:[%s7666_s16] sm:$0xff]   ;;  %v7330_v5 = vld [vmem:[%s7666_s16 + $0x50] sm:$0xff]   ;;  %v7331_v6 = vld [vmem:[%s7666_s16 + $0x8] sm:$0xff]   ;;  %s7287_s7 = smul.u32 2304, %s7620_s0  ;;  %s7563_s13 = smov [#allocation4]  }
  0x1d   : > { %6357 = vmatprep.mubr.msk.bf16.mxu0 %vm352_vm1, %v7329_v4  ;;  %6377 = vmatprep.mubr.msk.bf16.mxu1 %vm352_vm1, %v7330_v5  ;;  %v7332_v9 = vld [vmem:[%s7666_s16 + $0x58] sm:$0xff]   ;;  %v7333_v12 = vld [vmem:[%s7666_s16 + $0x10] sm:$0xff]   ;;  %v7334_v13 = vld [vmem:[%s7666_s16 + $0x60] sm:$0xff]   ;;  %s8730_s19 = scalar_lea.vmem [#allocation4], %s8710_s18  ;;  %s7505_s14 = sshll.u32 %s7563_s13, 4  ;;  %s7506_s14 = int_to_ptr.vmem [resolvable:$false] %s7505_s14 }
  0x1e   : > { %6358 = vmatmul.mubr.msk.bf16.vlgmr.msra.gmra.mxu0 %vm352_vm1, %v7331_v6  ;;  %6378 = vmatmul.mubr.msk.bf16.vlgmr.msra.gmra.mxu1 %vm352_vm1, %v7332_v9  ;;  %v7335_v14 = vld [vmem:[%s7666_s16 + $0x18] sm:$0xff]   ;;  %v7336_v15 = vld [vmem:[%s7666_s16 + $0x68] sm:$0xff]   ;;  %v7337_v16 = vld [vmem:[%s7666_s16 + $0x20] sm:$0xff]   ;;  %s5593_s8 = sshll.u32 %s8730_s19, 4  ;;  %s9085_s11 = scalar_lea.hbm %s9137_s5, %s7287_s7  ;;  %s9087_s8 = int_to_ptr.vmem [resolvable:$true] %s5593_s8 }
  0x1f   : > { %6432 = vmatpush3.bf16.msra.mxu0 %v1472_v7  ;;  %6394 = vmatpush3.bf16.msra.mxu1 %v960_v10  ;;  %v7338_v17 = vld [vmem:[%s7666_s16 + $0x70] sm:$0xff]   ;;  %v7339_v18 = vld [vmem:[%s7666_s16 + $0x28] sm:$0xff]   ;;  %v7340_v19 = vld [vmem:[%s7666_s16 + $0x78] sm:$0xff]   ;;  %s7501_s0 = scalar_lea.vmem %s9087_s8, 2304  ;;  %s7507_s15 = scalar_lea.vmem %s7506_s14, 4608 }
  0x20   : > { %6361 = vmatprep.mubr.msk.bf16.mxu0 %vm352_vm1, %v7333_v12  ;;  %6381 = vmatprep.mubr.msk.bf16.mxu1 %vm352_vm1, %v7334_v13  ;;  %v7341_v20 = vld [vmem:[%s7666_s16 + $0x30] sm:$0xff]   ;;  %v7342_v21 = vld [vmem:[%s7666_s16 + $0x80] sm:$0xff]   ;;  %v7347_v23 = vld [vmem:[%s7666_s16 + $0x8] sm:$0xff]   ;;  %p7502_p11 = scmp.ne.s32.totalorder %s9087_s8, %s7501_s0  ;;  %p7508_p0 = scmp.lt.s32.totalorder %s9087_s8, %s7506_s14 }
  0x21   : > { %6703 = vmatprep.subr.msk.bf16.mxu1 %vm407_vm0, %v7676_v8  ;;  %6704 = vmatprep.subr.msk.bf16.mxu0 %vm407_vm0, %v7684_v11  ;;  %v7346_v22 = vld [vmem:[%s7666_s16] sm:$0xff]   ;;  %v765_v26 = vshll.u32 %v7347_v23, 16  ;;  %v7349_v27 = vld [vmem:[%s7666_s16 + $0x10] sm:$0xff]   ;;  %v7343_v28 = vld [vmem:[%s7666_s16 + $0x38] sm:$0xff]   ;;  %v769_v35 = vshrl.u32 %v7347_v23, 16  ;;  %v2628_v8 = vsel %vm407_vm0, %v7684_v11, 0  ;;  %p7509_p1 = scmp.lt.s32.totalorder %s7507_s15, %s7501_s0 }
  0x22   : > { %v758_v24 = vshrl.u32 %v7346_v22, 16  ;;  %v760_v25 = vshll.u32 %v7346_v22, 16  ;;  %v7350_v31 = vld [vmem:[%s7666_s16 + $0x18] sm:$0xff]   ;;  %v7344_v32 = vld [vmem:[%s7666_s16 + $0x88] sm:$0xff]   ;;  %v7345_v34 = vld [vmem:[%s7666_s16 + $0x40] sm:$0xff]   ;;  %v773_v36 = vshll.u32 %v7349_v27, 16  ;;  %p7503_p12 = pnand %p7502_p11, %p7637_p5 }
  0x23   : > { %v767_v30 = vrot.slane %v765_v26, 1  ;;  %v7352_v37 = vld [vmem:[%s7666_s16 + $0x8] sm:$0xff]   ;;  %v7351_v38 = vld [vmem:[%s7666_s16] sm:$0xfe]   ;;  %v777_v40 = vshrl.u32 %v7349_v27, 16  ;;  %v781_v41 = vshll.u32 %v7350_v31, 16  ;;  %p7510_p2 = por %p7509_p1, %p7508_p0 }
  0x24   : > { %v762_v29 = vrot.slane %v760_v25, 1  ;;  %v7353_v42 = vld [vmem:[%s7666_s16 + $0x20] sm:$0xff]   ;;  %v775_v43 = vrot.slane %v773_v36, 1  ;;  %v1380_v45 = vrot.slane %v7351_v38, 1  ;;  %v1381_v46 = vrot.slane %v7352_v37, 1  ;;  %v7355_v49 = vld [vmem:[%s7666_s16 + $0x28] sm:$0xff]   ;;  %p7504_p13 = pneg %p7503_p12 }
  0x25   : > { %v771_v44 = vor.u32 %v769_v35, %v767_v30  ;;  %v783_v48 = vrot.slane %v781_v41, 1  ;;  %v7348_v50 = vld [vmem:[%s7666_s16 + $0x48] sm:$0xff]   ;;  %v789_v51 = vshll.u32 %v7353_v42, 16  ;;  %v7354_v52 = vld [vmem:[%s7666_s16 + $0x10] sm:$0xff]   ;;  %v785_v55 = vshrl.u32 %v7350_v31, 16  ;;  %v7356_v56 = vld [vmem:[%s7666_s16 + $0x18] sm:$0xff]  }
  0x26   : > { %6362 = vmatmul.mubr.msk.bf16.gmra.mxu0 %vm352_vm1, %v7335_v14  ;;  %6382 = vmatmul.mubr.msk.bf16.gmra.mxu1 %vm352_vm1, %v7336_v15  ;;  %v763_v33 = vor.u32 %v762_v29, %v758_v24  ;;  %v779_v47 = vor.u32 %v777_v40, %v775_v43  ;;  %v1382_v54 = vsel %vm1379_vm3, %v1380_v45, %v1381_v46  ;;  %v793_v60 = vshrl.u32 %v7353_v42, 16  ;;  %v7357_v0 = vld [vmem:[%s7666_s16 + $0x30] sm:$0xff]   ;;  %v7359_v5 = vld [vmem:[%s7666_s16 + $0x38] sm:$0xff]   ;;  %v7358_v6 = vld [vmem:[%s7666_s16 + $0x20] sm:$0xff]   ;;  %p7511_p3 = pnand %p7510_p2, %p7504_p13 }
  0x27   : > { %6365 = vmatprep.mubr.msk.bf16.mxu0 %vm352_vm1, %v7337_v16  ;;  %6385 = vmatprep.mubr.msk.bf16.mxu1 %vm352_vm1, %v7338_v17  ;;  %v776_v53 = vsel %vm756_vm2, %v771_v44, %v775_v43  ;;  %v797_v61 = vshll.u32 %v7355_v49, 16  ;;  %v791_v62 = vrot.slane %v789_v51, 1  ;;  %v1383_v63 = vrot.slane %v7354_v52, 1  ;;  %v7360_v13 = vld [vmem:[%s7666_s16 + $0x28] sm:$0xff]   ;;  %v7362_v29 = vld [vmem:[%s7666_s16 + $0x30] sm:$0xff]   ;;  %v7367_v44 = vld [vmem:[%s7666_s16 + $0x58] sm:$0xff]  }
  0x28   : > { %v768_v39 = vsel %vm756_vm2, %v763_v33, %v767_v30  ;;  %v784_v59 = vsel %vm756_vm2, %v779_v47, %v783_v48  ;;  %v787_v1 = vor.u32 %v785_v55, %v783_v48  ;;  %v1385_v2 = vrot.slane %v7356_v56, 1  ;;  %v7758_v14 = vld [vmem:[%s9134_s2 + $0xc] sm:$0x3]  ;;  %v7364_v33 = vld [vmem:[%s7666_s16 + $0x38] sm:$0xff]   ;;  %v7365_v36 = vld [vmem:[%s7666_s16 + $0x50] sm:$0xff]  }
  0x29   : > { %v795_v3 = vor.u32 %v793_v60, %v791_v62  ;;  %v799_v4 = vrot.slane %v797_v61, 1  ;;  %v1384_v7 = vsel %vm1379_vm3, %v1381_v46, %v1383_v63  ;;  %v805_v9 = vshll.u32 %v7357_v0, 16  ;;  %v7363_v25 = vld [vmem:[%s7666_s16 + $0x48] sm:$0xff]   ;;  %v7366_v45 = vld [vmem:[%s7666_s16 + $0x40] sm:$0xff]  }
  0x2a   : > { %v792_v10 = vsel %vm756_vm2, %v787_v1, %v791_v62  ;;  %v801_v12 = vshrl.u32 %v7355_v49, 16  ;;  %v1386_v16 = vsel %vm1379_vm3, %v1383_v63, %v1385_v2  ;;  %v809_v17 = vshrl.u32 %v7357_v0, 16  ;;  %v7368_v48 = vld [vmem:[%s7666_s16 + $0x48] sm:$0xff]   ;;  %v7369_v56 = vld [vmem:[%s7666_s16 + $0x60] sm:$0xff]   ;;  %v7370_v63 = vld [vmem:[%s7666_s16 + $0x50] sm:$0xff]  }
  0x2b   : > { %v800_v15 = vsel %vm756_vm2, %v795_v3, %v799_v4  ;;  %v1387_v11 = vrot.slane %v7358_v6, 1  ;;  %v1389_v22 = vrot.slane %v7360_v13, 1  ;;  %v817_v27 = vshrl.u32 %v7359_v5, 16  ;;  %v7371_v60 = vld [vmem:[%s7666_s16 + $0x68] sm:$0xff]  }
  0x2c   : > { %v829_v35 = vshll.u32 %v7363_v25, 16  ;;  %v1391_v38 = vrot.slane %v7362_v29, 1  ;;  %v1393_v40 = vrot.slane %v7364_v33, 1  ;;  %v837_v43 = vshll.u32 %v7365_v36, 16 }
  0x2d   : > { %v1388_v26 = vsel %vm1379_vm3, %v1385_v2, %v1387_v11  ;;  %v1390_v31 = vsel %vm1379_vm3, %v1387_v11, %v1389_v22  ;;  %v833_v47 = vshrl.u32 %v7363_v25, 16  ;;  %v1395_v55 = vrot.slane %v7366_v45, 1 }
  0x2e   : > { %6366 = vmatmul.mubr.msk.bf16.gmra.mxu0 %vm352_vm1, %v7339_v18  ;;  %6386 = vmatmul.mubr.msk.bf16.gmra.mxu1 %vm352_vm1, %v7340_v19  ;;  %v813_v18 = vshll.u32 %v7359_v5, 16  ;;  %v807_v19 = vrot.slane %v805_v9, 1  ;;  %v831_v42 = vrot.slane %v829_v35, 1  ;;  %v1392_v46 = vsel %vm1379_vm3, %v1389_v22, %v1391_v38  ;;  %v7379_v35 = vld [vmem:[%s7666_s16 + $0x88] sm:$0xff]  }
  0x2f   : > { %6369 = vmatprep.mubr.msk.bf16.mxu0 %vm352_vm1, %v7341_v20  ;;  %6389 = vmatprep.mubr.msk.bf16.mxu1 %vm352_vm1, %v7342_v21  ;;  %v7361_v20 = vld [vmem:[%s7666_s16 + $0x40] sm:$0xff]   ;;  %v803_v21 = vor.u32 %v801_v12, %v799_v4  ;;  %v839_v52 = vrot.slane %v837_v43, 1  ;;  %v1396_v1 = vsel %vm1379_vm3, %v1393_v40, %v1395_v55  ;;  %v853_v2 = vshll.u32 %v7369_v56, 16  ;;  %v7373_v12 = vld [vmem:[%s7666_s16 + $0x70] sm:$0xff]  }
  0x30   : > { %v811_v23 = vor.u32 %v809_v17, %v807_v19  ;;  %v815_v24 = vrot.slane %v813_v18, 1  ;;  %v849_v4 = vshrl.u32 %v7367_v44, 16  ;;  %v857_v5 = vshrl.u32 %v7369_v56, 16  ;;  %v7375_v18 = vld [vmem:[%s7666_s16 + $0x78] sm:$0xff]  }
  0x31   : > { %v808_v30 = vsel %vm756_vm2, %v803_v21, %v807_v19  ;;  %v861_v6 = vshll.u32 %v7371_v60, 16  ;;  %v1399_v9 = vrot.slane %v7370_v63, 1  ;;  %v869_v19 = vshll.u32 %v7373_v12, 16  ;;  %v7384_v63 = vld [vmem:[%s7666_s16 + $0x8] sm:$0xfe]  }
  0x32   : > { %v893_v45 = vshll.u32 %v7379_v35, 16 }
  0x33   : > { %v863_v17 = vrot.slane %v861_v6, 1 }
  0x36   : > { %6370 = vmatmul.mubr.msk.bf16.gmra.mxu0 %vm352_vm1, %v7343_v28  ;;  %6390 = vmatmul.mubr.msk.bf16.gmra.mxu1 %vm352_vm1, %v7344_v32  ;;  %v821_v28 = vshll.u32 %v7361_v20, 16  ;;  %v825_v32 = vshrl.u32 %v7361_v20, 16  ;;  %v7374_v20 = vld [vmem:[%s7666_s16 + $0x60] sm:$0xff]  }
  0x37   : > { %6373 = vmatprep.mubr.msk.bf16.mxu0 %vm352_vm1, %v7345_v34  ;;  %6395 = vmatprep.mubr.msk.bf16.mxu1 %vm352_vm1, %v768_v39  ;;  %v816_v34 = vsel %vm756_vm2, %v811_v23, %v815_v24  ;;  %v819_v39 = vor.u32 %v817_v27, %v815_v24  ;;  %v865_v23 = vshrl.u32 %v7371_v60, 16  ;;  %v7376_v24 = vld [vmem:[%s7666_s16 + $0x68] sm:$0xff]   ;;  %v877_v27 = vshll.u32 %v7375_v18, 16 }
  0x38   : > { %v823_v37 = vrot.slane %v821_v28, 1  ;;  %v871_v28 = vrot.slane %v869_v19, 1  ;;  %v1403_v29 = vrot.slane %v7374_v20, 1  ;;  %v7389_v60 = vld [vmem:[%s7666_s16 + $0x8] sm:$0xfe]   ;;  %v7392_v19 = vld [vmem:[%s7666_s16 + $0x18] sm:$0xff]  }
  0x39   : > { %v2404_v6 = vshrl.u32 %v7389_v60, 16 }
  0x3a   : > { %v827_v41 = vor.u32 %v825_v32, %v823_v37  ;;  %v824_v49 = vsel %vm756_vm2, %v819_v39, %v823_v37  ;;  %v1405_v32 = vrot.slane %v7376_v24, 1 }
  0x3b   : > { %v2406_v20 = vrot.slane %v2404_v6, 1 }
  0x3c   : > { %v832_v51 = vsel %vm756_vm2, %v827_v41, %v831_v42  ;;  %v881_v41 = vshrl.u32 %v7375_v18, 16 }
  0x3e   : > { %6374 = vmatmul.mubr.msk.bf16.gmra.mxu0 %vm352_vm1, %v7348_v50  ;;  %6396 = vmatmul.mubr.msk.bf16.vlgmr.msra.gmra.mxu1 %vm352_vm1, %v776_v53  ;;  %v1394_v50 = vsel %vm1379_vm3, %v1391_v38, %v1393_v40  ;;  %v841_v53 = vshrl.u32 %v7365_v36, 16  ;;  %v7378_v38 = vld [vmem:[%s7666_s16 + $0x70] sm:$0xff]   ;;  %v1406_v40 = vsel %vm1379_vm3, %v1403_v29, %v1405_v32 }
  0x3f   : > { %6433 = vmatprep.mubr.msk.bf16.mxu0 %vm352_vm1, %v1382_v54  ;;  %6470 = vmatpush3.bf16.msra.mxu1 %v1983_v58  ;;  %v845_v54 = vshll.u32 %v7367_v44, 16  ;;  %v835_v58 = vor.u32 %v833_v47, %v831_v42  ;;  %v7380_v42 = vld [vmem:[%s7666_s16 + $0x78] sm:$0xff]  }
  0x40   : > { %6399 = vmatprep.mubr.msk.bf16.mxu1 %vm352_vm1, %v784_v59  ;;  %6705 = vmatprep.subr.msk.bf16.mxu1 %vm407_vm0, %v7736_v57  ;;  %v1397_v59 = vrot.slane %v7368_v48, 1  ;;  %v843_v61 = vor.u32 %v841_v53, %v839_v52  ;;  %v1407_v48 = vrot.slane %v7378_v38, 1  ;;  %v897_v53 = vshrl.u32 %v7379_v35, 16 }
  0x41   : > { %v847_v62 = vrot.slane %v845_v54, 1  ;;  %v840_v0 = vsel %vm756_vm2, %v835_v58, %v839_v52  ;;  %v895_v52 = vrot.slane %v893_v45, 1  ;;  %v7382_v54 = vld [vmem:[%s7666_s16 + $0x80] sm:$0xff]   ;;  %v7390_v58 = vld [vmem:[%s7666_s16 + $0x10] sm:$0xff]  }
  0x42   : > { %v1398_v3 = vsel %vm1379_vm3, %v1395_v55, %v1397_v59  ;;  %v1400_v11 = vsel %vm1379_vm3, %v1397_v59, %v1399_v9  ;;  %v7383_v55 = vld [vmem:[%s7666_s16 + $0x88] sm:$0xff]   ;;  %v1408_v59 = vsel %vm1379_vm3, %v1405_v32, %v1407_v48 }
  0x43   : > { %v851_v13 = vor.u32 %v849_v4, %v847_v62 }
  0x46   : > { %6434 = vmatmul.mubr.msk.bf16.vlgmr.msra.gmra.mxu0 %vm352_vm1, %v1384_v7  ;;  %6400 = vmatmul.mubr.msk.bf16.gmra.mxu1 %vm352_vm1, %v792_v10  ;;  %v7372_v7 = vld [vmem:[%s7666_s16 + $0x58] sm:$0xff]   ;;  %v855_v10 = vrot.slane %v853_v2, 1  ;;  %v7385_v2 = vld [vmem:[%s7666_s16 + $0x10] sm:$0xff]  }
  0x47   : > { %6508 = vmatpush3.bf16.msra.mxu0 %v2628_v8  ;;  %6403 = vmatprep.mubr.msk.bf16.mxu1 %vm352_vm1, %v800_v15  ;;  %v848_v8 = vsel %vm756_vm2, %v843_v61, %v847_v62  ;;  %v1401_v15 = vrot.slane %v7372_v7, 1  ;;  %v2407_v7 = vshll.u32 %v7389_v60, 16 }
  0x48   : > { %6437 = vmatprep.mubr.msk.bf16.mxu0 %vm352_vm1, %v1386_v16  ;;  %6706 = vmatprep.subr.msk.bf16.mxu0 %vm407_vm0, %v7758_v14  ;;  %v859_v16 = vor.u32 %v857_v5, %v855_v10  ;;  %v856_v21 = vsel %vm756_vm2, %v851_v13, %v855_v10  ;;  %v1413_v5 = vrot.slane %v7383_v55, 1  ;;  %v1891_v10 = vrot.slane %v7384_v63, 1  ;;  %v7386_v13 = vld [vmem:[%s7666_s16 + $0x90] ss:$0 sps:$4 sm:$0x11]  }
  0x49   : > { %v1402_v22 = vsel %vm1379_vm3, %v1399_v9, %v1401_v15  ;;  %v1404_v36 = vsel %vm1379_vm3, %v1401_v15, %v1403_v29  ;;  %v2415_v9 = vshll.u32 %v7390_v58, 16  ;;  %v7387_v15 = vld [vmem:[%s7666_s16 + $0x18] sm:$0xff]   ;;  %v3651_v55 = vsel %vm407_vm0, %v7758_v14, 0 }
  0x4a   : > { %v864_v25 = vsel %vm756_vm2, %v859_v16, %v863_v17  ;;  %v1894_v29 = vrot.slane %v7387_v15, 1 }
  0x4e   : > { %6438 = vmatmul.mubr.msk.bf16.gmra.mxu0 %vm352_vm1, %v1388_v26  ;;  %6404 = vmatmul.mubr.msk.bf16.gmra.mxu1 %vm352_vm1, %v808_v30  ;;  %v873_v26 = vshrl.u32 %v7373_v12, 16  ;;  %v7377_v30 = vld [vmem:[%s7666_s16 + $0x80] sm:$0xff]   ;;  %v1892_v12 = vrot.slane %v7385_v2, 1 }
  0x4f   : > { %6441 = vmatprep.mubr.msk.bf16.mxu0 %vm352_vm1, %v1390_v31  ;;  %6407 = vmatprep.mubr.msk.bf16.mxu1 %vm352_vm1, %v816_v34  ;;  %v867_v31 = vor.u32 %v865_v23, %v863_v17  ;;  %v879_v34 = vrot.slane %v877_v27, 1  ;;  %v885_v37 = vshll.u32 %v7377_v30, 16  ;;  %v889_v44 = vshrl.u32 %v7377_v30, 16 }
  0x50   : > { %v875_v33 = vor.u32 %v873_v26, %v871_v28  ;;  %v2417_v23 = vrot.slane %v2415_v9, 2  ;;  %v1893_v24 = vsel %vm1379_vm3, %v1891_v10, %v1892_v12  ;;  %v1415_v26 = vrot.slane %v7386_v13, 1  ;;  %v7892_v9 = vld [vmem:[%s9134_s2 + $0x10] sm:$0x3] }
  0x51   : > { %v872_v39 = vsel %vm756_vm2, %v867_v31, %v871_v28  ;;  %v887_v47 = vrot.slane %v885_v37, 1  ;;  %v2421_v27 = vshrl.u32 %v7392_v19, 16  ;;  %v2424_v28 = vshll.u32 %v7392_v19, 16 }
  0x52   : > { %v880_v43 = vsel %vm756_vm2, %v875_v33, %v879_v34  ;;  %v1416_v35 = vsel %vm1379_vm3, %v1413_v5, %v1415_v26  ;;  %v7401_v26 = vld [vmem:[%s7666_s16 + $0x50] sm:$0xff]  }
  0x53   : > { %v2423_v37 = vrot.slane %v2421_v27, 1  ;;  %v2426_v38 = vrot.slane %v2424_v28, 2 }
  0x56   : > { %6442 = vmatmul.mubr.msk.bf16.gmra.mxu0 %vm352_vm1, %v1392_v46  ;;  %6408 = vmatmul.mubr.msk.bf16.gmra.mxu1 %vm352_vm1, %v824_v49  ;;  %v7381_v46 = vld [vmem:[%s7666_s16 + $0x90] ss:$0 sps:$4 sm:$0x11]   ;;  %v883_v49 = vor.u32 %v881_v41, %v879_v34  ;;  %v1895_v41 = vsel %vm1379_vm3, %v1892_v12, %v1894_v29 }
  0x57   : > { %6445 = vmatprep.mubr.msk.bf16.mxu0 %vm352_vm1, %v1394_v50  ;;  %6411 = vmatprep.mubr.msk.bf16.mxu1 %vm352_vm1, %v832_v51  ;;  %v1409_v50 = vrot.slane %v7380_v42, 1  ;;  %v891_v51 = vor.u32 %v889_v44, %v887_v47  ;;  %v901_v56 = vshll.u32 %v7381_v46, 16  ;;  %v3140_v42 = vsel %vm407_vm0, %v7736_v57, 0  ;;  %v7398_v44 = vld [vmem:[%s7666_s16 + $0x30] sm:$0xff]  }
  0x58   : > { %v888_v61 = vsel %vm756_vm2, %v883_v49, %v887_v47 }
  0x59   : > { %v1410_v62 = vsel %vm1379_vm3, %v1407_v48, %v1409_v50  ;;  %v903_v4 = vrot.slane %v901_v56, 1  ;;  %v2427_v48 = vor.u32 %v2426_v38, %v2423_v37  ;;  %v7395_v56 = vld [vmem:[%s7666_s16 + $0x38] sm:$0xff]  }
  0x5a   : > { %v1902_v6 = vrot.slane %v7395_v56, 1  ;;  %v7408_v37 = vld [vmem:[%s7666_s16 + $0x58] sm:$0xff]   ;;  %v7412_v56 = vld [vmem:[%s7666_s16 + $0x68] sm:$0xff]  }
  0x5e   : > { %6446 = vmatmul.mubr.msk.bf16.gmra.mxu0 %vm352_vm1, %v1396_v1  ;;  %6412 = vmatmul.mubr.msk.bf16.gmra.mxu1 %vm352_vm1, %v840_v0  ;;  %v896_v0 = vsel %vm756_vm2, %v891_v51, %v895_v52  ;;  %v1411_v1 = vrot.slane %v7382_v54, 1  ;;  %v2448_v51 = vshrl.u32 %v7398_v44, 16 }
  0x5f   : > { %6449 = vmatprep.mubr.msk.bf16.mxu0 %vm352_vm1, %v1398_v3  ;;  %6415 = vmatprep.mubr.msk.bf16.mxu1 %vm352_vm1, %v848_v8  ;;  %v899_v3 = vor.u32 %v897_v53, %v895_v52  ;;  %v2412_v8 = vshrl.u32 %v7390_v58, 16  ;;  %v2451_v52 = vshll.u32 %v7398_v44, 16  ;;  %v7400_v58 = vld [vmem:[%s7666_s16 + $0x38] sm:$0xff]   ;;  %v7410_v44 = vld [vmem:[%s7666_s16 + $0x60] sm:$0xff]  }
  0x60   : > { %v1412_v17 = vsel %vm1379_vm3, %v1409_v50, %v1411_v1  ;;  %v1414_v18 = vsel %vm1379_vm3, %v1411_v1, %v1413_v5  ;;  %v2450_v1 = vrot.slane %v2448_v51, 1  ;;  %v2457_v5 = vshrl.u32 %v7400_v58, 16 }
  0x61   : > { %v904_v16 = vsel %vm756_vm2, %v899_v3, %v903_v4  ;;  %v2453_v2 = vrot.slane %v2451_v52, 2  ;;  %v7402_v3 = vld [vmem:[%s7666_s16 + $0x40] sm:$0xff]   ;;  %v2502_v51 = vshrl.u32 %v7410_v44, 16  ;;  %v2505_v52 = vshll.u32 %v7410_v44, 16  ;;  %v7417_v44 = vld [vmem:[%s7666_s16 + $0x90] sm:$0xff]  }
  0x62   : > { %v2466_v12 = vshrl.u32 %v7402_v3, 16  ;;  %v2469_v13 = vshll.u32 %v7402_v3, 16  ;;  %v7409_v3 = vld [vmem:[%s7666_s16 + $0x70] sm:$0xff]  }
  0x63   : > { %v2454_v10 = vor.u32 %v2453_v2, %v2450_v1  ;;  %v2507_v1 = vrot.slane %v2505_v52, 2  ;;  %v1924_v52 = vrot.slane %v7417_v44, 1 }
  0x66   : > { %6450 = vmatmul.mubr.msk.bf16.gmra.mxu0 %vm352_vm1, %v1400_v11  ;;  %6416 = vmatmul.mubr.msk.bf16.gmra.mxu1 %vm352_vm1, %v856_v21  ;;  %v7388_v11 = vld [vmem:[%s7666_s16 + $0x20] sm:$0xff]   ;;  %v2409_v21 = vrot.slane %v2407_v7, 2 }
  0x67   : > { %6453 = vmatprep.mubr.msk.bf16.mxu0 %vm352_vm1, %v1402_v22  ;;  %6419 = vmatprep.mubr.msk.bf16.mxu1 %vm352_vm1, %v864_v25  ;;  %v2414_v22 = vrot.slane %v2412_v8, 1  ;;  %v7394_v25 = vld [vmem:[%s7666_s16 + $0x20] sm:$0xff]   ;;  %v1896_v32 = vrot.slane %v7388_v11, 1  ;;  %v2460_v8 = vshll.u32 %v7400_v58, 16 }
  0x68   : > { %v2410_v30 = vor.u32 %v2409_v21, %v2406_v20  ;;  %v2430_v33 = vshrl.u32 %v7394_v25, 16  ;;  %v2433_v34 = vshll.u32 %v7394_v25, 16  ;;  %v7406_v20 = vld [vmem:[%s7666_s16 + $0x50] sm:$0xff]  }
  0x69   : > { %v2418_v31 = vor.u32 %v2417_v23, %v2414_v22  ;;  %v1897_v45 = vsel %vm1379_vm3, %v1894_v29, %v1896_v32  ;;  %v2462_v19 = vrot.slane %v2460_v8, 2  ;;  %v2468_v23 = vrot.slane %v2466_v12, 1 }
  0x6a   : > { %v2432_v46 = vrot.slane %v2430_v33, 1  ;;  %v2435_v47 = vrot.slane %v2433_v34, 2  ;;  %v2487_v33 = vshll.u32 %v7406_v20, 16  ;;  %v1908_v34 = vrot.slane %v7401_v26, 1 }
  0x6b   : > { %v1916_v12 = vrot.slane %v7409_v3, 1 }
  0x6c   : > { %v2436_v54 = vor.u32 %v2435_v47, %v2432_v46  ;;  %v7405_v46 = vld [vmem:[%s7666_s16 + $0x60] sm:$0xff]   ;;  %v2493_v47 = vshrl.u32 %v7408_v37, 16 }
  0x6e   : > { %6454 = vmatmul.mubr.msk.bf16.gmra.mxu0 %vm352_vm1, %v1404_v36  ;;  %6420 = vmatmul.mubr.msk.bf16.gmra.mxu1 %vm352_vm1, %v872_v39  ;;  %v7391_v36 = vld [vmem:[%s7666_s16 + $0x28] sm:$0xff]   ;;  %v7393_v39 = vld [vmem:[%s7666_s16 + $0x30] sm:$0xff]   ;;  %v2437_v4 = vsel %vm2402_vm4, %v2427_v48, %v2436_v54 }
  0x6f   : > { %6457 = vmatprep.mubr.msk.bf16.mxu0 %vm352_vm1, %v1406_v40  ;;  %6423 = vmatprep.mubr.msk.bf16.mxu1 %vm352_vm1, %v880_v43  ;;  %v7396_v40 = vld [vmem:[%s7666_s16 + $0x28] sm:$0xff]   ;;  %v2419_v43 = vsel %vm2402_vm4, %v2410_v30, %v2418_v31  ;;  %v1898_v57 = vrot.slane %v7391_v36, 1  ;;  %v1900_v53 = vrot.slane %v7393_v39, 1  ;;  %v2484_v30 = vshrl.u32 %v7406_v20, 16 }
  0x70   : > { %v2439_v49 = vshrl.u32 %v7396_v40, 16  ;;  %v2442_v50 = vshll.u32 %v7396_v40, 16 }
  0x71   : > { %v1899_v63 = vsel %vm1379_vm3, %v1896_v32, %v1898_v57  ;;  %v1901_v14 = vsel %vm1379_vm3, %v1898_v57, %v1900_v53  ;;  %v1903_v21 = vsel %vm1379_vm3, %v1900_v53, %v1902_v6  ;;  %v2486_v40 = vrot.slane %v2484_v30, 1 }
  0x72   : > { %v2441_v60 = vrot.slane %v2439_v49, 1  ;;  %v1912_v53 = vrot.slane %v7405_v46, 1 }
  0x76   : > { %6458 = vmatmul.mubr.msk.bf16.gmra.mxu0 %vm352_vm1, %v1408_v59  ;;  %6424 = vmatmul.mubr.msk.bf16.gmra.mxu1 %vm352_vm1, %v888_v61  ;;  %v2428_v59 = vsel %vm2402_vm4, %v2418_v31, %v2427_v48  ;;  %v2444_v61 = vrot.slane %v2442_v50, 2  ;;  %v2496_v50 = vshll.u32 %v7408_v37, 16 }
  0x77   : > { %6461 = vmatprep.mubr.msk.bf16.mxu0 %vm352_vm1, %v1410_v62  ;;  %6427 = vmatprep.mubr.msk.bf16.mxu1 %vm352_vm1, %v896_v0  ;;  %v7878_v62 = vld [vmem:[%s9134_s2 + $0xe] sm:$0x3]  ;;  %v7397_v0 = vld [vmem:[%s7666_s16 + $0x40] sm:$0xff]  }
  0x78   : > { %v2445_v7 = vor.u32 %v2444_v61, %v2441_v60  ;;  %v1904_v15 = vrot.slane %v7397_v0, 1  ;;  %v7414_v60 = vld [vmem:[%s7666_s16 + $0x70] sm:$0xff]   ;;  %v2504_v0 = vrot.slane %v2502_v51, 1  ;;  %v7424_v51 = vld [vmem:[%s7666_s16 + $0x98] ss:$0 sps:$4 sm:$0x33]  }
  0x7a   : > { %v2446_v11 = vsel %vm2402_vm4, %v2436_v54, %v2445_v7  ;;  %v2455_v22 = vsel %vm2402_vm4, %v2445_v7, %v2454_v10  ;;  %v1905_v25 = vsel %vm1379_vm3, %v1902_v6, %v1904_v15  ;;  %v7407_v54 = vld [vmem:[%s7666_s16 + $0x68] sm:$0xff]   ;;  %v2520_v6 = vshrl.u32 %v7414_v60, 16 }
  0x7b   : > { %v1914_v7 = vrot.slane %v7407_v54, 1  ;;  %v2508_v8 = vor.u32 %v2507_v1, %v2504_v0  ;;  %v7423_v1 = vld [vmem:[%s7666_s16 + $0x10] sm:$0xff]  }
  0x7e   : > { %6462 = vmatmul.mubr.msk.bf16.gmra.mxu0 %vm352_vm1, %v1412_v17  ;;  %6428 = vmatmul.mubr.msk.bf16.gmra.mxu1 %vm352_vm1, %v904_v16  ;;  %v7399_v16 = vld [vmem:[%s7666_s16 + $0x48] sm:$0xff]   ;;  %v2459_v17 = vrot.slane %v2457_v5, 1 }
  0x7f   : > { %6465 = vmatprep.mubr.msk.bf16.mxu0 %vm352_vm1, %v1414_v18  ;;  %6471 = vmatprep.mubr.msk.bf16.mxu1 %vm352_vm1, %v1893_v24  ;;  %v7404_v18 = vld [vmem:[%s7666_s16 + $0x48] sm:$0xff]   ;;  %v2471_v24 = vrot.slane %v2469_v13, 2  ;;  %v1906_v31 = vrot.slane %v7399_v16, 1  ;;  %v7411_v13 = vld [vmem:[%s7666_s16 + $0x78] sm:$0xff]  }
  0x80   : > { %v2475_v27 = vshrl.u32 %v7404_v18, 16  ;;  %v2463_v28 = vor.u32 %v2462_v19, %v2459_v17  ;;  %v2478_v29 = vshll.u32 %v7404_v18, 16  ;;  %v2522_v18 = vrot.slane %v2520_v6, 1 }
  0x81   : > { %v2472_v32 = vor.u32 %v2471_v24, %v2468_v23  ;;  %v1915_v19 = vsel %vm1379_vm3, %v1912_v53, %v1914_v7  ;;  %v1917_v23 = vsel %vm1379_vm3, %v1914_v7, %v1916_v12  ;;  %v7413_v24 = vld [vmem:[%s7666_s16 + $0x80] sm:$0xff]   ;;  %v3049_v7 = vrot.slane %v7423_v1, 2 }
  0x82   : > { %v2477_v36 = vrot.slane %v2475_v27, 1  ;;  %v2464_v38 = vsel %vm2402_vm4, %v2454_v10, %v2463_v28  ;;  %v2480_v39 = vrot.slane %v2478_v29, 2  ;;  %v2523_v10 = vshll.u32 %v7414_v60, 16 }
  0x84   : > { %v2481_v49 = vor.u32 %v2480_v39, %v2477_v36 }
  0x86   : > { %6466 = vmatmul.mubr.msk.bf16.gmra.mxu0 %vm352_vm1, %v1416_v35  ;;  %6472 = vmatmul.mubr.msk.bf16.vlgmr.msra.gmra.mxu1 %vm352_vm1, %v1895_v41  ;;  %v7403_v35 = vld [vmem:[%s7666_s16 + $0x58] sm:$0xff]   ;;  %v1907_v41 = vsel %vm1379_vm3, %v1904_v15, %v1906_v31  ;;  %v2482_v58 = vsel %vm2402_vm4, %v2472_v32, %v2481_v49 }
  0x87   : > { %6509 = vmatprep.mubr.msk.bf16.mxu0 %vm352_vm1, %v2419_v43  ;;  %6546 = vmatpush3.bf16.msra.mxu1 %v3140_v42  ;;  %v2473_v42 = vsel %vm2402_vm4, %v2463_v28, %v2472_v32  ;;  %v2489_v43 = vrot.slane %v2487_v33, 2  ;;  %v1910_v48 = vrot.slane %v7403_v35, 1  ;;  %v1920_v32 = vrot.slane %v7413_v24, 1  ;;  %v7415_v33 = vld [vmem:[%s7666_s16 + $0x88] sm:$0xff]   ;;  %v7421_v35 = vld [vmem:[%s7666_s16 + $0x90] sm:$0xff]  }
  0x88   : > { %6475 = vmatprep.mubr.msk.bf16.mxu1 %vm352_vm1, %v1897_v45  ;;  %6707 = vmatprep.subr.msk.bf16.mxu1 %vm407_vm0, %v7878_v62  ;;  %v1909_v45 = vsel %vm1379_vm3, %v1906_v31, %v1908_v34 }
  0x89   : > { %v2490_v57 = vor.u32 %v2489_v43, %v2486_v40  ;;  %v1911_v61 = vsel %vm1379_vm3, %v1908_v34, %v1910_v48  ;;  %v1913_v2 = vsel %vm1379_vm3, %v1910_v48, %v1912_v53  ;;  %v7420_v34 = vld [vmem:[%s7666_s16 + $0x88] sm:$0xff]   ;;  %v2556_v48 = vshrl.u32 %v7421_v35, 16  ;;  %v7419_v53 = vld [vmem:[%s7666_s16 + $0x98] ss:$0 sps:$4 sm:$0x11]  }
  0x8a   : > { %v2547_v46 = vshrl.u32 %v7420_v34, 16 }
  0x8b   : > { %v2558_v60 = vrot.slane %v2556_v48, 1 }
  0x8e   : > { %6510 = vmatmul.mubr.msk.bf16.vlgmr.msra.gmra.mxu0 %vm352_vm1, %v2428_v59  ;;  %6476 = vmatmul.mubr.msk.bf16.gmra.mxu1 %vm352_vm1, %v1899_v63  ;;  %v2498_v59 = vrot.slane %v2496_v50, 2  ;;  %v2491_v63 = vsel %vm2402_vm4, %v2481_v49, %v2490_v57 }
  0x8f   : > { %6584 = vmatpush3.bf16.msra.mxu0 %v3651_v55  ;;  %6479 = vmatprep.mubr.msk.bf16.mxu1 %vm352_vm1, %v1901_v14  ;;  %v2495_v55 = vrot.slane %v2493_v47, 1  ;;  %v2511_v14 = vshrl.u32 %v7412_v56, 16  ;;  %v2550_v47 = vshll.u32 %v7420_v34, 16 }
  0x90   : > { %6513 = vmatprep.mubr.msk.bf16.mxu0 %vm352_vm1, %v2437_v4  ;;  %6708 = vmatprep.subr.msk.bf16.mxu0 %vm407_vm0, %v7892_v9  ;;  %v2514_v4 = vshll.u32 %v7412_v56, 16 }
  0x91   : > { %v2499_v5 = vor.u32 %v2498_v59, %v2495_v55  ;;  %v2513_v15 = vrot.slane %v2511_v14, 1  ;;  %v2549_v55 = vrot.slane %v2547_v46, 1  ;;  %v2552_v56 = vrot.slane %v2550_v47, 2 }
  0x92   : > { %v2516_v16 = vrot.slane %v2514_v4, 2  ;;  %v2568_v14 = vshll.u32 %v7424_v51, 16  ;;  %v1926_v4 = vrot.slane %v7419_v53, 1  ;;  %v7440_v53 = vld [vmem:[%s7666_s16 + $0x48] sm:$0xff]  }
  0x93   : > { %v2500_v17 = vsel %vm2402_vm4, %v2490_v57, %v2499_v5  ;;  %v2509_v20 = vsel %vm2402_vm4, %v2499_v5, %v2508_v8  ;;  %v2559_v57 = vshll.u32 %v7421_v35, 16  ;;  %v2553_v3 = vor.u32 %v2552_v56, %v2549_v55  ;;  %v7439_v55 = vld [vmem:[%s7666_s16 + $0x50] sm:$0xff]  }
  0x94   : > { %v2517_v26 = vor.u32 %v2516_v16, %v2513_v15  ;;  %v7428_v15 = vld [vmem:[%s7666_s16 + $0x18] sm:$0xff]   ;;  %v1927_v16 = vsel %vm1379_vm3, %v1924_v52, %v1926_v4  ;;  %v3065_v1 = vrot.slane %v7439_v55, 2  ;;  %v7442_v4 = vld [vmem:[%s7666_s16 + $0x50] sm:$0xff]  }
  0x96   : > { %6514 = vmatmul.mubr.msk.bf16.gmra.mxu0 %vm352_vm1, %v2446_v11  ;;  %6480 = vmatmul.mubr.msk.bf16.gmra.mxu1 %vm352_vm1, %v1903_v21  ;;  %v7416_v11 = vld [vmem:[%s7666_s16 + $0x78] sm:$0xff]   ;;  %v2525_v21 = vrot.slane %v2523_v10, 2  ;;  %v2518_v36 = vsel %vm2402_vm4, %v2508_v8, %v2517_v26 }
  0x97   : > { %6517 = vmatprep.mubr.msk.bf16.mxu0 %vm352_vm1, %v2455_v22  ;;  %6483 = vmatprep.mubr.msk.bf16.mxu1 %vm352_vm1, %v1905_v25  ;;  %v7418_v22 = vld [vmem:[%s7666_s16 + $0x80] sm:$0xff]   ;;  %v1918_v25 = vrot.slane %v7411_v13, 1  ;;  %v2529_v27 = vshrl.u32 %v7416_v11, 16  ;;  %v2532_v28 = vshll.u32 %v7416_v11, 16  ;;  %v7425_v10 = vld [vmem:[%s7666_s16 + $0x18] sm:$0xff]   ;;  %v2570_v13 = vrot.slane %v2568_v14, 2 }
  0x98   : > { %v2526_v29 = vor.u32 %v2525_v21, %v2522_v18  ;;  %v2538_v30 = vshrl.u32 %v7418_v22, 16  ;;  %v2541_v31 = vshll.u32 %v7418_v22, 16  ;;  %v7427_v18 = vld [vmem:[%s7666_s16 + $0x10] sm:$0xfc]   ;;  %v3051_v21 = vrot.slane %v7425_v10, 2  ;;  %v7444_v10 = vld [vmem:[%s7666_s16 + $0x58] sm:$0xff]  }
  0x99   : > { %v2531_v37 = vrot.slane %v2529_v27, 1  ;;  %v1919_v39 = vsel %vm1379_vm3, %v1916_v12, %v1918_v25  ;;  %v1921_v43 = vsel %vm1379_vm3, %v1918_v25, %v1920_v32  ;;  %v3559_v22 = vrot.slane %v7427_v18, 2  ;;  %v7430_v27 = vld [vmem:[%s7666_s16 + $0x20] sm:$0xff]  }
  0x9a   : > { %v2527_v40 = vsel %vm2402_vm4, %v2517_v26, %v2526_v29  ;;  %v7429_v26 = vld [vmem:[%s7666_s16 + $0x28] sm:$0xff]   ;;  %v3562_v34 = vrot.slane %v7430_v27, 2  ;;  %v3574_v18 = vrot.slane %v7442_v4, 2 }
  0x9b   : > { %v3055_v35 = vrot.slane %v7429_v26, 2  ;;  %v7446_v26 = vld [vmem:[%s7666_s16 + $0x60] sm:$0xff]  }
  0x9e   : > { %6518 = vmatmul.mubr.msk.bf16.gmra.mxu0 %vm352_vm1, %v2464_v38  ;;  %6484 = vmatmul.mubr.msk.bf16.gmra.mxu1 %vm352_vm1, %v1907_v41  ;;  %v2534_v38 = vrot.slane %v2532_v28, 2  ;;  %v2540_v41 = vrot.slane %v2538_v30, 1  ;;  %v3052_v28 = vsel %vm3047_vm5, %v3049_v7, %v3051_v21  ;;  %v7431_v30 = vld [vmem:[%s7666_s16 + $0x30] sm:$0xff]  }
  0x9f   : > { %6521 = vmatprep.mubr.msk.bf16.mxu0 %vm352_vm1, %v2473_v42  ;;  %6487 = vmatprep.mubr.msk.bf16.mxu1 %vm352_vm1, %v1909_v45  ;;  %v2543_v42 = vrot.slane %v2541_v31, 2  ;;  %v1922_v45 = vrot.slane %v7415_v33, 1  ;;  %v4296_v31 = vsel %vm407_vm0, %v7878_v62, 0  ;;  %v7432_v33 = vld [vmem:[%s7666_s16 + $0x28] sm:$0xff]  }
  0xa0   : > { %v2535_v49 = vor.u32 %v2534_v38, %v2531_v37  ;;  %v3564_v37 = vrot.slane %v7432_v33, 2  ;;  %v7433_v38 = vld [vmem:[%s7666_s16 + $0x38] sm:$0xff]  }
  0xa1   : > { %v2544_v50 = vor.u32 %v2543_v42, %v2540_v41  ;;  %v1925_v0 = vsel %vm1379_vm3, %v1922_v45, %v1924_v52  ;;  %v4808_v41 = vsel %vm407_vm0, %v7892_v9, 0  ;;  %v7436_v42 = vld [vmem:[%s7666_s16 + $0x38] sm:$0xff]   ;;  %v3059_v9 = vrot.slane %v7433_v38, 2  ;;  %v7437_v52 = vld [vmem:[%s7666_s16 + $0x48] sm:$0xff]  }
  0xa2   : > { %v2536_v54 = vsel %vm2402_vm4, %v2526_v29, %v2535_v49  ;;  %v3565_v44 = vsel %vm3047_vm5, %v3562_v34, %v3564_v37  ;;  %v3568_v47 = vrot.slane %v7436_v42, 2 }
  0xa3   : > { %v2545_v59 = vsel %vm2402_vm4, %v2535_v49, %v2544_v50  ;;  %v2554_v12 = vsel %vm2402_vm4, %v2544_v50, %v2553_v3  ;;  %v7438_v50 = vld [vmem:[%s7666_s16 + $0x40] sm:$0xff]  }
  0xa6   : > { %6522 = vmatmul.mubr.msk.bf16.gmra.mxu0 %vm352_vm1, %v2482_v58  ;;  %6488 = vmatmul.mubr.msk.bf16.gmra.mxu1 %vm352_vm1, %v1911_v61  ;;  %v1923_v58 = vsel %vm1379_vm3, %v1920_v32, %v1922_v45  ;;  %v2561_v61 = vrot.slane %v2559_v57, 2  ;;  %v7435_v45 = vld [vmem:[%s7666_s16 + $0x40] sm:$0xff]  }
  0xa7   : > { %6525 = vmatprep.mubr.msk.bf16.mxu0 %vm352_vm1, %v2491_v63  ;;  %6491 = vmatprep.mubr.msk.bf16.mxu1 %vm352_vm1, %v1913_v2  ;;  %v7422_v63 = vld [vmem:[%s7666_s16 + $0x8] sm:$0xfc]   ;;  %v2565_v2 = vshrl.u32 %v7424_v51, 16  ;;  %v3061_v48 = vrot.slane %v7435_v45, 2  ;;  %v7450_v45 = vld [vmem:[%s7666_s16 + $0x70] sm:$0xff]  }
  0xa8   : > { %v2562_v5 = vor.u32 %v2561_v61, %v2558_v60  ;;  %v3048_v6 = vrot.slane %v7422_v63, 2  ;;  %v3063_v61 = vrot.slane %v7437_v52, 2  ;;  %v3572_v63 = vrot.slane %v7440_v53, 2 }
  0xa9   : > { %v2567_v8 = vrot.slane %v2565_v2, 1 }
  0xaa   : > { %v3050_v11 = vsel %vm3047_vm5, %v3048_v6, %v3049_v7  ;;  %v3064_v6 = vsel %vm3047_vm5, %v3061_v48, %v3063_v61 }
  0xae   : > { %6526 = vmatmul.mubr.msk.bf16.gmra.mxu0 %vm352_vm1, %v2500_v17  ;;  %6492 = vmatmul.mubr.msk.bf16.gmra.mxu1 %vm352_vm1, %v1915_v19  ;;  %v2563_v17 = vsel %vm2402_vm4, %v2553_v3, %v2562_v5  ;;  %v7426_v19 = vld [vmem:[%s7666_s16 + $0x20] sm:$0xff]  }
  0xaf   : > { %6529 = vmatprep.mubr.msk.bf16.mxu0 %vm352_vm1, %v2509_v20  ;;  %6495 = vmatprep.mubr.msk.bf16.mxu1 %vm352_vm1, %v1917_v23  ;;  %v2571_v20 = vor.u32 %v2570_v13, %v2567_v8  ;;  %v3560_v23 = vrot.slane %v7428_v15, 2  ;;  %v3053_v24 = vrot.slane %v7426_v19, 2  ;;  %v7441_v8 = vld [vmem:[%s7666_s16 + $0x58] sm:$0xff]   ;;  %v3066_v13 = vsel %vm3047_vm5, %v3063_v61, %v3065_v1  ;;  %v7443_v15 = vld [vmem:[%s7666_s16 + $0x60] sm:$0xff]  }
  0xb0   : > { %v3067_v19 = vrot.slane %v7441_v8, 2  ;;  %v7454_v8 = vld [vmem:[%s7666_s16 + $0x80] sm:$0xff]  }
  0xb1   : > { %v2572_v25 = vsel %vm2402_vm4, %v2562_v5, %v2571_v20  ;;  %v3561_v29 = vsel %vm3047_vm5, %v3559_v22, %v3560_v23  ;;  %v3054_v32 = vsel %vm3047_vm5, %v3051_v21, %v3053_v24  ;;  %v3563_v62 = vsel %vm3047_vm5, %v3560_v23, %v3562_v34  ;;  %v7447_v34 = vld [vmem:[%s7666_s16 + $0x70] sm:$0xff]  }
  0xb2   : > { %v3576_v20 = vrot.slane %v7444_v10, 2  ;;  %v3069_v22 = vrot.slane %v7443_v15, 2 }
  0xb4   : > { %v3070_v33 = vsel %vm3047_vm5, %v3067_v19, %v3069_v22 }
  0xb6   : > { %6530 = vmatmul.mubr.msk.bf16.gmra.mxu0 %vm352_vm1, %v2518_v36  ;;  %6496 = vmatmul.mubr.msk.bf16.gmra.mxu1 %vm352_vm1, %v1919_v39  ;;  %v3057_v36 = vrot.slane %v7431_v30, 2  ;;  %v7434_v39 = vld [vmem:[%s7666_s16 + $0x30] sm:$0xff]   ;;  %v7445_v30 = vld [vmem:[%s7666_s16 + $0x68] sm:$0xff]  }
  0xb7   : > { %6533 = vmatprep.mubr.msk.bf16.mxu0 %vm352_vm1, %v2527_v40  ;;  %6499 = vmatprep.mubr.msk.bf16.mxu1 %vm352_vm1, %v1921_v43  ;;  %v3056_v40 = vsel %vm3047_vm5, %v3053_v24, %v3055_v35  ;;  %v3566_v46 = vrot.slane %v7434_v39, 2  ;;  %v3071_v38 = vrot.slane %v7445_v30, 2 }
  0xb8   : > { %v3058_v43 = vsel %vm3047_vm5, %v3055_v35, %v3057_v36  ;;  %v3060_v57 = vsel %vm3047_vm5, %v3057_v36, %v3059_v9 }
  0xb9   : > { %v3567_v49 = vsel %vm3047_vm5, %v3564_v37, %v3566_v46  ;;  %v3569_v51 = vsel %vm3047_vm5, %v3566_v46, %v3568_v47  ;;  %v3578_v37 = vrot.slane %v7446_v26, 2  ;;  %v7460_v26 = vld [vmem:[%s7666_s16 + $0x10] sm:$0xfc]  }
  0xbe   : > { %6534 = vmatmul.mubr.msk.bf16.gmra.mxu0 %vm352_vm1, %v2536_v54  ;;  %6500 = vmatmul.mubr.msk.bf16.gmra.mxu1 %vm352_vm1, %v1923_v58  ;;  %v3062_v54 = vsel %vm3047_vm5, %v3059_v9, %v3061_v48  ;;  %v3072_v9 = vsel %vm3047_vm5, %v3069_v22, %v3071_v38  ;;  %v7449_v48 = vld [vmem:[%s7666_s16 + $0x78] sm:$0xff]  }
  0xbf   : > { %6537 = vmatprep.mubr.msk.bf16.mxu0 %vm352_vm1, %v2545_v59  ;;  %6503 = vmatprep.mubr.msk.bf16.mxu1 %vm352_vm1, %v1925_v0  ;;  %v3570_v59 = vrot.slane %v7438_v50, 2 }
  0xc1   : > { %v3571_v14 = vsel %vm3047_vm5, %v3568_v47, %v3570_v59  ;;  %v3573_v7 = vsel %vm3047_vm5, %v3570_v59, %v3572_v63  ;;  %v3075_v59 = vrot.slane %v7449_v48, 2 }
  0xc6   : > { %6538 = vmatmul.mubr.msk.bf16.gmra.mxu0 %vm352_vm1, %v2554_v12  ;;  %6504 = vmatmul.mubr.msk.bf16.gmra.mxu1 %vm352_vm1, %v1927_v16 }
  0xc7   : > { %6541 = vmatprep.mubr.msk.bf16.mxu0 %vm352_vm1, %v2563_v17  ;;  %6547 = vmatprep.mubr.msk.bf16.mxu1 %vm352_vm1, %v3050_v11 }
  0xce   : > { %6542 = vmatmul.mubr.msk.bf16.gmra.mxu0 %vm352_vm1, %v2572_v25  ;;  %6548 = vmatmul.mubr.msk.bf16.vlgmr.msra.gmra.mxu1 %vm352_vm1, %v3052_v28  ;;  %v3575_v25 = vsel %vm3047_vm5, %v3572_v63, %v3574_v18  ;;  %v3068_v28 = vsel %vm3047_vm5, %v3065_v1, %v3067_v19  ;;  %v7461_v19 = vld [vmem:[%s7666_s16 + $0x18] sm:$0xff]  }
  0xcf   : > { %6585 = vmatprep.mubr.msk.bf16.mxu0 %vm352_vm1, %v3561_v29  ;;  %6622 = vmatpush3.bf16.msra.mxu1 %v4296_v31  ;;  %v3577_v29 = vsel %vm3047_vm5, %v3574_v18, %v3576_v20  ;;  %v7448_v31 = vld [vmem:[%s7666_s16 + $0x68] sm:$0xff]  }
  0xd0   : > { %6551 = vmatprep.mubr.msk.bf16.mxu1 %vm352_vm1, %v3054_v32  ;;  %v3580_v39 = vrot.slane %v7448_v31, 2  ;;  %v8126_v18 = vld [vmem:[%s7666_s16 + $0x88] sm:$0xff]   ;;  %v3586_v31 = vrot.slane %v7454_v8, 2  ;;  %v7457_v8 = vld [vmem:[%s7666_s16 + $0x98] ss:$0 sps:$4 sm:$0x33]  }
  0xd2   : > { %v3581_v47 = vsel %vm3047_vm5, %v3578_v37, %v3580_v39 }
  0xd6   : > { %6586 = vmatmul.mubr.msk.bf16.vlgmr.msra.gmra.mxu0 %vm352_vm1, %v3563_v62  ;;  %6552 = vmatmul.mubr.msk.bf16.gmra.mxu1 %vm352_vm1, %v3056_v40 }
  0xd7   : > { %6660 = vmatpush3.bf16.msra.mxu0 %v4808_v41  ;;  %6555 = vmatprep.mubr.msk.bf16.mxu1 %vm352_vm1, %v3058_v43  ;;  %v3073_v41 = vrot.slane %v7447_v34, 2 }
  0xd8   : > { %6589 = vmatprep.mubr.msk.bf16.mxu0 %vm352_vm1, %v3565_v44  ;;  %v3579_v44 = vsel %vm3047_vm5, %v3576_v20, %v3578_v37  ;;  %v3588_v37 = vrot.slane %v8126_v18, 2 }
  0xde   : > { %v8018_v56 = vpop.f32.mrf.mxu0  ;;  %6590 = vmatmul.mubr.msk.bf16.gmra.mxu0 %vm352_vm1, %v3567_v49  ;;  %v8021_v58 = vpop.f32.mrf.mxu1  ;;  %6556 = vmatmul.mubr.msk.bf16.gmra.mxu1 %vm352_vm1, %v3060_v57  ;;  %v7452_v49 = vld [vmem:[%s7666_s16 + $0x78] sm:$0xff]   ;;  %v3074_v57 = vsel %vm3047_vm5, %v3071_v38, %v3073_v41  ;;  %v4080_v38 = vshrl.u32 %v7461_v19, 16 }
  0xdf   : > { %6593 = vmatprep.mubr.msk.bf16.mxu0 %vm352_vm1, %v3569_v51  ;;  %6559 = vmatprep.mubr.msk.bf16.mxu1 %vm352_vm1, %v3062_v54  ;;  %v7451_v51 = vld [vmem:[%s7666_s16 + $0x80] sm:$0xff]   ;;  %v3582_v54 = vrot.slane %v7450_v45, 2  ;;  %v3584_v61 = vrot.slane %v7452_v49, 2  ;;  %v4072_v45 = vshrl.u32 %v7460_v26, 16 }
  0xe0   : > { %v8025_v60 = vpop.f32.mrf.mxu0  ;;  %v8028_v0 = vpop.f32.mrf.mxu1  ;;  %v3077_v1 = vrot.slane %v7451_v51, 2  ;;  %v7458_v51 = vld [vmem:[%s7666_s16 + $0x90] sm:$0xff]  }
  0xe1   : > { %v3585_v15 = vsel %vm3047_vm5, %v3582_v54, %v3584_v61 }
  0xe2   : > { %v8030_v2 = vpop.f32.mrf.mxu0  ;;  %v8032_v3 = vpop.f32.mrf.mxu1  ;;  %v3078_v22 = vsel %vm3047_vm5, %v3075_v59, %v3077_v1 }
  0xe4   : > { %v8036_v5 = vpop.f32.mrf.mxu0  ;;  %v8042_v12 = vpop.f32.mrf.mxu1 }
  0xe6   : > { %v8046_v16 = vpop.f32.mrf.mxu0  ;;  %6594 = vmatmul.mubr.msk.bf16.gmra.mxu0 %vm352_vm1, %v3571_v14  ;;  %v8049_v17 = vpop.f32.mrf.mxu1  ;;  %6560 = vmatmul.mubr.msk.bf16.gmra.mxu1 %vm352_vm1, %v3064_v6  ;;  %v3583_v6 = vsel %vm3047_vm5, %v3580_v39, %v3582_v54  ;;  %v4083_v39 = vshll.u32 %v7461_v19, 16  ;;  %v7463_v54 = vld [vmem:[%s7666_s16 + $0x20] sm:$0xff]  }
  0xe7   : > { %6597 = vmatprep.mubr.msk.bf16.mxu0 %vm352_vm1, %v3573_v7  ;;  %6563 = vmatprep.mubr.msk.bf16.mxu1 %vm352_vm1, %v3066_v13  ;;  %v7453_v7 = vld [vmem:[%s7666_s16 + $0x88] sm:$0xff]   ;;  %v3076_v13 = vsel %vm3047_vm5, %v3073_v41, %v3075_v59 }
  0xe8   : > { %v8053_v11 = vpop.f32.mrf.mxu0  ;;  %v8056_v21 = vpop.f32.mrf.mxu1  ;;  %v3079_v30 = vrot.slane %v7453_v7, 2  ;;  %v3589_v7 = vsel %vm3047_vm5, %v3586_v31, %v3588_v37 }
  0xea   : > { %v8058_v23 = vpop.f32.mrf.mxu0  ;;  %v8060_v24 = vpop.f32.mrf.mxu1  ;;  %v3080_v49 = vsel %vm3047_vm5, %v3077_v1, %v3079_v30 }
  0xec   : > { %v8064_v27 = vpop.f32.mrf.mxu0  ;;  %v8070_v32 = vpop.f32.mrf.mxu1 }
  0xee   : > { %v8074_v35 = vpop.f32.mrf.mxu0  ;;  %6598 = vmatmul.mubr.msk.bf16.gmra.mxu0 %vm352_vm1, %v3575_v25  ;;  %v8077_v36 = vpop.f32.mrf.mxu1  ;;  %6564 = vmatmul.mubr.msk.bf16.gmra.mxu1 %vm352_vm1, %v3068_v28  ;;  %v8133_v25 = vld [vmem:[%s7666_s16 + $0x90] sm:$0xff]  }
  0xef   : > { %6601 = vmatprep.mubr.msk.bf16.mxu0 %vm352_vm1, %v3577_v29  ;;  %6567 = vmatprep.mubr.msk.bf16.mxu1 %vm352_vm1, %v3070_v33 }
  0xf0   : > { %v8081_v62 = vpop.f32.mrf.mxu0  ;;  %v8084_v40 = vpop.f32.mrf.mxu1 }
  0xf2   : > { %v8086_v42 = vpop.f32.mrf.mxu0  ;;  %v8088_v43 = vpop.f32.mrf.mxu1 }
  0xf4   : > { %v8092_v46 = vpop.f32.mrf.mxu0  ;;  %v8098_v50 = vpop.f32.mrf.mxu1 }
  0xf6   : > { %v8102_v52 = vpop.f32.mrf.mxu0  ;;  %6602 = vmatmul.mubr.msk.bf16.gmra.mxu0 %vm352_vm1, %v3579_v44  ;;  %v8105_v53 = vpop.f32.mrf.mxu1  ;;  %6568 = vmatmul.mubr.msk.bf16.gmra.mxu1 %vm352_vm1, %v3072_v9  ;;  %v3081_v44 = vrot.slane %v8133_v25, 2  ;;  %v4075_v9 = vshll.u32 %v7460_v26, 16  ;;  %v7464_v25 = vld [vmem:[%s7666_s16 + $0x28] sm:$0xff]  }
  0xf7   : > { %6605 = vmatprep.mubr.msk.bf16.mxu0 %vm352_vm1, %v3581_v47  ;;  %6571 = vmatprep.mubr.msk.bf16.mxu1 %vm352_vm1, %v3074_v57  ;;  %v3587_v57 = vsel %vm3047_vm5, %v3584_v61, %v3586_v31  ;;  %v3590_v31 = vrot.slane %v7458_v51, 2  ;;  %v4101_v51 = vshll.u32 %v7464_v25, 16 }
  0xf8   : > { %v8109_v55 = vpop.f32.mrf.mxu0  ;;  %v8112_v63 = vpop.f32.mrf.mxu1  ;;  %v3082_v19 = vsel %vm3047_vm5, %v3079_v30, %v3081_v44  ;;  %v4077_v1 = vrot.slane %v4075_v9, 3 }
  0xfa   : > { %v8114_v14 = vpop.f32.mrf.mxu0  ;;  %v8116_v4 = vpop.f32.mrf.mxu1 }
  0xfc   : > { %v8121_v10 = vpop.f32.mrf.mxu0  ;;  %v8129_v20 = vpop.f32.mrf.mxu1 }
  0xfe   : > { %v8136_v28 = vpop.f32.mrf.mxu0  ;;  %6606 = vmatmul.mubr.msk.bf16.gmra.mxu0 %vm352_vm1, %v3583_v6  ;;  %v6397_v29 = vpop.f32.mrf.mxu1  ;;  %6572 = vmatmul.mubr.msk.bf16.gmra.mxu1 %vm352_vm1, %v3076_v13  ;;  %v8160_v13 = vld [vmem:[%s7666_s16 + $0x98] sm:$0xff]  }
  0xff   : > { %6609 = vmatprep.mubr.msk.bf16.mxu0 %vm352_vm1, %v3585_v15  ;;  %v1177_v33 = vadd.f32 %v6397_v29, %v8018_v56  ;;  %6575 = vmatprep.mubr.msk.bf16.mxu1 %vm352_vm1, %v3078_v22  ;;  %v4085_v15 = vrot.slane %v4083_v39, 3  ;;  %v4074_v22 = vrot.slane %v4072_v45, 2  ;;  %v4092_v39 = vshll.u32 %v7463_v54, 16 }
 0x100   : > { %v8142_v34 = vpop.f32.mrf.mxu0  ;;  %v996_v41 = vpop.f32.mrf.mxu1  ;;  %v3592_v45 = vrot.slane %v8160_v13, 2 }
 0x101   : > { %v1175_v47 = vadd.f32 %v996_v41, %v8025_v60  ;;  %v4082_v60 = vrot.slane %v4080_v38, 2  ;;  %v4089_v38 = vshrl.u32 %v7463_v54, 16 }
 0x102   : > { %v8148_v48 = vpop.f32.mrf.mxu0  ;;  %v6398_v56 = vpop.f32.mrf.mxu1 }
 0x103   : > { %v1178_v59 = vadd.f32 %v6398_v56, %v8030_v2  ;;  %v4086_v9 = vor.u32 %v4085_v15, %v4082_v60  ;;  %v4091_v13 = vrot.slane %v4089_v38, 2  ;;  %v4094_v60 = vrot.slane %v4092_v39, 3  ;;  %v7469_v38 = vld [vmem:[%s7666_s16 + $0x38] sm:$0xff]  }
 0x104   : > { %v8155_v6 = vpop.f32.mrf.mxu0  ;;  %v999_v18 = vpop.f32.mrf.mxu1 }
 0x105   : > { %v1176_v61 = vadd.f32 %v999_v18, %v8036_v5  ;;  %v3083_v5 = vrot.slane %v7457_v8, 2  ;;  %v3591_v8 = vsel %vm3047_vm5, %v3588_v37, %v3590_v31  ;;  %v4103_v37 = vrot.slane %v4101_v51, 3 }
 0x106   : > { %v6435_v26 = vpop.f32.mrf.mxu0  ;;  %6610 = vmatmul.mubr.msk.bf16.gmra.mxu0 %vm352_vm1, %v3587_v57  ;;  %v6401_v2 = vpop.f32.mrf.mxu1  ;;  %6576 = vmatmul.mubr.msk.bf16.gmra.mxu1 %vm352_vm1, %v3080_v49  ;;  %v4078_v49 = vor.u32 %v4077_v1, %v4074_v22  ;;  %v4098_v57 = vshrl.u32 %v7464_v25, 16  ;;  %v7465_v25 = vld [vmem:[%s7666_s16 + $0x10] sm:$0xf8]  }
 0x107   : > { %v8166_v29 = vadd.f32 %v6435_v26, %v1177_v33  ;;  %6613 = vmatprep.mubr.msk.bf16.mxu0 %vm352_vm1, %v3589_v7  ;;  %v1181_v30 = vadd.f32 %v6401_v2, %v8046_v16  ;;  %6579 = vmatprep.mubr.msk.bf16.mxu1 %vm352_vm1, %v3082_v19  ;;  %v7462_v16 = vld [vmem:[%s7666_s16 + $0xa0] ss:$0 sps:$4 sm:$0x33]   ;;  %v3084_v1 = vsel %vm3047_vm5, %v3081_v44, %v3083_v5  ;;  %v7467_v26 = vld [vmem:[%s7666_s16 + $0x30] sm:$0xff]  }
 0x108   : > { %v1508_v41 = vpop.f32.mrf.mxu0  ;;  %v1012_v33 = vpop.f32.mrf.mxu1  ;;  %v4110_v51 = vshll.u32 %v7467_v26, 16 }
 0x109   : > { %v8173_v56 = vadd.f32 %v1508_v41, %v1175_v47  ;;  %v1179_v54 = vadd.f32 %v1012_v33, %v8053_v11  ;;  %v8181_v47 = vld [vmem:[%s7666_s16 + $0x18] sm:$0xff]   ;;  %v3593_v11 = vsel %vm3047_vm5, %v3590_v31, %v3592_v45  ;;  %v4100_v33 = vrot.slane %v4098_v57, 2 }
 0x10a   : > { %v6436_v7 = vpop.f32.mrf.mxu0  ;;  %v6402_v18 = vpop.f32.mrf.mxu1  ;;  %v4717_v31 = vrot.slane %v8181_v47, 3  ;;  %v4107_v57 = vshrl.u32 %v7467_v26, 16  ;;  %v8210_v26 = vld [vmem:[%s7666_s16 + $0x28] sm:$0xff]  }
 0x10b   : > { %v8177_v19 = vadd.f32 %v6436_v7, %v1178_v59  ;;  %v1182_v15 = vadd.f32 %v6402_v18, %v8058_v23  ;;  %v4087_v59 = vsel %vm4070_vm6, %v4078_v49, %v4086_v9  ;;  %v3594_v23 = vrot.slane %v7462_v16, 2 }
 0x10c   : > { %v1511_v22 = vpop.f32.mrf.mxu0  ;;  %v1015_v2 = vpop.f32.mrf.mxu1 }
 0x10d   : > { %v8188_v41 = vadd.f32 %v1511_v22, %v1176_v61  ;;  %v1180_v39 = vadd.f32 %v1015_v2, %v8064_v27  ;;  %v4095_v61 = vor.u32 %v4094_v60, %v4091_v13  ;;  %v4716_v27 = vrot.slane %v7465_v25, 3  ;;  %v7468_v2 = vld [vmem:[%s7666_s16 + $0x20] sm:$0xff]  }
 0x10e   : > { %v6439_v7 = vpop.f32.mrf.mxu0  ;;  %6614 = vmatmul.mubr.msk.bf16.gmra.mxu0 %vm352_vm1, %v3591_v8  ;;  %v6405_v18 = vpop.f32.mrf.mxu1  ;;  %6580 = vmatmul.mubr.msk.bf16.gmra.mxu1 %vm352_vm1, %v3084_v1  ;;  %v4104_v8 = vor.u32 %v4103_v37, %v4100_v33  ;;  %v4116_v22 = vshrl.u32 %v7469_v38, 16  ;;  %v4119_v13 = vshll.u32 %v7469_v38, 16  ;;  %v4109_v37 = vrot.slane %v4107_v57, 2 }
 0x10f   : > { %v8194_v44 = vadd.f32 %v6439_v7, %v1181_v30  ;;  %6617 = vmatprep.mubr.msk.bf16.mxu0 %vm352_vm1, %v3593_v11  ;;  %v1185_v5 = vadd.f32 %v6405_v18, %v8074_v35  ;;  %6623 = vmatprep.mubr.msk.bf16.mxu1 %vm352_vm1, %v4087_v59  ;;  %v3595_v11 = vsel %vm3047_vm5, %v3592_v45, %v3594_v23  ;;  %v4112_v38 = vrot.slane %v4110_v51, 3  ;;  %v7473_v23 = vld [vmem:[%s7666_s16 + $0x48] sm:$0xff]  }
 0x110   : > { %v1524_v49 = vpop.f32.mrf.mxu0  ;;  %v1028_v30 = vpop.f32.mrf.mxu1  ;;  %v4096_v25 = vsel %vm4070_vm6, %v4086_v9, %v4095_v61  ;;  %v4718_v33 = vsel %vm4715_vm7, %v4716_v27, %v4717_v31  ;;  %v4121_v45 = vrot.slane %v4119_v13, 3  ;;  %v4719_v27 = vrot.slane %v7468_v2, 3 }
 0x111   : > { %v8201_v16 = vadd.f32 %v1524_v49, %v1179_v54  ;;  %v1183_v60 = vadd.f32 %v1028_v30, %v8081_v62  ;;  %v7471_v62 = vld [vmem:[%s7666_s16 + $0x40] sm:$0xff]   ;;  %v4118_v49 = vrot.slane %v4116_v22, 2 }
 0x112   : > { %v6440_v47 = vpop.f32.mrf.mxu0  ;;  %v6406_v1 = vpop.f32.mrf.mxu1  ;;  %v4125_v51 = vshrl.u32 %v7471_v62, 16  ;;  %v4128_v22 = vshll.u32 %v7471_v62, 16  ;;  %v7475_v62 = vld [vmem:[%s7666_s16 + $0x50] sm:$0xff]  }
 0x113   : > { %v8204_v35 = vadd.f32 %v6440_v47, %v1182_v15  ;;  %v1186_v54 = vadd.f32 %v6406_v1, %v8086_v42  ;;  %v4105_v15 = vsel %vm4070_vm6, %v4095_v61, %v4104_v8  ;;  %v4122_v1 = vor.u32 %v4121_v45, %v4118_v49 }
 0x114   : > { %v1527_v59 = vpop.f32.mrf.mxu0  ;;  %v1031_v7 = vpop.f32.mrf.mxu1  ;;  %v4127_v49 = vrot.slane %v4125_v51, 2  ;;  %v4130_v45 = vrot.slane %v4128_v22, 3  ;;  %v4146_v51 = vshll.u32 %v7475_v62, 16 }
 0x115   : > { %v8215_v18 = vadd.f32 %v1527_v59, %v1180_v39  ;;  %v1184_v9 = vadd.f32 %v1031_v7, %v8092_v46  ;;  %v4721_v39 = vrot.slane %v8210_v26, 3  ;;  %v4113_v46 = vor.u32 %v4112_v38, %v4109_v37  ;;  %v7472_v38 = vld [vmem:[%s7666_s16 + $0x30] sm:$0xff]  }
 0x116   : > { %v6443_v30 = vpop.f32.mrf.mxu0  ;;  %6618 = vmatmul.mubr.msk.bf16.gmra.mxu0 %vm352_vm1, %v3595_v11  ;;  %v6409_v42 = vpop.f32.mrf.mxu1  ;;  %6624 = vmatmul.mubr.msk.bf16.vlgmr.msra.gmra.mxu1 %vm352_vm1, %v4096_v25  ;;  %v4134_v11 = vshrl.u32 %v7473_v23, 16  ;;  %v4137_v25 = vshll.u32 %v7473_v23, 16  ;;  %v8240_v23 = vld [vmem:[%s7666_s16 + $0x38] sm:$0xff]  }
 0x117   : > { %v8221_v47 = vadd.f32 %v6443_v30, %v1185_v5  ;;  %6661 = vmatprep.mubr.msk.bf16.mxu0 %vm352_vm1, %v4718_v33  ;;  %v1189_v61 = vadd.f32 %v6409_v42, %v8102_v52  ;;  %6627 = vmatprep.mubr.msk.bf16.mxu1 %vm352_vm1, %v4105_v15  ;;  %v4720_v33 = vsel %vm4715_vm7, %v4717_v31, %v4719_v27 }
 0x118   : > { %v1540_v57 = vpop.f32.mrf.mxu0  ;;  %v1044_v13 = vpop.f32.mrf.mxu1  ;;  %v4722_v37 = vsel %vm4715_vm7, %v4719_v27, %v4721_v39  ;;  %v4114_v15 = vsel %vm4070_vm6, %v4104_v8, %v4113_v46  ;;  %v4136_v42 = vrot.slane %v4134_v11, 2  ;;  %v4139_v31 = vrot.slane %v4137_v25, 3 }
 0x119   : > { %v8228_v5 = vadd.f32 %v1540_v57, %v1183_v60  ;;  %v1187_v2 = vadd.f32 %v1044_v13, %v8109_v55  ;;  %v7477_v57 = vld [vmem:[%s7666_s16 + $0x58] sm:$0xff]   ;;  %v4723_v8 = vrot.slane %v7472_v38, 3  ;;  %v4725_v11 = vrot.slane %v8240_v23, 3  ;;  %v8263_v23 = vld [vmem:[%s7666_s16 + $0x48] sm:$0xff]  }
 0x11a   : > { %v6444_v26 = vpop.f32.mrf.mxu0  ;;  %v6410_v59 = vpop.f32.mrf.mxu1 }
 0x11b   : > { %v8231_v52 = vadd.f32 %v6444_v26, %v1186_v54  ;;  %v1190_v60 = vadd.f32 %v6410_v59, %v8114_v14  ;;  %v4123_v54 = vsel %vm4070_vm6, %v4113_v46, %v4122_v1  ;;  %v4140_v59 = vor.u32 %v4139_v31, %v4136_v42 }
 0x11c   : > { %v1543_v7 = vpop.f32.mrf.mxu0  ;;  %v1047_v55 = vpop.f32.mrf.mxu1  ;;  %v4726_v31 = vsel %vm4715_vm7, %v4723_v8, %v4725_v11 }
 0x11d   : > { %v8242_v30 = vadd.f32 %v1543_v7, %v1184_v9  ;;  %v1188_v27 = vadd.f32 %v1047_v55, %v8121_v10  ;;  %v4143_v9 = vshrl.u32 %v7475_v62, 16  ;;  %v4131_v10 = vor.u32 %v4130_v45, %v4127_v49  ;;  %v7476_v45 = vld [vmem:[%s7666_s16 + $0x40] sm:$0xff]  }
 0x11e   : > { %v6447_v13 = vpop.f32.mrf.mxu0  ;;  %6662 = vmatmul.mubr.msk.bf16.vlgmr.msra.gmra.mxu0 %vm352_vm1, %v4720_v33  ;;  %v6413_v14 = vpop.f32.mrf.mxu1  ;;  %6628 = vmatmul.mubr.msk.bf16.gmra.mxu1 %vm352_vm1, %v4114_v15  ;;  %v4152_v33 = vshrl.u32 %v7477_v57, 16  ;;  %v4724_v15 = vsel %vm4715_vm7, %v4721_v39, %v4723_v8  ;;  %v4148_v49 = vrot.slane %v4146_v51, 3  ;;  %v4727_v8 = vrot.slane %v7476_v45, 3 }
 0x11f   : > { %v8248_v26 = vadd.f32 %v6447_v13, %v1189_v61  ;;  %6665 = vmatprep.mubr.msk.bf16.mxu0 %vm352_vm1, %v4722_v37  ;;  %v1193_v46 = vadd.f32 %v6413_v14, %v8136_v28  ;;  %6631 = vmatprep.mubr.msk.bf16.mxu1 %vm352_vm1, %v4123_v54  ;;  %v4155_v37 = vshll.u32 %v7477_v57, 16  ;;  %v4145_v55 = vrot.slane %v4143_v9, 2  ;;  %v7479_v57 = vld [vmem:[%s7666_s16 + $0x60] sm:$0xff]  }
 0x120   : > { %v1556_v22 = vpop.f32.mrf.mxu0  ;;  %v1060_v25 = vpop.f32.mrf.mxu1  ;;  %v4132_v42 = vsel %vm4070_vm6, %v4122_v1, %v4131_v10  ;;  %v4154_v39 = vrot.slane %v4152_v33, 2  ;;  %v4164_v33 = vshll.u32 %v7479_v57, 16  ;;  %v4728_v45 = vsel %vm4715_vm7, %v4725_v11, %v4727_v8 }
 0x121   : > { %v8255_v61 = vadd.f32 %v1556_v22, %v1187_v2  ;;  %v1191_v38 = vadd.f32 %v1060_v25, %v8142_v34  ;;  %v7481_v34 = vld [vmem:[%s7666_s16 + $0x68] sm:$0xff]   ;;  %v4157_v9 = vrot.slane %v4155_v37, 3  ;;  %v4149_v1 = vor.u32 %v4148_v49, %v4145_v55 }
 0x122   : > { %v6448_v62 = vpop.f32.mrf.mxu0  ;;  %v6414_v28 = vpop.f32.mrf.mxu1  ;;  %v4170_v37 = vshrl.u32 %v7481_v34, 16 }
 0x123   : > { %v8258_v7 = vadd.f32 %v6448_v62, %v1190_v60  ;;  %v1194_v2 = vadd.f32 %v6414_v28, %v8148_v48  ;;  %v4141_v60 = vsel %vm4070_vm6, %v4131_v10, %v4140_v59  ;;  %v4173_v62 = vshll.u32 %v7481_v34, 16 }
 0x124   : > { %v1559_v54 = vpop.f32.mrf.mxu0  ;;  %v1063_v13 = vpop.f32.mrf.mxu1  ;;  %v4150_v49 = vsel %vm4070_vm6, %v4140_v59, %v4149_v1 }
 0x125   : > { %v8270_v14 = vadd.f32 %v1559_v54, %v1188_v27  ;;  %v1192_v51 = vadd.f32 %v1063_v13, %v8155_v6  ;;  %v4729_v27 = vrot.slane %v8263_v23, 3  ;;  %v4161_v6 = vshrl.u32 %v7479_v57, 16  ;;  %v8290_v57 = vld [vmem:[%s7666_s16 + $0x58] sm:$0xff]  }
 0x126   : > { %v6451_v22 = vpop.f32.mrf.mxu0  ;;  %6666 = vmatmul.mubr.msk.bf16.gmra.mxu0 %vm352_vm1, %v4724_v15  ;;  %v6417_v48 = vpop.f32.mrf.mxu1  ;;  %6632 = vmatmul.mubr.msk.bf16.gmra.mxu1 %vm352_vm1, %v4132_v42  ;;  %v4158_v15 = vor.u32 %v4157_v9, %v4154_v39  ;;  %v7483_v39 = vld [vmem:[%s7666_s16 + $0x70] sm:$0xff]  }
 0x127   : > { %v8275_v25 = vadd.f32 %v6451_v22, %v1193_v46  ;;  %6669 = vmatprep.mubr.msk.bf16.mxu0 %vm352_vm1, %v4726_v31  ;;  %6635 = vmatprep.mubr.msk.bf16.mxu1 %vm352_vm1, %v4141_v60  ;;  %v4730_v23 = vsel %vm4715_vm7, %v4727_v8, %v4729_v27  ;;  %v7480_v31 = vld [vmem:[%s7666_s16 + $0x50] sm:$0xff]   ;;  %v4163_v13 = vrot.slane %v4161_v6, 2  ;;  %v4166_v60 = vrot.slane %v4164_v33, 3 }
 0x128   : > { %v1572_v10 = vpop.f32.mrf.mxu0  ;;  %v1076_v28 = vpop.f32.mrf.mxu1  ;;  %v4175_v22 = vrot.slane %v4173_v62, 3  ;;  %v1197_v9 = vadd.f32 %v6417_v48, %v8021_v58  ;;  %v4159_v59 = vsel %vm4070_vm6, %v4149_v1, %v4158_v15  ;;  %v4731_v58 = vrot.slane %v7480_v31, 3  ;;  %v7484_v31 = vld [vmem:[%s7666_s16 + $0x60] sm:$0xff]  }
 0x129   : > { %v8281_v46 = vadd.f32 %v1572_v10, %v1191_v38  ;;  %v4172_v38 = vrot.slane %v4170_v37, 2  ;;  %v1195_v8 = vadd.f32 %v1076_v28, %v8028_v0  ;;  %v4167_v1 = vor.u32 %v4166_v60, %v4163_v13 }
 0x12a   : > { %v6452_v54 = vpop.f32.mrf.mxu0  ;;  %v6418_v42 = vpop.f32.mrf.mxu1  ;;  %v4179_v33 = vshrl.u32 %v7483_v39, 16  ;;  %v4182_v0 = vshll.u32 %v7483_v39, 16  ;;  %v4732_v13 = vsel %vm4715_vm7, %v4729_v27, %v4731_v58 }
 0x12b   : > { %9140 = vst [vmem:[#allocation7_spill] sm:$0xff] %v8281_v46  ;;  %v8283_v55 = vadd.f32 %v6452_v54, %v1194_v2  ;;  %v7485_v54 = vld [vmem:[%s7666_s16 + $0x78] sm:$0xff]   ;;  %v4176_v6 = vor.u32 %v4175_v22, %v4172_v38  ;;  %v1198_v37 = vadd.f32 %v6418_v42, %v8032_v3  ;;  %v8316_v38 = vld [vmem:[%s7666_s16 + $0x68] sm:$0xff]   ;;  %v7487_v3 = vld [vmem:[%s7666_s16 + $0x80] sm:$0xff]   ;;  %v4168_v22 = vsel %vm4070_vm6, %v4158_v15, %v4167_v1 }
 0x12c   : > { %v1575_v34 = vpop.f32.mrf.mxu0  ;;  %v1079_v2 = vpop.f32.mrf.mxu1 }
 0x12d   : > { %9141 = vst [vmem:[#allocation8_spill] sm:$0xff] %v8283_v55  ;;  %v8294_v10 = vadd.f32 %v1575_v34, %v1192_v51  ;;  %v4733_v51 = vrot.slane %v8290_v57, 3  ;;  %v1196_v57 = vadd.f32 %v1079_v2, %v8042_v12  ;;  %v4177_v39 = vsel %vm4070_vm6, %v4167_v1, %v4176_v6 }
 0x12e   : > { %v6455_v11 = vpop.f32.mrf.mxu0  ;;  %6670 = vmatmul.mubr.msk.bf16.gmra.mxu0 %vm352_vm1, %v4728_v45  ;;  %v6421_v55 = vpop.f32.mrf.mxu1  ;;  %6636 = vmatmul.mubr.msk.bf16.gmra.mxu1 %vm352_vm1, %v4150_v49  ;;  %v4188_v49 = vshrl.u32 %v7485_v54, 16  ;;  %v4191_v45 = vshll.u32 %v7485_v54, 16  ;;  %v4184_v54 = vrot.slane %v4182_v0, 3  ;;  %v4200_v0 = vshll.u32 %v7487_v3, 16 }
 0x12f   : > { %v8300_v46 = vadd.f32 %v6455_v11, %v1197_v9  ;;  %6673 = vmatprep.mubr.msk.bf16.mxu0 %vm352_vm1, %v4730_v23  ;;  %6639 = vmatprep.mubr.msk.bf16.mxu1 %vm352_vm1, %v4159_v59  ;;  %v4734_v60 = vsel %vm4715_vm7, %v4731_v58, %v4733_v51  ;;  %v4181_v59 = vrot.slane %v4179_v33, 2  ;;  %v7489_v11 = vld [vmem:[%s7666_s16 + $0x88] sm:$0xff]   ;;  %v1201_v12 = vadd.f32 %v6421_v55, %v8049_v17 }
 0x130   : > { %v1588_v48 = vpop.f32.mrf.mxu0  ;;  %v1092_v62 = vpop.f32.mrf.mxu1  ;;  %v4193_v27 = vrot.slane %v4191_v45, 3  ;;  %v4735_v58 = vrot.slane %v7484_v31, 3  ;;  %v4737_v17 = vrot.slane %v8316_v38, 3  ;;  %v4197_v55 = vshrl.u32 %v7487_v3, 16  ;;  %v7488_v38 = vld [vmem:[%s7666_s16 + $0x70] sm:$0xff]  }
 0x131   : > { %v8307_v28 = vadd.f32 %v1588_v48, %v1195_v8  ;;  %v4190_v48 = vrot.slane %v4188_v49, 2  ;;  %v4185_v33 = vor.u32 %v4184_v54, %v4181_v59  ;;  %v4206_v49 = vshrl.u32 %v7489_v11, 16  ;;  %v7491_v54 = vld [vmem:[%s7666_s16 + $0x90] sm:$0xff]  }
 0x132   : > { %v6456_v23 = vpop.f32.mrf.mxu0  ;;  %v6422_v34 = vpop.f32.mrf.mxu1  ;;  %v4209_v45 = vshll.u32 %v7489_v11, 16  ;;  %v4738_v3 = vsel %vm4715_vm7, %v4735_v58, %v4737_v17  ;;  %v4199_v59 = vrot.slane %v4197_v55, 2  ;;  %v4202_v11 = vrot.slane %v4200_v0, 3 }
 0x133   : > { %v8311_v9 = vadd.f32 %v6456_v23, %v1198_v37  ;;  %v1199_v23 = vadd.f32 %v1092_v62, %v8056_v21  ;;  %v1202_v21 = vadd.f32 %v6422_v34, %v8060_v24  ;;  %v4186_v34 = vsel %vm4070_vm6, %v4176_v6, %v4185_v33 }
 0x134   : > { %v1591_v42 = vpop.f32.mrf.mxu0  ;;  %v1095_v2 = vpop.f32.mrf.mxu1 }
 0x135   : > { %9142 = vst [vmem:[#allocation9_spill] sm:$0xff] %v8311_v9  ;;  %v8323_v8 = vadd.f32 %v1591_v42, %v1196_v57  ;;  %v4194_v57 = vor.u32 %v4193_v27, %v4190_v48  ;;  %v1200_v42 = vadd.f32 %v1095_v2, %v8070_v32  ;;  %v4211_v48 = vrot.slane %v4209_v45, 3  ;;  %v8345_v27 = vld [vmem:[%s7666_s16 + $0x78] sm:$0xff]  }
 0x136   : > { %v6459_v37 = vpop.f32.mrf.mxu0  ;;  %6674 = vmatmul.mubr.msk.bf16.gmra.mxu0 %vm352_vm1, %v4732_v13  ;;  %v6425_v9 = vpop.f32.mrf.mxu1  ;;  %6640 = vmatmul.mubr.msk.bf16.gmra.mxu1 %vm352_vm1, %v4168_v22 }
 0x137   : > { %v8327_v15 = vadd.f32 %v6459_v37, %v1201_v12  ;;  %6677 = vmatprep.mubr.msk.bf16.mxu0 %vm352_vm1, %v4734_v60  ;;  %6643 = vmatprep.mubr.msk.bf16.mxu1 %vm352_vm1, %v4177_v39  ;;  %v4736_v60 = vsel %vm4715_vm7, %v4733_v51, %v4735_v58  ;;  %v4208_v12 = vrot.slane %v4206_v49, 2  ;;  %v1205_v51 = vadd.f32 %v6425_v9, %v8077_v36 }
 0x138   : > { %v1604_v1 = vpop.f32.mrf.mxu0  ;;  %v1108_v62 = vpop.f32.mrf.mxu1  ;;  %v4195_v2 = vsel %vm4070_vm6, %v4185_v33, %v4194_v57  ;;  %v4739_v58 = vrot.slane %v7488_v38, 3  ;;  %v4215_v36 = vshrl.u32 %v7491_v54, 16  ;;  %v4218_v9 = vshll.u32 %v7491_v54, 16 }
 0x139   : > { %v8334_v31 = vadd.f32 %v1604_v1, %v1199_v23  ;;  %v7493_v23 = vld [vmem:[%s7666_s16 + $0x98] sm:$0xff]   ;;  %v1203_v55 = vadd.f32 %v1108_v62, %v8084_v40  ;;  %v4203_v33 = vor.u32 %v4202_v11, %v4199_v59  ;;  %v4212_v45 = vor.u32 %v4211_v48, %v4208_v12  ;;  %v7492_v12 = vld [vmem:[%s7666_s16 + $0x80] sm:$0xff]  }
 0x13a   : > { %v6460_v13 = vpop.f32.mrf.mxu0  ;;  %v6426_v22 = vpop.f32.mrf.mxu1  ;;  %v4227_v38 = vshll.u32 %v7493_v23, 16  ;;  %v4217_v59 = vrot.slane %v4215_v36, 2  ;;  %v4220_v11 = vrot.slane %v4218_v9, 3 }
 0x13b   : > { %v8339_v39 = vadd.f32 %v6460_v13, %v1202_v21  ;;  %v4741_v21 = vrot.slane %v8345_v27, 3  ;;  %v1206_v13 = vadd.f32 %v6426_v22, %v8088_v43  ;;  %v4204_v43 = vsel %vm4070_vm6, %v4194_v57, %v4203_v33 }
 0x13c   : > { %v1607_v24 = vpop.f32.mrf.mxu0  ;;  %v1111_v37 = vpop.f32.mrf.mxu1  ;;  %v4213_v22 = vsel %vm4070_vm6, %v4203_v33, %v4212_v45 }
 0x13d   : > { %v8348_v32 = vadd.f32 %v1607_v24, %v1200_v42  ;;  %v1204_v54 = vadd.f32 %v1111_v37, %v8098_v50  ;;  %v4742_v27 = vsel %vm4715_vm7, %v4739_v58, %v4741_v21 }
 0x13e   : > { %v6463_v1 = vpop.f32.mrf.mxu0  ;;  %6678 = vmatmul.mubr.msk.bf16.gmra.mxu0 %vm352_vm1, %v4736_v60  ;;  %v6429_v6 = vpop.f32.mrf.mxu1  ;;  %6644 = vmatmul.mubr.msk.bf16.gmra.mxu1 %vm352_vm1, %v4186_v34  ;;  %v4224_v60 = vshrl.u32 %v7493_v23, 16 }
 0x13f   : > { %v8354_v0 = vadd.f32 %v6463_v1, %v1205_v51  ;;  %6681 = vmatprep.mubr.msk.bf16.mxu0 %vm352_vm1, %v4738_v3  ;;  %6647 = vmatprep.mubr.msk.bf16.mxu1 %vm352_vm1, %v4195_v2  ;;  %v4740_v3 = vsel %vm4715_vm7, %v4737_v17, %v4739_v58  ;;  %v8372_v51 = vld [vmem:[%s7666_s16 + $0x88] sm:$0xff]   ;;  %v7495_v2 = vld [vmem:[%s7666_s16 + $0xa0] ss:$0 sps:$4 sm:$0x77]   ;;  %v1209_v17 = vadd.f32 %v6429_v6, %v8105_v53  ;;  %v4229_v1 = vrot.slane %v4227_v38, 3 }
 0x140   : > { %v1620_v49 = vpop.f32.mrf.mxu0  ;;  %v1124_v40 = vpop.f32.mrf.mxu1  ;;  %v4226_v37 = vrot.slane %v4224_v60, 2  ;;  %v4221_v58 = vor.u32 %v4220_v11, %v4217_v59  ;;  %v4745_v33 = vrot.slane %v8372_v51, 3  ;;  %v4236_v60 = vshll.u32 %v7495_v2, 16 }
 0x141   : > { %v8361_v62 = vadd.f32 %v1620_v49, %v1203_v55  ;;  %v1207_v36 = vadd.f32 %v1124_v40, %v8112_v63  ;;  %v4743_v49 = vrot.slane %v7492_v12, 3 }
 0x142   : > { %v6464_v42 = vpop.f32.mrf.mxu0  ;;  %v6430_v24 = vpop.f32.mrf.mxu1  ;;  %v4222_v12 = vsel %vm4070_vm6, %v4212_v45, %v4221_v58  ;;  %v4238_v51 = vrot.slane %v4236_v60, 3 }
 0x143   : > { %v8365_v34 = vadd.f32 %v6464_v42, %v1206_v13  ;;  %v4233_v13 = vshrl.u32 %v7495_v2, 16  ;;  %v1210_v63 = vadd.f32 %v6430_v24, %v8116_v4  ;;  %v4230_v42 = vor.u32 %v4229_v1, %v4226_v37  ;;  %v7497_v2 = vld [vmem:[%s7666_s16 + $0x98] sm:$0xff]  }
 0x144   : > { %v1623_v48 = vpop.f32.mrf.mxu0  ;;  %v1127_v23 = vpop.f32.mrf.mxu1 }
 0x145   : > { %v8376_v50 = vadd.f32 %v1623_v48, %v1204_v54  ;;  %v4744_v48 = vsel %vm4715_vm7, %v4741_v21, %v4743_v49 }
 0x146   : > { %v6467_v55 = vpop.f32.mrf.mxu0  ;;  %6682 = vmatmul.mubr.msk.bf16.gmra.mxu0 %vm352_vm1, %v4740_v3  ;;  %v6473_v9 = vpop.f32.mrf.mxu1  ;;  %6648 = vmatmul.mubr.msk.bf16.gmra.mxu1 %vm352_vm1, %v4204_v43  ;;  %v7496_v43 = vld [vmem:[%s7666_s16 + $0x90] sm:$0xff]  }
 0x147   : > { %v8380_v57 = vadd.f32 %v6467_v55, %v1209_v17  ;;  %6685 = vmatprep.mubr.msk.bf16.mxu0 %vm352_vm1, %v4742_v27  ;;  %v2200_v53 = vadd.f32 %v6473_v9, %v8166_v29  ;;  %6651 = vmatprep.mubr.msk.bf16.mxu1 %vm352_vm1, %v4213_v22  ;;  %v1208_v29 = vadd.f32 %v1127_v23, %v8129_v20  ;;  %v4235_v27 = vrot.slane %v4233_v13, 2 }
 0x148   : > { %v1636_v6 = vpop.f32.mrf.mxu0  ;;  %v2019_v38 = vpop.f32.mrf.mxu1  ;;  %v4746_v22 = vsel %vm4715_vm7, %v4743_v49, %v4745_v33  ;;  %v4231_v20 = vsel %vm4070_vm6, %v4221_v58, %v4230_v42  ;;  %v4749_v9 = vrot.slane %v7497_v2, 3 }
 0x149   : > { %v8388_v40 = vadd.f32 %v1636_v6, %v1207_v36  ;;  %v2198_v3 = vadd.f32 %v2019_v38, %v8173_v56  ;;  %v4239_v36 = vor.u32 %v4238_v51, %v4235_v27 }
 0x14a   : > { %v6468_v54 = vpop.f32.mrf.mxu0  ;;  %v6474_v11 = vpop.f32.mrf.mxu1 }
 0x14b   : > { %v8392_v59 = vadd.f32 %v6468_v54, %v1210_v63  ;;  %v2201_v4 = vadd.f32 %v6474_v11, %v8177_v19  ;;  %v4747_v19 = vrot.slane %v7496_v43, 3  ;;  %v7498_v63 = vld [vmem:[%s7666_s16 + $0xa0] ss:$0 sps:$4 sm:$0x77]   ;;  %v4240_v54 = vsel %vm4070_vm6, %v4230_v42, %v4239_v36 }
 0x14c   : > { %v1639_v24 = vpop.f32.mrf.mxu0  ;;  %v2022_v17 = vpop.f32.mrf.mxu1 }
 0x14d   : > { %v8400_v56 = vadd.f32 %v1639_v24, %v1208_v29  ;;  %v2199_v23 = vadd.f32 %v2022_v17, %v8188_v41  ;;  %v4748_v60 = vsel %vm4715_vm7, %v4745_v33, %v4747_v19  ;;  %v4750_v29 = vsel %vm4715_vm7, %v4747_v19, %v4749_v9 }
 0x14e   : > { %v6511_v37 = vpop.f32.mrf.mxu0  ;;  %6686 = vmatmul.mubr.msk.bf16.gmra.mxu0 %vm352_vm1, %v4744_v48  ;;  %v6477_v45 = vpop.f32.mrf.mxu1  ;;  %6652 = vmatmul.mubr.msk.bf16.gmra.mxu1 %vm352_vm1, %v4222_v12 }
 0x14f   : > { %v8405_v21 = vadd.f32 %v6511_v37, %v2200_v53  ;;  %6689 = vmatprep.mubr.msk.bf16.mxu0 %vm352_vm1, %v4746_v22  ;;  %v2204_v1 = vadd.f32 %v6477_v45, %v8194_v44  ;;  %6655 = vmatprep.mubr.msk.bf16.mxu1 %vm352_vm1, %v4231_v20 }
 0x150   : > { %v2664_v55 = vpop.f32.mrf.mxu0  ;;  %v2035_v41 = vpop.f32.mrf.mxu1 }
 0x151   : > { %v8411_v58 = vadd.f32 %v2664_v55, %v2198_v3  ;;  %v2202_v49 = vadd.f32 %v2035_v41, %v8201_v16 }
 0x152   : > { %v6512_v53 = vpop.f32.mrf.mxu0  ;;  %v6478_v6 = vpop.f32.mrf.mxu1 }
 0x153   : > { %v8414_v13 = vadd.f32 %v6512_v53, %v2201_v4  ;;  %v2205_v38 = vadd.f32 %v6478_v6, %v8204_v35  ;;  %v4751_v35 = vrot.slane %v7498_v63, 3 }
 0x154   : > { %v2667_v44 = vpop.f32.mrf.mxu0  ;;  %v2038_v11 = vpop.f32.mrf.mxu1 }
 0x155   : > { %v8421_v12 = vadd.f32 %v2667_v44, %v2199_v23  ;;  %v2203_v3 = vadd.f32 %v2038_v11, %v8215_v18  ;;  %v4752_v2 = vsel %vm4715_vm7, %v4749_v9, %v4751_v35 }
 0x156   : > { %v6515_v16 = vpop.f32.mrf.mxu0  ;;  %6690 = vmatmul.mubr.msk.bf16.gmra.mxu0 %vm352_vm1, %v4748_v60  ;;  %v6481_v48 = vpop.f32.mrf.mxu1  ;;  %6656 = vmatmul.mubr.msk.bf16.gmra.mxu1 %vm352_vm1, %v4240_v54 }
 0x157   : > { %v8425_v43 = vadd.f32 %v6515_v16, %v2204_v1  ;;  %6693 = vmatprep.mubr.msk.bf16.mxu0 %vm352_vm1, %v4750_v29  ;;  %v2208_v33 = vadd.f32 %v6481_v48, %v8221_v47  ;;  %v9143_v16 = vld [vmem:[#allocation7_spill] sm:$0xff] }
 0x158   : > { %v2680_v42 = vpop.f32.mrf.mxu0  ;;  %v2051_v4 = vpop.f32.mrf.mxu1 }
 0x159   : > { %v8430_v24 = vadd.f32 %v2680_v42, %v2202_v49  ;;  %v2206_v22 = vadd.f32 %v2051_v4, %v8228_v5  ;;  %v9144_v42 = vld [vmem:[#allocation8_spill] sm:$0xff] }
 0x15a   : > { %v6516_v18 = vpop.f32.mrf.mxu0  ;;  %v6482_v27 = vpop.f32.mrf.mxu1 }
 0x15b   : > { %v8433_v51 = vadd.f32 %v6516_v18, %v2205_v38  ;;  %v2209_v17 = vadd.f32 %v6482_v27, %v8231_v52 }
 0x15c   : > { %v2683_v20 = vpop.f32.mrf.mxu0  ;;  %v2054_v23 = vpop.f32.mrf.mxu1 }
 0x15d   : > { %v8437_v37 = vadd.f32 %v2683_v20, %v2203_v3  ;;  %v2207_v47 = vadd.f32 %v2054_v23, %v8242_v30 }
 0x15e   : > { %v6519_v45 = vpop.f32.mrf.mxu0  ;;  %6694 = vmatmul.mubr.msk.bf16.gmra.mxu0 %vm352_vm1, %v4752_v2  ;;  %v6485_v19 = vpop.f32.mrf.mxu1 }
 0x15f   : > { %v8441_v1 = vadd.f32 %v6519_v45, %v2208_v33  ;;  %v2212_v5 = vadd.f32 %v6485_v19, %v8248_v26 }
 0x160   : > { %v2696_v55 = vpop.f32.mrf.mxu0  ;;  %v2067_v36 = vpop.f32.mrf.mxu1 }
 0x161   : > { %v8444_v41 = vadd.f32 %v2696_v55, %v2206_v22  ;;  %v2210_v52 = vadd.f32 %v2067_v36, %v8255_v61 }
 0x162   : > { %v6520_v9 = vpop.f32.mrf.mxu0  ;;  %v6486_v49 = vpop.f32.mrf.mxu1 }
 0x163   : > { %v8447_v53 = vadd.f32 %v6520_v9, %v2209_v17  ;;  %v2213_v30 = vadd.f32 %v6486_v49, %v8258_v7 }
 0x164   : > { %v2699_v6 = vpop.f32.mrf.mxu0  ;;  %v2070_v60 = vpop.f32.mrf.mxu1 }
 0x165   : > { %v8450_v63 = vadd.f32 %v2699_v6, %v2207_v47  ;;  %v2211_v38 = vadd.f32 %v2070_v60, %v8270_v14 }
 0x166   : > { %v6523_v44 = vpop.f32.mrf.mxu0  ;;  %v6489_v26 = vpop.f32.mrf.mxu1 }
 0x167   : > { %v8453_v54 = vadd.f32 %v6523_v44, %v2212_v5  ;;  %v2216_v29 = vadd.f32 %v6489_v26, %v8275_v25 }
 0x168   : > { %v2712_v11 = vpop.f32.mrf.mxu0  ;;  %v2083_v61 = vpop.f32.mrf.mxu1 }
 0x169   : > { %v8456_v3 = vadd.f32 %v2712_v11, %v2210_v52  ;;  %v2214_v48 = vadd.f32 %v2083_v61, %v9143_v16  ;;  %v9145_v52 = vld [vmem:[#allocation9_spill] sm:$0xff] }
 0x16a   : > { %v6524_v35 = vpop.f32.mrf.mxu0  ;;  %v6490_v7 = vpop.f32.mrf.mxu1 }
 0x16b   : > { %v8459_v33 = vadd.f32 %v6524_v35, %v2213_v30  ;;  %v2217_v4 = vadd.f32 %v6490_v7, %v9144_v42 }
 0x16c   : > { %v2715_v22 = vpop.f32.mrf.mxu0  ;;  %v2086_v14 = vpop.f32.mrf.mxu1 }
 0x16d   : > { %v8462_v18 = vadd.f32 %v2715_v22, %v2211_v38  ;;  %v2215_v27 = vadd.f32 %v2086_v14, %v8294_v10 }
 0x16e   : > { %v6527_v2 = vpop.f32.mrf.mxu0  ;;  %v6493_v25 = vpop.f32.mrf.mxu1 }
 0x16f   : > { %v8465_v17 = vadd.f32 %v6527_v2, %v2216_v29  ;;  %v2220_v20 = vadd.f32 %v6493_v25, %v8300_v46 }
 0x170   : > { %v2728_v23 = vpop.f32.mrf.mxu0  ;;  %v2099_v47 = vpop.f32.mrf.mxu1 }
 0x171   : > { %v8468_v45 = vadd.f32 %v2728_v23, %v2214_v48  ;;  %v2218_v19 = vadd.f32 %v2099_v47, %v8307_v28 }
 0x172   : > { %v6528_v5 = vpop.f32.mrf.mxu0  ;;  %v6494_v55 = vpop.f32.mrf.mxu1 }
 0x173   : > { %v8471_v36 = vadd.f32 %v6528_v5, %v2217_v4  ;;  %v2221_v9 = vadd.f32 %v6494_v55, %v9145_v52 }
 0x174   : > { %v2731_v49 = vpop.f32.mrf.mxu0  ;;  %v2102_v10 = vpop.f32.mrf.mxu1 }
 0x175   : > { %v8474_v30 = vadd.f32 %v2731_v49, %v2215_v27  ;;  %v2219_v6 = vadd.f32 %v2102_v10, %v8323_v8 }
 0x176   : > { %v6531_v60 = vpop.f32.mrf.mxu0  ;;  %v6497_v46 = vpop.f32.mrf.mxu1 }
 0x177   : > { %v8477_v38 = vadd.f32 %v6531_v60, %v2220_v20  ;;  %v2224_v44 = vadd.f32 %v6497_v46, %v8327_v15 }
 0x178   : > { %v2744_v26 = vpop.f32.mrf.mxu0  ;;  %v2115_v28 = vpop.f32.mrf.mxu1 }
 0x179   : > { %v8480_v29 = vadd.f32 %v2744_v26, %v2218_v19  ;;  %v2222_v11 = vadd.f32 %v2115_v28, %v8334_v31 }
 0x17a   : > { %v6532_v61 = vpop.f32.mrf.mxu0  ;;  %v6498_v16 = vpop.f32.mrf.mxu1 }
 0x17b   : > { %v8483_v48 = vadd.f32 %v6532_v61, %v2221_v9  ;;  %v2225_v35 = vadd.f32 %v6498_v16, %v8339_v39 }
 0x17c   : > { %v2747_v7 = vpop.f32.mrf.mxu0  ;;  %v2118_v8 = vpop.f32.mrf.mxu1 }
 0x17d   : > { %v8486_v42 = vadd.f32 %v2747_v7, %v2219_v6  ;;  %v2223_v4 = vadd.f32 %v2118_v8, %v8348_v32 }
 0x17e   : > { %v6535_v22 = vpop.f32.mrf.mxu0  ;;  %v6501_v15 = vpop.f32.mrf.mxu1 }
 0x17f   : > { %v8489_v14 = vadd.f32 %v6535_v22, %v2224_v44  ;;  %v2228_v27 = vadd.f32 %v6501_v15, %v8354_v0 }
 0x180   : > { %v2760_v2 = vpop.f32.mrf.mxu0  ;;  %v2131_v31 = vpop.f32.mrf.mxu1 }
 0x181   : > { %v8492_v25 = vadd.f32 %v2760_v2, %v2222_v11  ;;  %v2226_v20 = vadd.f32 %v2131_v31, %v8361_v62 }
 0x182   : > { %v6536_v23 = vpop.f32.mrf.mxu0  ;;  %v6502_v39 = vpop.f32.mrf.mxu1 }
 0x183   : > { %v8495_v47 = vadd.f32 %v6536_v23, %v2225_v35  ;;  %v2229_v19 = vadd.f32 %v6502_v39, %v8365_v34 }
 0x184   : > { %v2763_v5 = vpop.f32.mrf.mxu0  ;;  %v2134_v32 = vpop.f32.mrf.mxu1 }
 0x185   : > { %v8498_v55 = vadd.f32 %v2763_v5, %v2223_v4  ;;  %v2227_v52 = vadd.f32 %v2134_v32, %v8376_v50 }
 0x186   : > { %v6539_v9 = vpop.f32.mrf.mxu0  ;;  %v6505_v0 = vpop.f32.mrf.mxu1 }
 0x187   : > { %v8501_v49 = vadd.f32 %v6539_v9, %v2228_v27  ;;  %v2232_v10 = vadd.f32 %v6505_v0, %v8380_v57 }
 0x188   : > { %v2776_v6 = vpop.f32.mrf.mxu0  ;;  %v2147_v62 = vpop.f32.mrf.mxu1 }
 0x189   : > { %v8504_v60 = vadd.f32 %v2776_v6, %v2226_v20  ;;  %v2230_v46 = vadd.f32 %v2147_v62, %v8388_v40 }
 0x18a   : > { %v6540_v44 = vpop.f32.mrf.mxu0  ;;  %v6506_v34 = vpop.f32.mrf.mxu1 }
 0x18b   : > { %v8507_v26 = vadd.f32 %v6540_v44, %v2229_v19  ;;  %v2233_v28 = vadd.f32 %v6506_v34, %v8392_v59 }
 0x18c   : > { %v2779_v11 = vpop.f32.mrf.mxu0  ;;  %v2150_v50 = vpop.f32.mrf.mxu1 }
 0x18d   : > { %v8510_v61 = vadd.f32 %v2779_v11, %v2227_v52  ;;  %v2231_v16 = vadd.f32 %v2150_v50, %v8400_v56 }
 0x18e   : > { %v6543_v35 = vpop.f32.mrf.mxu0  ;;  %v6549_v7 = vpop.f32.mrf.mxu1 }
 0x18f   : > { %v8513_v57 = vadd.f32 %v6543_v35, %v2232_v10  ;;  %v3357_v8 = vadd.f32 %v6549_v7, %v8405_v21 }
 0x190   : > { %v2792_v4 = vpop.f32.mrf.mxu0  ;;  %v3176_v22 = vpop.f32.mrf.mxu1 }
 0x191   : > { %v8516_v40 = vadd.f32 %v2792_v4, %v2230_v46  ;;  %v3355_v15 = vadd.f32 %v3176_v22, %v8411_v58 }
 0x192   : > { %v6544_v27 = vpop.f32.mrf.mxu0  ;;  %v6550_v2 = vpop.f32.mrf.mxu1 }
 0x193   : > { %v8519_v59 = vadd.f32 %v6544_v27, %v2233_v28  ;;  %v3358_v31 = vadd.f32 %v6550_v2, %v8414_v13 }
 0x194   : > { %v2795_v20 = vpop.f32.mrf.mxu0  ;;  %v3179_v23 = vpop.f32.mrf.mxu1 }
 0x195   : > { %v8522_v56 = vadd.f32 %v2795_v20, %v2231_v16  ;;  %v3356_v39 = vadd.f32 %v3179_v23, %v8421_v12 }
 0x196   : > { %v6587_v19 = vpop.f32.mrf.mxu0  ;;  %v6553_v21 = vpop.f32.mrf.mxu1 }
 0x197   : > { %v8525_v5 = vadd.f32 %v6587_v19, %v3357_v8  ;;  %v3361_v32 = vadd.f32 %v6553_v21, %v8425_v43 }
 0x198   : > { %v3687_v52 = vpop.f32.mrf.mxu0  ;;  %v3192_v58 = vpop.f32.mrf.mxu1 }
 0x199   : > { %v8528_v9 = vadd.f32 %v3687_v52, %v3355_v15  ;;  %v3359_v0 = vadd.f32 %v3192_v58, %v8430_v24 }
 0x19a   : > { %v6588_v10 = vpop.f32.mrf.mxu0  ;;  %v6554_v13 = vpop.f32.mrf.mxu1 }
 0x19b   : > { %v8531_v6 = vadd.f32 %v6588_v10, %v3358_v31  ;;  %v3362_v62 = vadd.f32 %v6554_v13, %v8433_v51 }
 0x19c   : > { %v3690_v46 = vpop.f32.mrf.mxu0  ;;  %v3195_v12 = vpop.f32.mrf.mxu1 }
 0x19d   : > { %v8534_v44 = vadd.f32 %v3690_v46, %v3356_v39  ;;  %v3360_v34 = vadd.f32 %v3195_v12, %v8437_v37 }
 0x19e   : > { %v6591_v28 = vpop.f32.mrf.mxu0  ;;  %v6557_v43 = vpop.f32.mrf.mxu1 }
 0x19f   : > { %v8537_v11 = vadd.f32 %v6591_v28, %v3361_v32  ;;  %v3365_v50 = vadd.f32 %v6557_v43, %v8441_v1 }
 0x1a0   : > { %v3703_v16 = vpop.f32.mrf.mxu0  ;;  %v3208_v24 = vpop.f32.mrf.mxu1 }
 0x1a1   : > { %v8540_v35 = vadd.f32 %v3703_v16, %v3359_v0  ;;  %v3363_v7 = vadd.f32 %v3208_v24, %v8444_v41 }
 0x1a2   : > { %v6592_v8 = vpop.f32.mrf.mxu0  ;;  %v6558_v51 = vpop.f32.mrf.mxu1 }
 0x1a3   : > { %v8543_v4 = vadd.f32 %v6592_v8, %v3362_v62  ;;  %v3366_v22 = vadd.f32 %v6558_v51, %v8447_v53 }
 0x1a4   : > { %v3706_v15 = vpop.f32.mrf.mxu0  ;;  %v3211_v37 = vpop.f32.mrf.mxu1 }
 0x1a5   : > { %v8546_v27 = vadd.f32 %v3706_v15, %v3360_v34  ;;  %v3364_v2 = vadd.f32 %v3211_v37, %v8450_v63 }
 0x1a6   : > { %v6595_v31 = vpop.f32.mrf.mxu0  ;;  %v6561_v1 = vpop.f32.mrf.mxu1 }
 0x1a7   : > { %v8549_v20 = vadd.f32 %v6595_v31, %v3365_v50  ;;  %v3369_v23 = vadd.f32 %v6561_v1, %v8453_v54 }
 0x1a8   : > { %v3719_v39 = vpop.f32.mrf.mxu0  ;;  %v3224_v41 = vpop.f32.mrf.mxu1 }
 0x1a9   : > { %v8552_v19 = vadd.f32 %v3719_v39, %v3363_v7  ;;  %v3367_v21 = vadd.f32 %v3224_v41, %v8456_v3 }
 0x1aa   : > { %v6596_v32 = vpop.f32.mrf.mxu0  ;;  %v6562_v53 = vpop.f32.mrf.mxu1 }
 0x1ab   : > { %v8555_v52 = vadd.f32 %v6596_v32, %v3366_v22  ;;  %v3370_v58 = vadd.f32 %v6562_v53, %v8459_v33 }
 0x1ac   : > { %v3722_v0 = vpop.f32.mrf.mxu0  ;;  %v3227_v63 = vpop.f32.mrf.mxu1 }
 0x1ad   : > { %v8558_v10 = vadd.f32 %v3722_v0, %v3364_v2  ;;  %v3368_v13 = vadd.f32 %v3227_v63, %v8462_v18 }
 0x1ae   : > { %v6599_v62 = vpop.f32.mrf.mxu0  ;;  %v6565_v54 = vpop.f32.mrf.mxu1 }
 0x1af   : > { %v8561_v46 = vadd.f32 %v6599_v62, %v3369_v23  ;;  %v3373_v12 = vadd.f32 %v6565_v54, %v8465_v17 }
 0x1b0   : > { %v3735_v34 = vpop.f32.mrf.mxu0  ;;  %v3240_v3 = vpop.f32.mrf.mxu1 }
 0x1b1   : > { %v8564_v28 = vadd.f32 %v3735_v34, %v3367_v21  ;;  %v3371_v43 = vadd.f32 %v3240_v3, %v8468_v45 }
 0x1b2   : > { %v6600_v50 = vpop.f32.mrf.mxu0  ;;  %v6566_v33 = vpop.f32.mrf.mxu1 }
 0x1b3   : > { %v8567_v16 = vadd.f32 %v6600_v50, %v3370_v58  ;;  %v3374_v24 = vadd.f32 %v6566_v33, %v8471_v36 }
 0x1b4   : > { %v3738_v7 = vpop.f32.mrf.mxu0  ;;  %v3243_v18 = vpop.f32.mrf.mxu1 }
 0x1b5   : > { %v8570_v8 = vadd.f32 %v3738_v7, %v3368_v13  ;;  %v3372_v51 = vadd.f32 %v3243_v18, %v8474_v30 }
 0x1b6   : > { %v6603_v22 = vpop.f32.mrf.mxu0  ;;  %v6569_v17 = vpop.f32.mrf.mxu1 }
 0x1b7   : > { %v8573_v15 = vadd.f32 %v6603_v22, %v3373_v12  ;;  %v3377_v37 = vadd.f32 %v6569_v17, %v8477_v38 }
 0x1b8   : > { %v3751_v2 = vpop.f32.mrf.mxu0  ;;  %v3256_v45 = vpop.f32.mrf.mxu1 }
 0x1b9   : > { %v8576_v31 = vadd.f32 %v3751_v2, %v3371_v43  ;;  %v3375_v1 = vadd.f32 %v3256_v45, %v8480_v29 }
 0x1ba   : > { %v6604_v23 = vpop.f32.mrf.mxu0  ;;  %v6570_v36 = vpop.f32.mrf.mxu1 }
 0x1bb   : > { %v8579_v39 = vadd.f32 %v6604_v23, %v3374_v24  ;;  %v3378_v41 = vadd.f32 %v6570_v36, %v8483_v48 }
 0x1bc   : > { %v3754_v21 = vpop.f32.mrf.mxu0  ;;  %v3259_v30 = vpop.f32.mrf.mxu1 }
 0x1bd   : > { %v8582_v32 = vadd.f32 %v3754_v21, %v3372_v51  ;;  %v3376_v53 = vadd.f32 %v3259_v30, %v8486_v42 }
 0x1be   : > { %v6607_v58 = vpop.f32.mrf.mxu0  ;;  %v6573_v38 = vpop.f32.mrf.mxu1 }
 0x1bf   : > { %v8585_v0 = vadd.f32 %v6607_v58, %v3377_v37  ;;  %v3381_v63 = vadd.f32 %v6573_v38, %v8489_v14 }
 0x1c0   : > { %v3767_v13 = vpop.f32.mrf.mxu0  ;;  %v3272_v29 = vpop.f32.mrf.mxu1 }
 0x1c1   : > { %v8588_v62 = vadd.f32 %v3767_v13, %v3375_v1  ;;  %v3379_v54 = vadd.f32 %v3272_v29, %v8492_v25 }
 0x1c2   : > { %v6608_v12 = vpop.f32.mrf.mxu0  ;;  %v6574_v48 = vpop.f32.mrf.mxu1 }
 0x1c3   : > { %v8591_v34 = vadd.f32 %v6608_v12, %v3378_v41  ;;  %v3382_v3 = vadd.f32 %v6574_v48, %v8495_v47 }
 0x1c4   : > { %v3770_v43 = vpop.f32.mrf.mxu0  ;;  %v3275_v42 = vpop.f32.mrf.mxu1 }
 0x1c5   : > { %v8594_v50 = vadd.f32 %v3770_v43, %v3376_v53  ;;  %v3380_v33 = vadd.f32 %v3275_v42, %v8498_v55 }
 0x1c6   : > { %v6611_v24 = vpop.f32.mrf.mxu0  ;;  %v6577_v14 = vpop.f32.mrf.mxu1 }
 0x1c7   : > { %v8597_v7 = vadd.f32 %v6611_v24, %v3381_v63  ;;  %v3385_v18 = vadd.f32 %v6577_v14, %v8501_v49 }
 0x1c8   : > { %v3783_v51 = vpop.f32.mrf.mxu0  ;;  %v3288_v25 = vpop.f32.mrf.mxu1 }
 0x1c9   : > { %v8600_v22 = vadd.f32 %v3783_v51, %v3379_v54  ;;  %v3383_v17 = vadd.f32 %v3288_v25, %v8504_v60 }
 0x1ca   : > { %v6612_v37 = vpop.f32.mrf.mxu0  ;;  %v6578_v47 = vpop.f32.mrf.mxu1 }
 0x1cb   : > { %v8603_v2 = vadd.f32 %v6612_v37, %v3382_v3  ;;  %v3386_v45 = vadd.f32 %v6578_v47, %v8507_v26  ;;  %v8630_v37 = vstv %s5095_s12  ;;  %s9092_s12 = scalar_lea.sflag [#allocation5], %s216_s17 }
 0x1cc   : > { %v3786_v1 = vpop.f32.mrf.mxu0  ;;  %v3291_v55 = vpop.f32.mrf.mxu1 }
 0x1cd   : > { %v8606_v23 = vadd.f32 %v3786_v1, %v3380_v33  ;;  %v3384_v36 = vadd.f32 %v3291_v55, %v8510_v61 }
 0x1ce   : > { %v6615_v41 = vpop.f32.mrf.mxu0  ;;  %v6581_v49 = vpop.f32.mrf.mxu1 }
 0x1cf   : > { %v8609_v21 = vadd.f32 %v6615_v41, %v3385_v18  ;;  %v3389_v30 = vadd.f32 %v6581_v49, %v8513_v57 }
 0x1d0   : > { %v3799_v53 = vpop.f32.mrf.mxu0  ;;  %v3304_v60 = vpop.f32.mrf.mxu1 }
 0x1d1   : > { %v8612_v58 = vadd.f32 %v3799_v53, %v3383_v17  ;;  %v3387_v38 = vadd.f32 %v3304_v60, %v8516_v40 }
 0x1d2   : > { %v6616_v63 = vpop.f32.mrf.mxu0  ;;  %v6582_v26 = vpop.f32.mrf.mxu1 }
 0x1d3   : > { %v8615_v13 = vadd.f32 %v6616_v63, %v3386_v45  ;;  %v3390_v29 = vadd.f32 %v6582_v26, %v8519_v59 }
 0x1d4   : > { %v3802_v54 = vpop.f32.mrf.mxu0  ;;  %v3307_v61 = vpop.f32.mrf.mxu1 }
 0x1d5   : > { %v8618_v12 = vadd.f32 %v3802_v54, %v3384_v36  ;;  %v3388_v48 = vadd.f32 %v3307_v61, %v8522_v56 }
 0x1d6   : > { %v6619_v3 = vpop.f32.mrf.mxu0  ;;  %v6625_v43 = vpop.f32.mrf.mxu1 }
 0x1d7   : > { %v8621_v57 = vadd.f32 %v6619_v3, %v3389_v30  ;;  %v4513_v51 = vadd.f32 %v6625_v43, %v8525_v5 }
 0x1d8   : > { %v3815_v42 = vpop.f32.mrf.mxu0  ;;  %v4332_v40 = vpop.f32.mrf.mxu1 }
 0x1d9   : > { %v8623_v33 = vadd.f32 %v3815_v42, %v3387_v38  ;;  %v4511_v47 = vadd.f32 %v4332_v40, %v8528_v9 }
 0x1da   : > { %v6620_v24 = vpop.f32.mrf.mxu0  ;;  %v6626_v18 = vpop.f32.mrf.mxu1 }
 0x1db   : > { %v8625_v14 = vadd.f32 %v6620_v24, %v3390_v29  ;;  %v4514_v49 = vadd.f32 %v6626_v18, %v8531_v6 }
 0x1dc   : > { %v3818_v59 = vpop.f32.mrf.mxu0  ;;  %v4335_v17 = vpop.f32.mrf.mxu1 }
 0x1dd   : > { %v8628_v25 = vadd.f32 %v3818_v59, %v3388_v48  ;;  %v4512_v60 = vadd.f32 %v4335_v17, %v8534_v44 }
 0x1de   : > { %v6663_v56 = vpop.f32.mrf.mxu0  ;;  %v6629_v1 = vpop.f32.mrf.mxu1 }
 0x1df   : > { %9146 = vst [vmem:[#allocation7_spill] sm:$0xff] %v8628_v25  ;;  %v5025_v45 = vadd.f32 %v6663_v56, %v4513_v51  ;;  %v4517_v29 = vadd.f32 %v6629_v1, %v8537_v11  ;;  %v8643_v11 = vld [vmem:[%s9135_s3] ss:$0 sm:$0xff] }
 0x1e0   : > { %v4844_v55 = vpop.f32.mrf.mxu0  ;;  %v4348_v38 = vpop.f32.mrf.mxu1 }
 0x1e1   : > { %v5135_v36 = vmul.f32 %v8630_v37, %v5025_v45  ;;  %v5023_v41 = vadd.f32 %v4844_v55, %v4511_v47  ;;  %v4515_v55 = vadd.f32 %v4348_v38, %v8540_v35 }
 0x1e2   : > { %v6664_v30 = vpop.f32.mrf.mxu0  ;;  %v6630_v51 = vpop.f32.mrf.mxu1 }
 0x1e3   : > { %v6729_v53 = vcvt.f32.s32 %v5135_v36  ;;  %v5133_v5 = vmul.f32 %v8630_v37, %v5023_v41  ;;  %v5026_v63 = vadd.f32 %v6664_v30, %v4514_v49  ;;  %v6727_v61 = vand.u32 2147483647, %v5135_v36 }
 0x1e4   : > { %v4847_v26 = vpop.f32.mrf.mxu0  ;;  %v6732_v6 = vand.u32 2147483648, %v5135_v36 }
 0x1e5   : > { %v6730_v9 = vcvt.s32.f32 %v6729_v53  ;;  %v6713_v54 = vcvt.f32.s32 %v5133_v5  ;;  %v5136_v48 = vmul.f32 %v8630_v37, %v5026_v63  ;;  %v5024_v3 = vadd.f32 %v4847_v26, %v4512_v60 }
 0x1e6   : > { %v6667_v43 = vpop.f32.mrf.mxu0  ;;  %v6711_v18 = vand.u32 2147483647, %v5133_v5  ;;  %v6716_v59 = vand.u32 2147483648, %v5133_v5  ;;  %vm6728_vm8 = vcmp.lt.f32.partialorder %v6727_v61, 8388608.0  ;;  %v8650_v60 = vadd.f32 %v6630_v51, %v8543_v4 }
 0x1e7   : > { %v6731_v42 = vand.u32 2147483647, %v6730_v9  ;;  %v6714_v40 = vcvt.s32.f32 %v6713_v54  ;;  %v5029_v24 = vadd.f32 %v6667_v43, %v4517_v29  ;;  %v6737_v44 = vcvt.f32.s32 %v5136_v48  ;;  %v4351_v9 = vpop.f32.mrf.mxu1 }
 0x1e8   : > { %v5134_v17 = vmul.f32 %v8630_v37, %v5024_v3  ;;  %v6735_v45 = vand.u32 2147483647, %v5136_v48  ;;  %vm6712_vm9 = vcmp.lt.f32.partialorder %v6711_v18, 8388608.0  ;;  %v6740_v35 = vand.u32 2147483648, %v5136_v48 }
 0x1e9   : > { %v6733_v56 = vor.u32 %v6732_v6, %v6731_v42  ;;  %v6715_v47 = vand.u32 2147483647, %v6714_v40  ;;  %v8646_v1 = vmul.f32 %v8630_v37, %v5029_v24  ;;  %v6738_v41 = vcvt.s32.f32 %v6737_v44  ;;  %v6633_v44 = vpop.f32.mrf.mxu1 }
 0x1ea   : > { %v6721_v49 = vcvt.f32.s32 %v5134_v17  ;;  %v6719_v63 = vand.u32 2147483647, %v5134_v17  ;;  %vm8653_vm10 = vcmp.lt.f32.partialorder %v6735_v45, 8388608.0  ;;  %v6724_v4 = vand.u32 2147483648, %v5134_v17 }
 0x1eb   : > { %v6734_v30 = vsel %vm6728_vm8, %v6733_v56, %v5135_v36  ;;  %v6717_v53 = vor.u32 %v6716_v59, %v6715_v47  ;;  %v6739_v29 = vand.u32 2147483647, %v6738_v41  ;;  %v6761_v38 = vcvt.f32.s32 %v8646_v1  ;;  %v4860_v47 = vpop.f32.mrf.mxu0 }
 0x1ec   : > { %v5214_v26 = vmul.f32 %v6734_v30, %v8643_v11  ;;  %v6722_v54 = vcvt.s32.f32 %v6721_v49  ;;  %v6759_v42 = vand.u32 2147483647, %v8646_v1  ;;  %vm8660_vm11 = vcmp.lt.f32.partialorder %v6719_v63, 8388608.0 }
 0x1ed   : > { %v6718_v3 = vsel %vm6712_vm9, %v6717_v53, %v5133_v5  ;;  %v6741_v6 = vor.u32 %v6740_v35, %v6739_v29  ;;  %v6762_v5 = vcvt.s32.f32 %v6761_v38  ;;  %v6764_v56 = vand.u32 2147483648, %v8646_v1 }
 0x1ee   : > { %v7017_v36 = vcvt.f32.s32 %v5214_v26  ;;  %v5212_v61 = vmul.f32 %v6718_v3, %v8643_v11  ;;  %v6723_v24 = vand.u32 2147483647, %v6722_v54  ;;  %v7015_v18 = vand.u32 2147483647, %v5214_v26 }
 0x1ef   : > { %v6742_v41 = vsel %vm8653_vm10, %v6741_v6, %v5136_v48  ;;  %v6763_v30 = vand.u32 2147483647, %v6762_v5  ;;  %v7020_v63 = vand.u32 2147483648, %v5214_v26  ;;  %vm8670_vm12 = vcmp.lt.f32.partialorder %v6759_v42, 8388608.0  ;;  %v8677_v48 = vld [vmem:[%s9136_s4] ss:$0 sm:$0xff] }
 0x1f0   : > { %v7018_v59 = vcvt.s32.f32 %v7017_v36  ;;  %v7001_v51 = vcvt.f32.s32 %v5212_v61  ;;  %v6999_v45 = vand.u32 2147483647, %v5212_v61  ;;  %v6725_v49 = vor.u32 %v6724_v4, %v6723_v24  ;;  %v4364_v24 = vpop.f32.mrf.mxu1 }
 0x1f1   : > { %v5215_v3 = vmul.f32 %v6742_v41, %v8643_v11  ;;  %v6765_v38 = vor.u32 %v6764_v56, %v6763_v30  ;;  %v5027_v36 = vadd.f32 %v4860_v47, %v4515_v55  ;;  %v7004_v4 = vand.u32 2147483648, %v5212_v61 }
 0x1f2   : > { %v7019_v53 = vand.u32 2147483647, %v7018_v59  ;;  %v7002_v29 = vcvt.s32.f32 %v7001_v51  ;;  %v6726_v54 = vsel %vm8660_vm11, %v6725_v49, %v5134_v17  ;;  %vm7016_vm13 = vcmp.lt.f32.partialorder %v7015_v18, 8388608.0 }
 0x1f3   : > { %v7025_v6 = vcvt.f32.s32 %v5215_v3  ;;  %vm8679_vm14 = vcmp.lt.f32.partialorder %v6999_v45, 8388608.0  ;;  %v5213_v17 = vmul.f32 %v6726_v54, %v8643_v11  ;;  %v6766_v55 = vsel %vm8670_vm12, %v6765_v38, %v8646_v1  ;;  %v6668_v45 = vpop.f32.mrf.mxu0 }
 0x1f4   : > { %v7021_v25 = vor.u32 %v7020_v63, %v7019_v53  ;;  %v7003_v43 = vand.u32 2147483647, %v7002_v29  ;;  %v7023_v59 = vand.u32 2147483647, %v5215_v3  ;;  %v7028_v47 = vand.u32 2147483648, %v5215_v3 }
 0x1f5   : > { %v7026_v51 = vcvt.s32.f32 %v7025_v6  ;;  %v7009_v41 = vcvt.f32.s32 %v5213_v17  ;;  %v8689_v18 = vmul.f32 %v8630_v37, %v5027_v36  ;;  %v7007_v53 = vand.u32 2147483647, %v5213_v17  ;;  %v4863_v40 = vpop.f32.mrf.mxu0 }
 0x1f6   : > { %v7022_v42 = vsel %vm7016_vm13, %v7021_v25, %v5214_v26  ;;  %v7005_v5 = vor.u32 %v7004_v4, %v7003_v43  ;;  %v5218_v1 = vmul.f32 %v6766_v55, %v8643_v11  ;;  %v6634_v25 = vpop.f32.mrf.mxu1  ;;  %v4516_v26 = vadd.f32 %v4351_v9, %v8546_v27 }
 0x1f7   : > { %v5293_v56 = vadd.f32 %v7022_v42, %v8677_v48  ;;  %v7027_v30 = vand.u32 2147483647, %v7026_v51  ;;  %v7010_v63 = vcvt.s32.f32 %v7009_v41  ;;  %v4521_v29 = vadd.f32 %v6633_v44, %v8549_v20 }
 0x1f8   : > { %v7006_v49 = vsel %vm8679_vm14, %v7005_v5, %v5212_v61  ;;  %v8697_v54 = vadd.f32 %v4364_v24, %v8552_v19  ;;  %vm7024_vm15 = vcmp.lt.f32.partialorder %v7023_v59, 8388608.0  ;;  %v7049_v36 = vcvt.f32.s32 %v5218_v1  ;;  %v4367_v44 = vpop.f32.mrf.mxu1 }
 0x1f9   : > { %v5291_v35 = vadd.f32 %v7006_v49, %v8677_v48  ;;  %v7029_v38 = vor.u32 %v7028_v47, %v7027_v30  ;;  %v5329_v61 = vmax.f32 %v5293_v56, 0.0  ;;  %v7011_v43 = vand.u32 2147483647, %v7010_v63 }
 0x1fa   : > { %v7012_v4 = vand.u32 2147483648, %v5213_v17  ;;  %v6743_v6 = vand.u32 2147483647, %v8689_v18  ;;  %vm8702_vm0 = vcmp.lt.f32.partialorder %v7007_v53, 8388608.0  ;;  %v7050_v20 = vcvt.s32.f32 %v7049_v36  ;;  %v6671_v53 = vpop.f32.mrf.mxu0 }
 0x1fb   : > { %v7030_v27 = vsel %vm7024_vm15, %v7029_v38, %v5215_v3  ;;  %v6745_v19 = vcvt.f32.s32 %v8689_v18  ;;  %v7047_v42 = vand.u32 2147483647, %v5218_v1  ;;  %v7052_v5 = vand.u32 2147483648, %v5218_v1 }
 0x1fc   : > { %v5294_v24 = vadd.f32 %v7030_v27, %v8677_v48  ;;  %v7013_v55 = vor.u32 %v7012_v4, %v7011_v43  ;;  %v5327_v59 = vmax.f32 %v5291_v35, 0.0  ;;  %v7051_v51 = vand.u32 2147483647, %v7050_v20  ;;  %v6637_v43 = vpop.f32.mrf.mxu1 }
 0x1fd   : > { %v6746_v56 = vcvt.s32.f32 %v6745_v19  ;;  %v5030_v3 = vadd.f32 %v6668_v45, %v8650_v60  ;;  %v6748_v49 = vand.u32 2147483648, %v8689_v18  ;;  %v5028_v30 = vadd.f32 %v4863_v40, %v4516_v26 }
 0x1fe   : > { %v5330_v47 = vmax.f32 %v5294_v24, 0.0  ;;  %v7014_v41 = vsel %vm8702_vm0, %v7013_v55, %v5213_v17  ;;  %v7053_v38 = vor.u32 %v7052_v5, %v7051_v51  ;;  %v5365_v4 = vmin.f32 %v5329_v61, 127.0  ;;  %v4380_v51 = vpop.f32.mrf.mxu1 }
 0x1ff   : > { %v5292_v63 = vadd.f32 %v7014_v41, %v8677_v48  ;;  %v6747_v36 = vand.u32 2147483647, %v6746_v56  ;;  %v5140_v35 = vmul.f32 %v8630_v37, %v5030_v3  ;;  %vm8718_vm1 = vcmp.lt.f32.partialorder %v7047_v42, 8388608.0 }
 0x200   : > { %v5366_v27 = vmin.f32 %v5330_v47, 127.0  ;;  %v8723_v17 = vmul.f32 %v8630_v37, %v5028_v30  ;;  %v7054_v26 = vsel %vm8718_vm1, %v7053_v38, %v5218_v1  ;;  %v5033_v9 = vadd.f32 %v6671_v53, %v4521_v29 }
 0x201   : > { %v5328_v45 = vmax.f32 %v5292_v63, 0.0  ;;  %v6749_v40 = vor.u32 %v6748_v49, %v6747_v36  ;;  %vm6744_vm2 = vcmp.lt.f32.partialorder %v6743_v6, 8388608.0  ;;  %v6767_v19 = vand.u32 2147483647, %v5140_v35 }
 0x202   : > { %v6085_v20 = vpack.c.bf16 %v5366_v27, %v5365_v4  ;;  %v6769_v24 = vcvt.f32.s32 %v5140_v35  ;;  %v5363_v61 = vmin.f32 %v5327_v59, 127.0  ;;  %v4522_v5 = vadd.f32 %v6634_v25, %v8555_v52  ;;  %v4876_v25 = vpop.f32.mrf.mxu0 }
 0x203   : > { %v5364_v55 = vmin.f32 %v5328_v45, 127.0  ;;  %v6750_v42 = vsel %vm6744_vm2, %v6749_v40, %v8689_v18  ;;  %v8734_v1 = vadd.f32 %v7054_v26, %v8677_v48  ;;  %v6753_v56 = vcvt.f32.s32 %v8723_v17 }
 0x204   : > { %6167 = vst [vmem:[%s8730_s19 + $0x8] sm:$0xff] %v6085_v20   ;;  %v5216_v29 = vmul.f32 %v6750_v42, %v8643_v11  ;;  %v6770_v6 = vcvt.s32.f32 %v6769_v24  ;;  %v8739_v3 = vadd.f32 %v4367_v44, %v8558_v10  ;;  %v8742_v52 = vadd.f32 %v6637_v43, %v8561_v46  ;;  %v6672_v20 = vpop.f32.mrf.mxu0 }
 0x205   : > { %v6080_v59 = vpack.c.bf16 %v5364_v55, %v5363_v61  ;;  %v5143_v18 = vmul.f32 %v8630_v37, %v5033_v9  ;;  %vm8745_vm3 = vcmp.lt.f32.partialorder %v6767_v19, 8388608.0  ;;  %v6772_v49 = vand.u32 2147483648, %v5140_v35 }
 0x206   : > { %v7033_v47 = vcvt.f32.s32 %v5216_v29  ;;  %v8750_v30 = vadd.f32 %v4380_v51, %v8564_v28  ;;  %v6771_v53 = vand.u32 2147483647, %v6770_v6  ;;  %v6751_v10 = vand.u32 2147483647, %v8723_v17 }
 0x207   : > { %6081 = vst [vmem:[%s8730_s19] sm:$0xff] %v6080_v59   ;;  %v6754_v44 = vcvt.s32.f32 %v6753_v56  ;;  %v6793_v63 = vcvt.f32.s32 %v5143_v18  ;;  %v5333_v46 = vmax.f32 %v8734_v1, 0.0  ;;  %v6756_v36 = vand.u32 2147483648, %v8723_v17 }
 0x208   : > { %v7034_v38 = vcvt.s32.f32 %v7033_v47  ;;  %v5031_v43 = vadd.f32 %v4876_v25, %v8697_v54  ;;  %v7031_v4 = vand.u32 2147483647, %v5216_v29  ;;  %v6773_v27 = vor.u32 %v6772_v49, %v6771_v53 }
 0x209   : > { %v6755_v60 = vand.u32 2147483647, %v6754_v44  ;;  %v6794_v45 = vcvt.s32.f32 %v6793_v63  ;;  %v7036_v28 = vand.u32 2147483648, %v5216_v29  ;;  %v6791_v40 = vand.u32 2147483647, %v5143_v18 }
 0x20a   : > { %v7035_v26 = vand.u32 2147483647, %v7034_v38  ;;  %v5141_v9 = vmul.f32 %v8630_v37, %v5031_v43  ;;  %v6774_v19 = vsel %vm8745_vm3, %v6773_v27, %v5140_v35  ;;  %v6796_v55 = vand.u32 2147483648, %v5143_v18 }
 0x20b   : > { %v6757_v24 = vor.u32 %v6756_v36, %v6755_v60  ;;  %v6795_v61 = vand.u32 2147483647, %v6794_v45  ;;  %v5219_v51 = vmul.f32 %v6774_v19, %v8643_v11  ;;  %vm6752_vm4 = vcmp.lt.f32.partialorder %v6751_v10, 8388608.0 }
 0x20c   : > { %v7037_v42 = vor.u32 %v7036_v28, %v7035_v26  ;;  %v6777_v54 = vcvt.f32.s32 %v5141_v9  ;;  %vm7032_vm5 = vcmp.lt.f32.partialorder %v7031_v4, 8388608.0  ;;  %v5034_v59 = vadd.f32 %v6672_v20, %v4522_v5  ;;  %v4879_v20 = vpop.f32.mrf.mxu0 }
 0x20d   : > { %v6758_v6 = vsel %vm6752_vm4, %v6757_v24, %v8723_v17  ;;  %v6797_v56 = vor.u32 %v6796_v55, %v6795_v61  ;;  %v7057_v47 = vcvt.f32.s32 %v5219_v51  ;;  %vm6792_vm6 = vcmp.lt.f32.partialorder %v6791_v40, 8388608.0 }
 0x20e   : > { %v7038_v25 = vsel %vm7032_vm5, %v7037_v42, %v5216_v29  ;;  %v6775_v49 = vand.u32 2147483647, %v5141_v9  ;;  %v7055_v35 = vand.u32 2147483647, %v5219_v51  ;;  %v5217_v53 = vmul.f32 %v6758_v6, %v8643_v11 }
 0x20f   : > { %v5295_v41 = vadd.f32 %v7038_v25, %v8677_v48  ;;  %v6798_v44 = vsel %vm6792_vm6, %v6797_v56, %v5143_v18  ;;  %v7058_v63 = vcvt.s32.f32 %v7057_v47  ;;  %v6778_v10 = vcvt.s32.f32 %v6777_v54 }
 0x210   : > { %v5222_v38 = vmul.f32 %v6798_v44, %v8643_v11  ;;  %v6780_v36 = vand.u32 2147483648, %v5141_v9  ;;  %v7060_v43 = vand.u32 2147483648, %v5219_v51  ;;  %v7039_v4 = vand.u32 2147483647, %v5217_v53 }
 0x211   : > { %v7041_v17 = vcvt.f32.s32 %v5217_v53  ;;  %v5144_v5 = vmul.f32 %v8630_v37, %v5034_v59  ;;  %v7059_v29 = vand.u32 2147483647, %v7058_v63  ;;  %vm8766_vm7 = vcmp.lt.f32.partialorder %v6775_v49, 8388608.0  ;;  %v6638_v49 = vpop.f32.mrf.mxu1 }
 0x212   : > { %v7079_v27 = vand.u32 2147483647, %v5222_v38  ;;  %v7081_v60 = vcvt.f32.s32 %v5222_v38  ;;  %v5331_v26 = vmax.f32 %v5295_v41, 0.0  ;;  %vm8770_vm8 = vcmp.lt.f32.partialorder %v7055_v35, 8388608.0 }
 0x213   : > { %v7042_v28 = vcvt.s32.f32 %v7041_v17  ;;  %v6779_v40 = vand.u32 2147483647, %v6778_v10  ;;  %v7061_v19 = vor.u32 %v7060_v43, %v7059_v29  ;;  %v7044_v24 = vand.u32 2147483648, %v5217_v53  ;;  %v6675_v17 = vpop.f32.mrf.mxu0 }
 0x214   : > { %v7082_v61 = vcvt.s32.f32 %v7081_v60  ;;  %v7084_v55 = vand.u32 2147483648, %v5222_v38  ;;  %vm8774_vm9 = vcmp.lt.f32.partialorder %v7039_v4, 8388608.0  ;;  %v6801_v56 = vcvt.f32.s32 %v5144_v5 }
 0x215   : > { %v7043_v54 = vand.u32 2147483647, %v7042_v28  ;;  %v6781_v6 = vor.u32 %v6780_v36, %v6779_v40  ;;  %v7062_v59 = vsel %vm8770_vm8, %v7061_v19, %v5219_v51  ;;  %vm8780_vm10 = vcmp.lt.f32.partialorder %v7079_v27, 8388608.0  ;;  %v4383_v40 = vpop.f32.mrf.mxu1 }
 0x216   : > { %v7083_v47 = vand.u32 2147483647, %v7082_v61  ;;  %v5032_v41 = vadd.f32 %v4879_v20, %v8739_v3  ;;  %v5298_v35 = vadd.f32 %v7062_v59, %v8677_v48  ;;  %v6802_v10 = vcvt.s32.f32 %v6801_v56 }
 0x217   : > { %v7045_v44 = vor.u32 %v7044_v24, %v7043_v54  ;;  %v6782_v63 = vsel %vm8766_vm7, %v6781_v6, %v5141_v9  ;;  %v6799_v51 = vand.u32 2147483647, %v5144_v5  ;;  %v6804_v4 = vand.u32 2147483648, %v5144_v5  ;;  %v6641_v25 = vpop.f32.mrf.mxu1 }
 0x218   : > { %v7085_v36 = vor.u32 %v7084_v55, %v7083_v47  ;;  %v8789_v43 = vmul.f32 %v6782_v63, %v8643_v11  ;;  %v5334_v29 = vmax.f32 %v5298_v35, 0.0  ;;  %v6803_v60 = vand.u32 2147483647, %v6802_v10  ;;  %v4892_v47 = vpop.f32.mrf.mxu0 }
 0x219   : > { %v7046_v27 = vsel %vm8774_vm9, %v7045_v44, %v5217_v53  ;;  %v5142_v3 = vmul.f32 %v8630_v37, %v5032_v41  ;;  %v5369_v18 = vmin.f32 %v5333_v46, 127.0  ;;  %v5367_v20 = vmin.f32 %v5331_v26, 127.0 }
 0x21a   : > { %v5296_v9 = vadd.f32 %v7046_v27, %v8677_v48  ;;  %v7086_v45 = vsel %vm8780_vm10, %v7085_v36, %v5222_v38  ;;  %v7065_v28 = vcvt.f32.s32 %v8789_v43  ;;  %v5370_v19 = vmin.f32 %v5334_v29, 127.0 }
 0x21b   : > { %v6805_v24 = vor.u32 %v6804_v4, %v6803_v60  ;;  %v5037_v53 = vadd.f32 %v6675_v17, %v8742_v52  ;;  %v7063_v55 = vand.u32 2147483647, %v8789_v43  ;;  %vm6800_vm11 = vcmp.lt.f32.partialorder %v6799_v51, 8388608.0 }
 0x21c   : > { %v5332_v61 = vmax.f32 %v5296_v9, 0.0  ;;  %v7066_v42 = vcvt.s32.f32 %v7065_v28  ;;  %v6095_v1 = vpack.c.bf16 %v5370_v19, %v5369_v18  ;;  %v5301_v46 = vadd.f32 %v7086_v45, %v8677_v48 }
 0x21d   : > { %v6806_v54 = vsel %vm6800_vm11, %v6805_v24, %v5144_v5  ;;  %v6785_v6 = vcvt.f32.s32 %v5142_v3  ;;  %v7068_v59 = vand.u32 2147483648, %v8789_v43  ;;  %v4526_v52 = vadd.f32 %v6638_v49, %v8567_v16  ;;  %v6676_v49 = vpop.f32.mrf.mxu0 }
 0x21e   : > { %v5368_v38 = vmin.f32 %v5332_v61, 127.0  ;;  %v7067_v56 = vand.u32 2147483647, %v7066_v42  ;;  %v5223_v26 = vmul.f32 %v6806_v54, %v8643_v11  ;;  %6169 = vst [vmem:[%s8730_s19 + $0x18] sm:$0xff] %v6095_v1   ;;  %v4524_v41 = vadd.f32 %v4383_v40, %v8570_v8 }
 0x21f   : > { %v6786_v35 = vcvt.s32.f32 %v6785_v6  ;;  %v5147_v44 = vmul.f32 %v8630_v37, %v5037_v53  ;;  %v6783_v36 = vand.u32 2147483647, %v5142_v3  ;;  %v6788_v4 = vand.u32 2147483648, %v5142_v3  ;;  %v4396_v6 = vpop.f32.mrf.mxu1 }
 0x220   : > { %v6090_v63 = vpack.c.bf16 %v5368_v38, %v5367_v20  ;;  %v7069_v5 = vor.u32 %v7068_v59, %v7067_v56  ;;  %v7089_v10 = vcvt.f32.s32 %v5223_v26  ;;  %v8810_v17 = vadd.f32 %v6641_v25, %v8573_v15 }
 0x221   : > { %v6787_v51 = vand.u32 2147483647, %v6786_v35  ;;  %v6825_v29 = vcvt.f32.s32 %v5147_v44  ;;  %v5337_v27 = vmax.f32 %v5301_v46, 0.0  ;;  %vm8813_vm12 = vcmp.lt.f32.partialorder %v7063_v55, 8388608.0 }
 0x222   : > { %6168 = vst [vmem:[%s8730_s19 + $0x10] sm:$0xff] %v6090_v63   ;;  %v7087_v16 = vand.u32 2147483647, %v5223_v26  ;;  %v7090_v8 = vcvt.s32.f32 %v7089_v10  ;;  %v7070_v18 = vsel %vm8813_vm12, %v7069_v5, %v8789_v43  ;;  %v6823_v45 = vand.u32 2147483647, %v5147_v44 }
 0x223   : > { %v6789_v9 = vor.u32 %v6788_v4, %v6787_v51  ;;  %v6826_v28 = vcvt.s32.f32 %v6825_v29  ;;  %v7092_v15 = vand.u32 2147483648, %v5223_v26  ;;  %vm6784_vm13 = vcmp.lt.f32.partialorder %v6783_v36, 8388608.0 }
 0x224   : > { %v7091_v40 = vand.u32 2147483647, %v7090_v8  ;;  %v5035_v20 = vadd.f32 %v4892_v47, %v8750_v30  ;;  %v6828_v53 = vand.u32 2147483648, %v5147_v44  ;;  %v5038_v61 = vadd.f32 %v6676_v49, %v4526_v52  ;;  %v6642_v8 = vpop.f32.mrf.mxu1 }
 0x225   : > { %v6790_v19 = vsel %vm6784_vm13, %v6789_v9, %v5142_v3  ;;  %v6827_v24 = vand.u32 2147483647, %v6826_v28  ;;  %v5299_v55 = vadd.f32 %v7070_v18, %v8677_v48  ;;  %v5373_v43 = vmin.f32 %v5337_v27, 127.0  ;;  %v4895_v3 = vpop.f32.mrf.mxu0 }
 0x226   : > { %v7093_v42 = vor.u32 %v7092_v15, %v7091_v40  ;;  %v5221_v1 = vmul.f32 %v6790_v19, %v8643_v11  ;;  %v5145_v46 = vmul.f32 %v8630_v37, %v5035_v20  ;;  %vm7088_vm14 = vcmp.lt.f32.partialorder %v7087_v16, 8388608.0 }
 0x227   : > { %vm6824_vm15 = vcmp.lt.f32.partialorder %v6823_v45, 8388608.0  ;;  %v6829_v54 = vor.u32 %v6828_v53, %v6827_v24  ;;  %v5148_v30 = vmul.f32 %v8630_v37, %v5038_v61  ;;  %v5335_v63 = vmax.f32 %v5299_v55, 0.0  ;;  %v6679_v45 = vpop.f32.mrf.mxu0 }
 0x228   : > { %v7094_v38 = vsel %vm7088_vm14, %v7093_v42, %v5223_v26  ;;  %v7071_v56 = vand.u32 2147483647, %v5221_v1  ;;  %v7073_v59 = vcvt.f32.s32 %v5221_v1  ;;  %v6807_v52 = vand.u32 2147483647, %v5145_v46 }
 0x229   : > { %v5302_v25 = vadd.f32 %v7094_v38, %v8677_v48  ;;  %v6830_v47 = vsel %vm6824_vm15, %v6829_v54, %v5147_v44  ;;  %v6809_v35 = vcvt.f32.s32 %v5145_v46  ;;  %v8830_v36 = vadd.f32 %v4396_v6, %v8576_v31  ;;  %v4399_v54 = vpop.f32.mrf.mxu1 }
 0x22a   : > { %v7074_v5 = vcvt.s32.f32 %v7073_v59  ;;  %v8827_v10 = vmul.f32 %v6830_v47, %v8643_v11  ;;  %v7076_v26 = vand.u32 2147483648, %v5221_v1  ;;  %v5036_v29 = vadd.f32 %v4895_v3, %v4524_v41 }
 0x22b   : > { %v5338_v51 = vmax.f32 %v5302_v25, 0.0  ;;  %v6810_v4 = vcvt.s32.f32 %v6809_v35  ;;  %vm8832_vm0 = vcmp.lt.f32.partialorder %v7071_v56, 8388608.0  ;;  %v6812_v16 = vand.u32 2147483648, %v5145_v46 }
 0x22c   : > { %v7075_v60 = vand.u32 2147483647, %v7074_v5  ;;  %v7113_v44 = vcvt.f32.s32 %v8827_v10  ;;  %vm8837_vm1 = vcmp.lt.f32.partialorder %v6807_v52, 8388608.0  ;;  %v6833_v9 = vcvt.f32.s32 %v5148_v30 }
 0x22d   : > { %v5374_v49 = vmin.f32 %v5338_v51, 127.0  ;;  %v6811_v31 = vand.u32 2147483647, %v6810_v4  ;;  %v7111_v41 = vand.u32 2147483647, %v8827_v10  ;;  %v5146_v53 = vmul.f32 %v8630_v37, %v5036_v29 }
 0x22e   : > { %v7077_v28 = vor.u32 %v7076_v26, %v7075_v60  ;;  %v7114_v40 = vcvt.s32.f32 %v7113_v44  ;;  %v6831_v15 = vand.u32 2147483647, %v5148_v30  ;;  %v6834_v24 = vcvt.s32.f32 %v6833_v9 }
 0x22f   : > { %v6105_v20 = vpack.c.bf16 %v5374_v49, %v5373_v43  ;;  %v6813_v19 = vor.u32 %v6812_v16, %v6811_v31  ;;  %v7116_v42 = vand.u32 2147483648, %v8827_v10  ;;  %v5041_v6 = vadd.f32 %v6679_v45, %v8810_v17 }
 0x230   : > { %v7078_v61 = vsel %vm8832_vm0, %v7077_v28, %v5221_v1  ;;  %v7115_v55 = vand.u32 2147483647, %v7114_v40  ;;  %v6835_v43 = vand.u32 2147483647, %v6834_v24  ;;  %v6836_v59 = vand.u32 2147483648, %v5148_v30 }
 0x231   : > { %6171 = vst [vmem:[%s8730_s19 + $0x28] sm:$0xff] %v6105_v20   ;;  %v5300_v38 = vadd.f32 %v7078_v61, %v8677_v48  ;;  %v6814_v56 = vsel %vm8837_vm1, %v6813_v19, %v5145_v46  ;;  %v4530_v47 = vadd.f32 %v6642_v8, %v8579_v39  ;;  %v6817_v1 = vcvt.f32.s32 %v5146_v53 }
 0x232   : > { %v7117_v3 = vor.u32 %v7116_v42, %v7115_v55  ;;  %v5224_v25 = vmul.f32 %v6814_v56, %v8643_v11  ;;  %v6837_v35 = vor.u32 %v6836_v59, %v6835_v43  ;;  %v8854_v5 = vadd.f32 %v4399_v54, %v8582_v32 }
 0x233   : > { %v5336_v52 = vmax.f32 %v5300_v38, 0.0  ;;  %v5151_v17 = vmul.f32 %v8630_v37, %v5041_v6  ;;  %v5371_v51 = vmin.f32 %v5335_v63, 127.0  ;;  %vm6832_vm2 = vcmp.lt.f32.partialorder %v6831_v15, 8388608.0 }
 0x234   : > { %v7097_v26 = vcvt.f32.s32 %v5224_v25  ;;  %v6815_v4 = vand.u32 2147483647, %v5146_v53  ;;  %vm8857_vm3 = vcmp.lt.f32.partialorder %v7111_v41, 8388608.0  ;;  %v6838_v27 = vsel %vm6832_vm2, %v6837_v35, %v5148_v30  ;;  %v4908_v30 = vpop.f32.mrf.mxu0 }
 0x235   : > { %v5372_v46 = vmin.f32 %v5336_v52, 127.0  ;;  %v6818_v39 = vcvt.s32.f32 %v6817_v1  ;;  %v7118_v60 = vsel %vm8857_vm3, %v7117_v3, %v8827_v10  ;;  %v7095_v32 = vand.u32 2147483647, %v5224_v25  ;;  %v6645_v3 = vpop.f32.mrf.mxu1 }
 0x236   : > { %v7098_v44 = vcvt.s32.f32 %v7097_v26  ;;  %v5227_v16 = vmul.f32 %v6838_v27, %v8643_v11  ;;  %v6820_v49 = vand.u32 2147483648, %v5146_v53  ;;  %v6857_v18 = vcvt.f32.s32 %v5151_v17  ;;  %v6680_v1 = vpop.f32.mrf.mxu0 }
 0x237   : > { %v6100_v63 = vpack.c.bf16 %v5372_v46, %v5371_v51  ;;  %v6819_v8 = vand.u32 2147483647, %v6818_v39  ;;  %v7100_v9 = vand.u32 2147483648, %v5224_v25  ;;  %vm8865_vm4 = vcmp.lt.f32.partialorder %v6815_v4, 8388608.0 }
 0x238   : > { %v7099_v31 = vand.u32 2147483647, %v7098_v44  ;;  %v7121_v45 = vcvt.f32.s32 %v5227_v16  ;;  %v5305_v41 = vadd.f32 %v7118_v60, %v8677_v48  ;;  %v6855_v40 = vand.u32 2147483647, %v5151_v17 }
 0x239   : > { %6170 = vst [vmem:[%s8730_s19 + $0x20] sm:$0xff] %v6100_v63   ;;  %v6821_v10 = vor.u32 %v6820_v49, %v6819_v8  ;;  %v6858_v15 = vcvt.s32.f32 %v6857_v18  ;;  %vm8871_vm5 = vcmp.lt.f32.partialorder %v7095_v32, 8388608.0  ;;  %v7119_v24 = vand.u32 2147483647, %v5227_v16  ;;  %v4412_v32 = vpop.f32.mrf.mxu1  ;;  %v4911_v63 = vpop.f32.mrf.mxu0 }
 0x23a   : > { %v7101_v19 = vor.u32 %v7100_v9, %v7099_v31  ;;  %v7122_v61 = vcvt.s32.f32 %v7121_v45  ;;  %v6860_v54 = vand.u32 2147483648, %v5151_v17  ;;  %v5039_v6 = vadd.f32 %v4908_v30, %v8830_v36 }
 0x23b   : > { %v6822_v55 = vsel %vm8865_vm4, %v6821_v10, %v5146_v53  ;;  %v6859_v42 = vand.u32 2147483647, %v6858_v15  ;;  %v7124_v43 = vand.u32 2147483648, %v5227_v16  ;;  %v5341_v52 = vmax.f32 %v5305_v41, 0.0  ;;  %v6646_v20 = vpop.f32.mrf.mxu1 }
 0x23c   : > { %v7102_v38 = vsel %vm8871_vm5, %v7101_v19, %v5224_v25  ;;  %v7123_v56 = vand.u32 2147483647, %v7122_v61  ;;  %v5225_v59 = vmul.f32 %v6822_v55, %v8643_v11  ;;  %vm6856_vm6 = vcmp.lt.f32.partialorder %v6855_v40, 8388608.0  ;;  %v6683_v19 = vpop.f32.mrf.mxu0 }
 0x23d   : > { %v6861_v35 = vor.u32 %v6860_v54, %v6859_v42  ;;  %v5149_v51 = vmul.f32 %v8630_v37, %v5039_v6  ;;  %v5303_v53 = vadd.f32 %v7102_v38, %v8677_v48  ;;  %vm7120_vm7 = vcmp.lt.f32.partialorder %v7119_v24, 8388608.0 }
 0x23e   : > { %v7125_v26 = vor.u32 %v7124_v43, %v7123_v56  ;;  %v7105_v4 = vcvt.f32.s32 %v5225_v59  ;;  %v7103_v36 = vand.u32 2147483647, %v5225_v59  ;;  %v5042_v25 = vadd.f32 %v6680_v1, %v4530_v47 }
 0x23f   : > { %v6862_v46 = vsel %vm6856_vm6, %v6861_v35, %v5151_v17  ;;  %v6841_v29 = vcvt.f32.s32 %v5149_v51  ;;  %v6839_v44 = vand.u32 2147483647, %v5149_v51  ;;  %v5377_v8 = vmin.f32 %v5341_v52, 127.0 }
 0x240   : > { %v7126_v27 = vsel %vm7120_vm7, %v7125_v26, %v5227_v16  ;;  %v7106_v39 = vcvt.s32.f32 %v7105_v4  ;;  %v5230_v60 = vmul.f32 %v6862_v46, %v8643_v11  ;;  %v4533_v18 = vadd.f32 %v6645_v3, %v8585_v0  ;;  %v4415_v26 = vpop.f32.mrf.mxu1 }
 0x241   : > { %v5306_v49 = vadd.f32 %v7126_v27, %v8677_v48  ;;  %v6842_v31 = vcvt.s32.f32 %v6841_v29  ;;  %v5339_v9 = vmax.f32 %v5303_v53, 0.0  ;;  %v7108_v28 = vand.u32 2147483648, %v5225_v59 }
 0x242   : > { %v7107_v45 = vand.u32 2147483647, %v7106_v39  ;;  %v7145_v30 = vcvt.f32.s32 %v5230_v60  ;;  %v6844_v47 = vand.u32 2147483648, %v5149_v51  ;;  %v5152_v16 = vmul.f32 %v8630_v37, %v5042_v25 }
 0x243   : > { %v5342_v17 = vmax.f32 %v5306_v49, 0.0  ;;  %v6843_v41 = vand.u32 2147483647, %v6842_v31  ;;  %vm7104_vm8 = vcmp.lt.f32.partialorder %v7103_v36, 8388608.0  ;;  %vm8887_vm9 = vcmp.lt.f32.partialorder %v6839_v44, 8388608.0  ;;  %v4924_v36 = vpop.f32.mrf.mxu0 }
 0x244   : > { %v7109_v10 = vor.u32 %v7108_v28, %v7107_v45  ;;  %v7146_v40 = vcvt.s32.f32 %v7145_v30  ;;  %v7143_v24 = vand.u32 2147483647, %v5230_v60  ;;  %v6865_v55 = vcvt.f32.s32 %v5152_v16 }
 0x245   : > { %v5378_v0 = vmin.f32 %v5342_v17, 127.0  ;;  %v6845_v61 = vor.u32 %v6844_v47, %v6843_v41  ;;  %v7148_v6 = vand.u32 2147483648, %v5230_v60  ;;  %v5040_v38 = vadd.f32 %v4911_v63, %v8854_v5 }
 0x246   : > { %v7110_v42 = vsel %vm7104_vm8, %v7109_v10, %v5225_v59  ;;  %v7147_v54 = vand.u32 2147483647, %v7146_v40  ;;  %v6863_v1 = vand.u32 2147483647, %v5152_v16  ;;  %v6866_v53 = vcvt.s32.f32 %v6865_v55 }
 0x247   : > { %v6115_v56 = vpack.c.bf16 %v5378_v0, %v5377_v8  ;;  %v5304_v43 = vadd.f32 %v7110_v42, %v8677_v48  ;;  %v6846_v3 = vsel %vm8887_vm9, %v6845_v61, %v5149_v51  ;;  %v5150_v4 = vmul.f32 %v8630_v37, %v5040_v38 }
 0x248   : > { %v7149_v52 = vor.u32 %v7148_v6, %v7147_v54  ;;  %v5228_v35 = vmul.f32 %v6846_v3, %v8643_v11  ;;  %vm7144_vm10 = vcmp.lt.f32.partialorder %v7143_v24, 8388608.0  ;;  %v4531_v5 = vadd.f32 %v4412_v32, %v8588_v62  ;;  %v6649_v62 = vpop.f32.mrf.mxu1  ;;  %v6684_v32 = vpop.f32.mrf.mxu0 }
 0x249   : > { %6173 = vst [vmem:[%s8730_s19 + $0x38] sm:$0xff] %v6115_v56   ;;  %v5340_v59 = vmax.f32 %v5304_v43, 0.0  ;;  %v4534_v46 = vadd.f32 %v6646_v20, %v8591_v34  ;;  %v5375_v29 = vmin.f32 %v5339_v9, 127.0  ;;  %v5045_v51 = vadd.f32 %v6683_v19, %v4533_v18 }
 0x24a   : > { %v7150_v25 = vsel %vm7144_vm10, %v7149_v52, %v5230_v60  ;;  %v7129_v27 = vcvt.f32.s32 %v5228_v35  ;;  %vm8900_vm11 = vcmp.lt.f32.partialorder %v6863_v1, 8388608.0  ;;  %v6867_v63 = vand.u32 2147483647, %v6866_v53 }
 0x24b   : > { %v5376_v39 = vmin.f32 %v5340_v59, 127.0  ;;  %v6868_v8 = vand.u32 2147483648, %v5152_v16  ;;  %v5309_v49 = vadd.f32 %v7150_v25, %v8677_v48  ;;  %v7127_v31 = vand.u32 2147483647, %v5228_v35 }
 0x24c   : > { %v7130_v45 = vcvt.s32.f32 %v7129_v27  ;;  %v6849_v28 = vcvt.f32.s32 %v5150_v4  ;;  %v7132_v9 = vand.u32 2147483648, %v5228_v35  ;;  %v6847_v30 = vand.u32 2147483647, %v5150_v4 }
 0x24d   : > { %v6110_v34 = vpack.c.bf16 %v5376_v39, %v5375_v29  ;;  %v6869_v60 = vor.u32 %v6868_v8, %v6867_v63  ;;  %v5155_v41 = vmul.f32 %v8630_v37, %v5045_v51  ;;  %v5043_v47 = vadd.f32 %v4924_v36, %v4531_v5 }
 0x24e   : > { %v7131_v18 = vand.u32 2147483647, %v7130_v45  ;;  %v6850_v17 = vcvt.s32.f32 %v6849_v28  ;;  %v8910_v40 = vadd.f32 %v4415_v26, %v8594_v50  ;;  %v8913_v15 = vadd.f32 %v6649_v62, %v8597_v7 }
 0x24f   : > { %6172 = vst [vmem:[%s8730_s19 + $0x30] sm:$0xff] %v6110_v34   ;;  %v6870_v10 = vsel %vm8900_vm11, %v6869_v60, %v5152_v16  ;;  %v5046_v20 = vadd.f32 %v6684_v32, %v4534_v46  ;;  %v5345_v19 = vmax.f32 %v5309_v49, 0.0  ;;  %vm7128_vm12 = vcmp.lt.f32.partialorder %v7127_v31, 8388608.0 }
 0x250   : > { %v7133_v0 = vor.u32 %v7132_v9, %v7131_v18  ;;  %v5231_v24 = vmul.f32 %v6870_v10, %v8643_v11  ;;  %v6851_v61 = vand.u32 2147483647, %v6850_v17  ;;  %v6852_v55 = vand.u32 2147483648, %v5150_v4 }
 0x251   : > { %v6889_v42 = vcvt.f32.s32 %v5155_v41  ;;  %v5153_v54 = vmul.f32 %v8630_v37, %v5043_v47  ;;  %vm6848_vm13 = vcmp.lt.f32.partialorder %v6847_v30, 8388608.0  ;;  %v6887_v16 = vand.u32 2147483647, %v5155_v41 }
 0x252   : > { %v7134_v6 = vsel %vm7128_vm12, %v7133_v0, %v5228_v35  ;;  %v7153_v38 = vcvt.f32.s32 %v5231_v24  ;;  %v7151_v50 = vand.u32 2147483647, %v5231_v24  ;;  %v6853_v56 = vor.u32 %v6852_v55, %v6851_v61 }
 0x253   : > { %v6890_v43 = vcvt.s32.f32 %v6889_v42  ;;  %v5156_v7 = vmul.f32 %v8630_v37, %v5046_v20  ;;  %v8918_v3 = vmin.f32 %v5345_v19, 127.0  ;;  %v8921_v1 = vadd.f32 %v7134_v6, %v8677_v48  ;;  %v4428_v6 = vpop.f32.mrf.mxu1 }
 0x254   : > { %v7154_v52 = vcvt.s32.f32 %v7153_v38  ;;  %v6873_v53 = vcvt.f32.s32 %v5153_v54  ;;  %v7156_v26 = vand.u32 2147483648, %v5231_v24  ;;  %v6854_v36 = vsel %vm6848_vm13, %v6853_v56, %v5150_v4  ;;  %v8946_v38 = vld [vmem:[%s9135_s3] ss:$0 sm:$0xff] }
 0x255   : > { %v6891_v59 = vand.u32 2147483647, %v6890_v43  ;;  %v6892_v5 = vand.u32 2147483648, %v5155_v41  ;;  %v5229_v46 = vmul.f32 %v6854_v36, %v8643_v11  ;;  %vm8924_vm14 = vcmp.lt.f32.partialorder %v6887_v16, 8388608.0 }
 0x256   : > { %v7155_v35 = vand.u32 2147483647, %v7154_v52  ;;  %v6874_v25 = vcvt.s32.f32 %v6873_v53  ;;  %vm8928_vm15 = vcmp.lt.f32.partialorder %v7151_v50, 8388608.0  ;;  %v6871_v39 = vand.u32 2147483647, %v5153_v54 }
 0x257   : > { %v6893_v51 = vor.u32 %v6892_v5, %v6891_v59  ;;  %v6897_v44 = vcvt.f32.s32 %v5156_v7  ;;  %v5343_v63 = vmax.f32 %v8921_v1, 0.0  ;;  %v7137_v8 = vcvt.f32.s32 %v5229_v46 }
 0x258   : > { %v7157_v4 = vor.u32 %v7156_v26, %v7155_v35  ;;  %v6876_v49 = vand.u32 2147483648, %v5153_v54  ;;  %v6875_v45 = vand.u32 2147483647, %v6874_v25  ;;  %v6895_v28 = vand.u32 2147483647, %v5156_v7 }
 0x259   : > { %v6894_v31 = vsel %vm8924_vm14, %v6893_v51, %v5155_v41  ;;  %v6898_v62 = vcvt.s32.f32 %v6897_v44  ;;  %v7135_v34 = vand.u32 2147483647, %v5229_v46  ;;  %v7138_v9 = vcvt.s32.f32 %v7137_v8  ;;  %v4927_v41 = vpop.f32.mrf.mxu0 }
 0x25a   : > { %v7158_v32 = vsel %vm8928_vm15, %v7157_v4, %v5231_v24  ;;  %v5234_v60 = vmul.f32 %v6894_v31, %v8643_v11  ;;  %v6877_v18 = vor.u32 %v6876_v49, %v6875_v45  ;;  %v6900_v47 = vand.u32 2147483648, %v5156_v7 }
 0x25b   : > { %v5310_v30 = vadd.f32 %v7158_v32, %v8677_v48  ;;  %v6899_v17 = vand.u32 2147483647, %v6898_v62  ;;  %v7139_v10 = vand.u32 2147483647, %v7138_v9  ;;  %v7140_v20 = vand.u32 2147483648, %v5229_v46  ;;  %v6687_v29 = vpop.f32.mrf.mxu0 }
 0x25c   : > { %v7177_v19 = vcvt.f32.s32 %v5234_v60  ;;  %vm6872_vm0 = vcmp.lt.f32.partialorder %v6871_v39, 8388608.0  ;;  %vm8939_vm1 = vcmp.lt.f32.partialorder %v6895_v28, 8388608.0  ;;  %vm7136_vm2 = vcmp.lt.f32.partialorder %v7135_v34, 8388608.0 }
 0x25d   : > { %v5346_v0 = vmax.f32 %v5310_v30, 0.0  ;;  %v6878_v61 = vsel %vm6872_vm0, %v6877_v18, %v5153_v54  ;;  %v6901_v24 = vor.u32 %v6900_v47, %v6899_v17  ;;  %v7141_v42 = vor.u32 %v7140_v20, %v7139_v10  ;;  %v4940_v62 = vpop.f32.mrf.mxu0 }
 0x25e   : > { %v7178_v11 = vcvt.s32.f32 %v7177_v19  ;;  %v5232_v16 = vmul.f32 %v8946_v38, %v6878_v61  ;;  %v7175_v56 = vand.u32 2147483647, %v5234_v60  ;;  %v5044_v43 = vadd.f32 %v4927_v41, %v8910_v40 }
 0x25f   : > { %v5382_v50 = vmin.f32 %v5346_v0, 127.0  ;;  %v6902_v54 = vsel %vm8939_vm1, %v6901_v24, %v5156_v7  ;;  %v7142_v1 = vsel %vm7136_vm2, %v7141_v42, %v5229_v46  ;;  %v7180_v53 = vand.u32 2147483648, %v5234_v60  ;;  %v6650_v7 = vpop.f32.mrf.mxu1  ;;  %v6688_v24 = vpop.f32.mrf.mxu0  ;;  %v8972_v42 = vld [vmem:[%s9136_s4] ss:$0 sm:$0xff] }
 0x260   : > { %v7179_v52 = vand.u32 2147483647, %v7178_v11  ;;  %v7161_v26 = vcvt.f32.s32 %v5232_v16  ;;  %v5308_v59 = vadd.f32 %v7142_v1, %v8677_v48  ;;  %v7159_v5 = vand.u32 2147483647, %v5232_v16 }
 0x261   : > { %v6125_v36 = vpack.c.bf16 %v5382_v50, %v8918_v3  ;;  %v5235_v35 = vmul.f32 %v8946_v38, %v6902_v54  ;;  %v4535_v27 = vadd.f32 %v4428_v6, %v8600_v22  ;;  %v5154_v40 = vmul.f32 %v8630_v37, %v5044_v43  ;;  %v4431_v9 = vpop.f32.mrf.mxu1 }
 0x262   : > { %v7181_v25 = vor.u32 %v7180_v53, %v7179_v52  ;;  %v7162_v51 = vcvt.s32.f32 %v7161_v26  ;;  %v5379_v39 = vmin.f32 %v5343_v63, 127.0  ;;  %v5344_v46 = vmax.f32 %v5308_v59, 0.0 }
 0x263   : > { %6175 = vst [vmem:[%s8730_s19 + $0x48] sm:$0xff] %v6125_v36   ;;  %vm7176_vm3 = vcmp.lt.f32.partialorder %v7175_v56, 8388608.0  ;;  %v7185_v44 = vcvt.f32.s32 %v5235_v35  ;;  %v7164_v8 = vand.u32 2147483648, %v5232_v16  ;;  %v6881_v49 = vcvt.f32.s32 %v5154_v40  ;;  %v6653_v6 = vpop.f32.mrf.mxu1 }
 0x264   : > { %v7182_v4 = vsel %vm7176_vm3, %v7181_v25, %v5234_v60  ;;  %v7163_v3 = vand.u32 2147483647, %v7162_v51  ;;  %v5380_v31 = vmin.f32 %v5344_v46, 127.0  ;;  %vm8959_vm4 = vcmp.lt.f32.partialorder %v7159_v5, 8388608.0 }
 0x265   : > { %v5313_v45 = vadd.f32 %v7182_v4, %v8677_v48  ;;  %v7186_v22 = vcvt.s32.f32 %v7185_v44  ;;  %v7183_v63 = vand.u32 2147483647, %v5235_v35  ;;  %v7188_v34 = vand.u32 2147483648, %v5235_v35 }
 0x266   : > { %v7165_v32 = vor.u32 %v7164_v8, %v7163_v3  ;;  %v6882_v30 = vcvt.s32.f32 %v6881_v49  ;;  %v6120_v18 = vpack.c.bf16 %v5380_v31, %v5379_v39  ;;  %v6879_v17 = vand.u32 2147483647, %v5154_v40  ;;  %v4444_v49 = vpop.f32.mrf.mxu1 }
 0x267   : > { %v7187_v60 = vand.u32 2147483647, %v7186_v22  ;;  %v5049_v47 = vadd.f32 %v6687_v29, %v8913_v15  ;;  %v6884_v20 = vand.u32 2147483648, %v5154_v40  ;;  %v5047_v19 = vadd.f32 %v4940_v62, %v4535_v27  ;;  %v4943_v27 = vpop.f32.mrf.mxu0 }
 0x268   : > { %v7166_v48 = vsel %vm8959_vm4, %v7165_v32, %v5232_v16  ;;  %v6883_v10 = vand.u32 2147483647, %v6882_v30  ;;  %6174 = vst [vmem:[%s8730_s19 + $0x40] sm:$0xff] %v6120_v18   ;;  %v5349_v41 = vmax.f32 %v5313_v45, 0.0  ;;  %v4538_v0 = vadd.f32 %v6650_v7, %v8603_v2 }
 0x269   : > { %v7189_v61 = vor.u32 %v7188_v34, %v7187_v60  ;;  %v5159_v55 = vmul.f32 %v8630_v37, %v5049_v47  ;;  %v5311_v15 = vadd.f32 %v8972_v42, %v7166_v48  ;;  %vm7184_vm5 = vcmp.lt.f32.partialorder %v7183_v63, 8388608.0 }
 0x26a   : > { %v6885_v11 = vor.u32 %v6884_v20, %v6883_v10  ;;  %v5157_v16 = vmul.f32 %v8630_v37, %v5047_v19  ;;  %vm6880_vm6 = vcmp.lt.f32.partialorder %v6879_v17, 8388608.0  ;;  %v4536_v43 = vadd.f32 %v4431_v9, %v8606_v23 }
 0x26b   : > { %v7190_v50 = vsel %vm7184_vm5, %v7189_v61, %v5235_v35  ;;  %v6919_v56 = vand.u32 2147483647, %v5159_v55  ;;  %v6921_v2 = vcvt.f32.s32 %v5159_v55  ;;  %v5050_v52 = vadd.f32 %v6688_v24, %v4538_v0 }
 0x26c   : > { %v5314_v54 = vadd.f32 %v8972_v42, %v7190_v50  ;;  %v6886_v1 = vsel %vm6880_vm6, %v6885_v11, %v5154_v40  ;;  %v5385_v53 = vmin.f32 %v5349_v41, 127.0  ;;  %v8980_v36 = vadd.f32 %v6653_v6, %v8609_v21  ;;  %v6654_v11 = vpop.f32.mrf.mxu1 }
 0x26d   : > { %v5233_v26 = vmul.f32 %v8946_v38, %v6886_v1  ;;  %v6922_v59 = vcvt.s32.f32 %v6921_v2  ;;  %v5347_v5 = vmax.f32 %v5311_v15, 0.0  ;;  %v6924_v25 = vand.u32 2147483648, %v5159_v55 }
 0x26e   : > { %v5350_v29 = vmax.f32 %v5314_v54, 0.0  ;;  %v6905_v35 = vcvt.f32.s32 %v5157_v16  ;;  %vm8982_vm7 = vcmp.lt.f32.partialorder %v6919_v56, 8388608.0  ;;  %v6903_v40 = vand.u32 2147483647, %v5157_v16  ;;  %v6691_v56 = vpop.f32.mrf.mxu0  ;;  %v4447_v7 = vpop.f32.mrf.mxu1 }
 0x26f   : > { %v7169_v51 = vcvt.f32.s32 %v5233_v26  ;;  %v6923_v23 = vand.u32 2147483647, %v6922_v59  ;;  %v6908_v44 = vand.u32 2147483648, %v5157_v16  ;;  %v5160_v21 = vmul.f32 %v8630_v37, %v5050_v52 }
 0x270   : > { %v5386_v39 = vmin.f32 %v5350_v29, 127.0  ;;  %v6906_v46 = vcvt.s32.f32 %v6905_v35  ;;  %v7167_v4 = vand.u32 2147483647, %v5233_v26  ;;  %v5048_v31 = vadd.f32 %v4943_v27, %v4536_v43 }
 0x271   : > { %v7170_v3 = vcvt.s32.f32 %v7169_v51  ;;  %v6925_v8 = vor.u32 %v6924_v25, %v6923_v23  ;;  %v7172_v28 = vand.u32 2147483648, %v5233_v26  ;;  %v6929_v62 = vcvt.f32.s32 %v5160_v21 }
 0x272   : > { %v6135_v45 = vpack.c.bf16 %v5386_v39, %v5385_v53  ;;  %v6907_v22 = vand.u32 2147483647, %v6906_v46  ;;  %v6927_v34 = vand.u32 2147483647, %v5160_v21  ;;  %v5158_v9 = vmul.f32 %v8630_v37, %v5048_v31 }
 0x273   : > { %v7171_v32 = vand.u32 2147483647, %v7170_v3  ;;  %v6926_v63 = vsel %vm8982_vm7, %v6925_v8, %v5159_v55  ;;  %v4539_v18 = vadd.f32 %v4444_v49, %v8612_v58  ;;  %v6930_v17 = vcvt.s32.f32 %v6929_v62  ;;  %v4956_v8 = vpop.f32.mrf.mxu0 }
 0x274   : > { %6177 = vst [vmem:[%s8730_s19 + $0x58] sm:$0xff] %v6135_v45   ;;  %v5238_v30 = vmul.f32 %v8946_v38, %v6926_v63  ;;  %v6909_v60 = vor.u32 %v6908_v44, %v6907_v22  ;;  %v5383_v47 = vmin.f32 %v5347_v5, 127.0  ;;  %vm6904_vm8 = vcmp.lt.f32.partialorder %v6903_v40, 8388608.0 }
 0x275   : > { %v7173_v48 = vor.u32 %v7172_v28, %v7171_v32  ;;  %v6913_v10 = vcvt.f32.s32 %v5158_v9  ;;  %vm7168_vm9 = vcmp.lt.f32.partialorder %v7167_v4, 8388608.0  ;;  %v6932_v41 = vand.u32 2147483648, %v5160_v21  ;;  %v6657_v32 = vpop.f32.mrf.mxu1 }
 0x276   : > { %v7209_v20 = vcvt.f32.s32 %v5238_v30  ;;  %v6910_v19 = vsel %vm6904_vm8, %v6909_v60, %v5157_v16  ;;  %vm8994_vm10 = vcmp.lt.f32.partialorder %v6927_v34, 8388608.0  ;;  %v6931_v24 = vand.u32 2147483647, %v6930_v17 }
 0x277   : > { %v7174_v0 = vsel %vm7168_vm9, %v7173_v48, %v5233_v26  ;;  %v5236_v61 = vmul.f32 %v8946_v38, %v6910_v19  ;;  %v6911_v6 = vand.u32 2147483647, %v5158_v9  ;;  %v6914_v50 = vcvt.s32.f32 %v6913_v10  ;;  %v6692_v10 = vpop.f32.mrf.mxu0 }
 0x278   : > { %v5312_v58 = vadd.f32 %v8972_v42, %v7174_v0  ;;  %v7210_v15 = vcvt.s32.f32 %v7209_v20  ;;  %v7207_v2 = vand.u32 2147483647, %v5238_v30  ;;  %v6933_v43 = vor.u32 %v6932_v41, %v6931_v24 }
 0x279   : > { %v7193_v54 = vcvt.f32.s32 %v5236_v61  ;;  %v6916_v16 = vand.u32 2147483648, %v5158_v9  ;;  %v7212_v53 = vand.u32 2147483648, %v5238_v30  ;;  %v6915_v26 = vand.u32 2147483647, %v6914_v50 }
 0x27a   : > { %v5348_v1 = vmax.f32 %v5312_v58, 0.0  ;;  %v7211_v52 = vand.u32 2147483647, %v7210_v15  ;;  %v7191_v59 = vand.u32 2147483647, %v5236_v61  ;;  %v6934_v29 = vsel %vm8994_vm10, %v6933_v43, %v5160_v21  ;;  %v4959_v43 = vpop.f32.mrf.mxu0 }
 0x27b   : > { %v7194_v5 = vcvt.s32.f32 %v7193_v54  ;;  %v5053_v25 = vadd.f32 %v6691_v56, %v8980_v36  ;;  %v5239_v51 = vmul.f32 %v8946_v38, %v6934_v29  ;;  %v6917_v23 = vor.u32 %v6916_v16, %v6915_v26 }
 0x27c   : > { %v5384_v35 = vmin.f32 %v5348_v1, 127.0  ;;  %v7213_v27 = vor.u32 %v7212_v53, %v7211_v52  ;;  %vm7208_vm11 = vcmp.lt.f32.partialorder %v7207_v2, 8388608.0  ;;  %v7196_v39 = vand.u32 2147483648, %v5236_v61 }
 0x27d   : > { %v7195_v40 = vand.u32 2147483647, %v7194_v5  ;;  %v5163_v46 = vmul.f32 %v8630_v37, %v5053_v25  ;;  %v7217_v3 = vcvt.f32.s32 %v5239_v51  ;;  %vm6912_vm12 = vcmp.lt.f32.partialorder %v6911_v6, 8388608.0 }
 0x27e   : > { %v6130_v44 = vpack.c.bf16 %v5384_v35, %v5383_v47  ;;  %v7214_v4 = vsel %vm7208_vm11, %v7213_v27, %v5238_v30  ;;  %v7215_v49 = vand.u32 2147483647, %v5239_v51  ;;  %v6918_v31 = vsel %vm6912_vm12, %v6917_v23, %v5158_v9 }
 0x27f   : > { %v5317_v21 = vadd.f32 %v8972_v42, %v7214_v4  ;;  %v7197_v36 = vor.u32 %v7196_v39, %v7195_v40  ;;  %vm9006_vm13 = vcmp.lt.f32.partialorder %v7191_v59, 8388608.0  ;;  %v4542_v28 = vadd.f32 %v6654_v11, %v8615_v13  ;;  %v6695_v39 = vpop.f32.mrf.mxu0 }
 0x280   : > { %6176 = vst [vmem:[%s8730_s19 + $0x50] sm:$0xff] %v6130_v44   ;;  %v7218_v22 = vcvt.s32.f32 %v7217_v3  ;;  %v5237_v62 = vmul.f32 %v8946_v38, %v6918_v31  ;;  %v4540_v34 = vadd.f32 %v4447_v7, %v8618_v12  ;;  %v6953_v30 = vcvt.f32.s32 %v5163_v46  ;;  %v4460_v3 = vpop.f32.mrf.mxu1 }
 0x281   : > { %v7198_v63 = vsel %vm9006_vm13, %v7197_v36, %v5236_v61  ;;  %v5051_v60 = vadd.f32 %v4956_v8, %v4539_v18  ;;  %v5353_v17 = vmax.f32 %v5317_v21, 0.0  ;;  %v7220_v47 = vand.u32 2147483648, %v5239_v51 }
 0x282   : > { %v7219_v9 = vand.u32 2147483647, %v7218_v22  ;;  %v7201_v48 = vcvt.f32.s32 %v5237_v62  ;;  %vm9015_vm14 = vcmp.lt.f32.partialorder %v7215_v49, 8388608.0  ;;  %v4545_v13 = vadd.f32 %v6657_v32, %v8621_v57 }
 0x283   : > { %v6951_v19 = vand.u32 2147483647, %v5163_v46  ;;  %v6954_v41 = vcvt.s32.f32 %v6953_v30  ;;  %v5315_v0 = vadd.f32 %v8972_v42, %v7198_v63  ;;  %v6956_v12 = vand.u32 2147483648, %v5163_v46 }
 0x284   : > { %v7221_v61 = vor.u32 %v7220_v47, %v7219_v9  ;;  %v7202_v55 = vcvt.s32.f32 %v7201_v48  ;;  %v7199_v24 = vand.u32 2147483647, %v5237_v62  ;;  %v5161_v58 = vmul.f32 %v8630_v37, %v5051_v60  ;;  %v6658_v47 = vpop.f32.mrf.mxu1 }
 0x285   : > { %v6955_v18 = vand.u32 2147483647, %v6954_v41  ;;  %v5054_v15 = vadd.f32 %v6692_v10, %v4542_v28  ;;  %v5389_v11 = vmin.f32 %v5353_v17, 127.0  ;;  %v7204_v56 = vand.u32 2147483648, %v5237_v62  ;;  %v4972_v41 = vpop.f32.mrf.mxu0 }
 0x286   : > { %v7222_v6 = vsel %vm9015_vm14, %v7221_v61, %v5239_v51  ;;  %v7203_v50 = vand.u32 2147483647, %v7202_v55  ;;  %vm6952_vm15 = vcmp.lt.f32.partialorder %v6951_v19, 8388608.0  ;;  %v6937_v54 = vcvt.f32.s32 %v5161_v58 }
 0x287   : > { %v5318_v57 = vadd.f32 %v8972_v42, %v7222_v6  ;;  %v6957_v2 = vor.u32 %v6956_v12, %v6955_v18  ;;  %v5351_v16 = vmax.f32 %v5315_v0, 0.0  ;;  %v6935_v52 = vand.u32 2147483647, %v5161_v58 }
 0x288   : > { %v7205_v1 = vor.u32 %v7204_v56, %v7203_v50  ;;  %v5164_v53 = vmul.f32 %v8630_v37, %v5054_v15  ;;  %vm7200_vm0 = vcmp.lt.f32.partialorder %v7199_v24, 8388608.0  ;;  %v6938_v5 = vcvt.s32.f32 %v6937_v54 }
 0x289   : > { %v5354_v26 = vmax.f32 %v5318_v57, 0.0  ;;  %v6958_v59 = vsel %vm6952_vm15, %v6957_v2, %v5163_v46  ;;  %v5052_v27 = vadd.f32 %v4959_v43, %v4540_v34  ;;  %v6940_v40 = vand.u32 2147483648, %v5161_v58 }
 0x28a   : > { %v7206_v29 = vsel %vm7200_vm0, %v7205_v1, %v5237_v62  ;;  %v5242_v25 = vmul.f32 %v8946_v38, %v6958_v59  ;;  %v6961_v35 = vcvt.f32.s32 %v5164_v53  ;;  %v6939_v23 = vand.u32 2147483647, %v6938_v5 }
 0x28b   : > { %v5390_v51 = vmin.f32 %v5354_v26, 127.0  ;;  %v5316_v7 = vadd.f32 %v8972_v42, %v7206_v29  ;;  %v5387_v44 = vmin.f32 %v5351_v16, 127.0  ;;  %vm9028_vm1 = vcmp.lt.f32.partialorder %v6935_v52, 8388608.0 }
 0x28c   : > { %v7241_v4 = vcvt.f32.s32 %v5242_v25  ;;  %v6959_v46 = vand.u32 2147483647, %v5164_v53  ;;  %v6941_v49 = vor.u32 %v6940_v40, %v6939_v23  ;;  %v6962_v31 = vcvt.s32.f32 %v6961_v35  ;;  %v6696_v35 = vpop.f32.mrf.mxu0 }
 0x28d   : > { %v6145_v21 = vpack.c.bf16 %v5390_v51, %v5389_v11  ;;  %v5352_v36 = vmax.f32 %v5316_v7, 0.0  ;;  %v6964_v28 = vand.u32 2147483648, %v5164_v53  ;;  %v5162_v22 = vmul.f32 %v8630_v37, %v5052_v27 }
 0x28e   : > { %v7242_v45 = vcvt.s32.f32 %v7241_v4  ;;  %v5057_v62 = vadd.f32 %v6695_v39, %v4545_v13  ;;  %v7239_v63 = vand.u32 2147483647, %v5242_v25  ;;  %v6942_v34 = vsel %vm9028_vm1, %v6941_v49, %v5161_v58  ;;  %v4975_v12 = vpop.f32.mrf.mxu0 }
 0x28f   : > { %6179 = vst [vmem:[%s8730_s19 + $0x68] sm:$0xff] %v6145_v21   ;;  %v5388_v32 = vmin.f32 %v5352_v36, 127.0  ;;  %v6963_v30 = vand.u32 2147483647, %v6962_v31  ;;  %v7244_v17 = vand.u32 2147483648, %v5242_v25  ;;  %v5240_v9 = vmul.f32 %v8946_v38, %v6942_v34 }
 0x290   : > { %v7243_v60 = vand.u32 2147483647, %v7242_v45  ;;  %v6945_v48 = vcvt.f32.s32 %v5162_v22  ;;  %v4543_v20 = vadd.f32 %v4460_v3, %v8623_v33  ;;  %v5167_v13 = vmul.f32 %v8630_v37, %v5057_v62  ;;  %v4463_v45 = vpop.f32.mrf.mxu1 }
 0x291   : > { %v6140_v10 = vpack.c.bf16 %v5388_v32, %v5387_v44  ;;  %v6965_v19 = vor.u32 %v6964_v28, %v6963_v30  ;;  %v7225_v61 = vcvt.f32.s32 %v5240_v9  ;;  %vm6960_vm2 = vcmp.lt.f32.partialorder %v6959_v46, 8388608.0 }
 0x292   : > { %v7245_v0 = vor.u32 %v7244_v17, %v7243_v60  ;;  %v6943_v55 = vand.u32 2147483647, %v5162_v22  ;;  %vm9040_vm3 = vcmp.lt.f32.partialorder %v7239_v63, 8388608.0  ;;  %v4546_v24 = vadd.f32 %v6658_v47, %v8625_v14 }
 0x293   : > { %6178 = vst [vmem:[%s8730_s19 + $0x60] sm:$0xff] %v6140_v10   ;;  %v6966_v18 = vsel %vm6960_vm2, %v6965_v19, %v5164_v53  ;;  %v6946_v58 = vcvt.s32.f32 %v6945_v48  ;;  %v7226_v15 = vcvt.s32.f32 %v7225_v61  ;;  %v5055_v6 = vadd.f32 %v4972_v41, %v4543_v20  ;;  %v9209_v48 = vld [vmem:[#allocation7_spill] sm:$0xff] }
 0x294   : > { %v7246_v33 = vsel %vm9040_vm3, %v7245_v0, %v5242_v25  ;;  %v5243_v11 = vmul.f32 %v8946_v38, %v6966_v18  ;;  %v7223_v50 = vand.u32 2147483647, %v5240_v9  ;;  %v6948_v57 = vand.u32 2147483648, %v5162_v22 }
 0x295   : > { %v6947_v56 = vand.u32 2147483647, %v6946_v58  ;;  %v6985_v2 = vcvt.f32.s32 %v5167_v13  ;;  %v7227_v54 = vand.u32 2147483647, %v7226_v15  ;;  %v7228_v43 = vand.u32 2147483648, %v5240_v9 }
 0x296   : > { %v7249_v16 = vcvt.f32.s32 %v5243_v11  ;;  %vm9048_vm4 = vcmp.lt.f32.partialorder %v6943_v55, 8388608.0  ;;  %v5321_v14 = vadd.f32 %v8972_v42, %v7246_v33  ;;  %v6983_v53 = vand.u32 2147483647, %v5167_v13 }
 0x297   : > { %v6949_v52 = vor.u32 %v6948_v57, %v6947_v56  ;;  %v6986_v26 = vcvt.s32.f32 %v6985_v2  ;;  %v7229_v59 = vor.u32 %v7228_v43, %v7227_v54  ;;  %v7247_v5 = vand.u32 2147483647, %v5243_v11 }
 0x298   : > { %v7250_v29 = vcvt.s32.f32 %v7249_v16  ;;  %v5165_v25 = vmul.f32 %v8630_v37, %v5055_v6  ;;  %vm9054_vm5 = vcmp.lt.f32.partialorder %v7223_v50, 8388608.0  ;;  %v6988_v23 = vand.u32 2147483648, %v5167_v13 }
 0x299   : > { %v6950_v51 = vsel %vm9048_vm4, %v6949_v52, %v5162_v22  ;;  %v6987_v7 = vand.u32 2147483647, %v6986_v26  ;;  %v7230_v40 = vsel %vm9054_vm5, %v7229_v59, %v5240_v9  ;;  %v7252_v44 = vand.u32 2147483648, %v5243_v11 }
 0x29a   : > { %v7251_v39 = vand.u32 2147483647, %v7250_v29  ;;  %v5241_v4 = vmul.f32 %v8946_v38, %v6950_v51  ;;  %vm6984_vm6 = vcmp.lt.f32.partialorder %v6983_v53, 8388608.0  ;;  %v6969_v8 = vcvt.f32.s32 %v5165_v25 }
 0x29b   : > { %v6989_v3 = vor.u32 %v6988_v23, %v6987_v7  ;;  %v5058_v46 = vadd.f32 %v6696_v35, %v4546_v24  ;;  %v5357_v21 = vmax.f32 %v5321_v14, 0.0  ;;  %vm7248_vm7 = vcmp.lt.f32.partialorder %v7247_v5, 8388608.0 }
 0x29c   : > { %v7253_v36 = vor.u32 %v7252_v44, %v7251_v39  ;;  %v7233_v49 = vcvt.f32.s32 %v5241_v4  ;;  %v5319_v31 = vadd.f32 %v8972_v42, %v7230_v40  ;;  %v6967_v22 = vand.u32 2147483647, %v5165_v25 }
 0x29d   : > { %v6990_v28 = vsel %vm6984_vm6, %v6989_v3, %v5167_v13  ;;  %v6970_v62 = vcvt.s32.f32 %v6969_v8  ;;  %v6972_v30 = vand.u32 2147483648, %v5165_v25  ;;  %v7231_v17 = vand.u32 2147483647, %v5241_v4 }
 0x29e   : > { %v7254_v32 = vsel %vm7248_vm7, %v7253_v36, %v5243_v11  ;;  %v7234_v63 = vcvt.s32.f32 %v7233_v49  ;;  %v5246_v34 = vmul.f32 %v8946_v38, %v6990_v28  ;;  %v5168_v47 = vmul.f32 %v8630_v37, %v5058_v46 }
 0x29f   : > { %v5322_v60 = vadd.f32 %v8972_v42, %v7254_v32  ;;  %v6971_v9 = vand.u32 2147483647, %v6970_v62  ;;  %v4544_v10 = vadd.f32 %v4463_v45, %v9209_v48  ;;  %v7236_v19 = vand.u32 2147483648, %v5241_v4 }
 0x2a0   : > { %v7235_v20 = vand.u32 2147483647, %v7234_v63  ;;  %v7273_v41 = vcvt.f32.s32 %v5246_v34  ;;  %v5393_v0 = vmin.f32 %v5357_v21, 127.0  ;;  %v6993_v55 = vcvt.f32.s32 %v5168_v47 }
 0x2a1   : > { %v5358_v13 = vmax.f32 %v5322_v60, 0.0  ;;  %v6973_v61 = vor.u32 %v6972_v30, %v6971_v9  ;;  %v5355_v24 = vmax.f32 %v5319_v31, 0.0  ;;  %vm6968_vm8 = vcmp.lt.f32.partialorder %v6967_v22, 8388608.0 }
 0x2a2   : > { %v7237_v18 = vor.u32 %v7236_v19, %v7235_v20  ;;  %v7274_v58 = vcvt.s32.f32 %v7273_v41  ;;  %vm7232_vm9 = vcmp.lt.f32.partialorder %v7231_v17, 8388608.0  ;;  %v6994_v11 = vcvt.s32.f32 %v6993_v55 }
 0x2a3   : > { %v5394_v33 = vmin.f32 %v5358_v13, 127.0  ;;  %v6974_v15 = vsel %vm6968_vm8, %v6973_v61, %v5165_v25  ;;  %v6991_v56 = vand.u32 2147483647, %v5168_v47  ;;  %v5056_v57 = vadd.f32 %v4975_v12, %v4544_v10 }
 0x2a4   : > { %v7238_v6 = vsel %vm7232_vm9, %v7237_v18, %v5241_v4  ;;  %v5244_v50 = vmul.f32 %v8946_v38, %v6974_v15  ;;  %v6995_v43 = vand.u32 2147483647, %v6994_v11  ;;  %v6996_v16 = vand.u32 2147483648, %v5168_v47 }
 0x2a5   : > { %v6155_v2 = vpack.c.bf16 %v5394_v33, %v5393_v0  ;;  %v5320_v54 = vadd.f32 %v8972_v42, %v7238_v6  ;;  %v7275_v1 = vand.u32 2147483647, %v7274_v58  ;;  %v5166_v53 = vmul.f32 %v8630_v37, %v5056_v57 }
 0x2a6   : > { %v6997_v52 = vor.u32 %v6996_v16, %v6995_v43  ;;  %v7276_v26 = vand.u32 2147483648, %v5246_v34  ;;  %v7257_v59 = vcvt.f32.s32 %v5244_v50  ;;  %vm6992_vm10 = vcmp.lt.f32.partialorder %v6991_v56, 8388608.0 }
 0x2a7   : > { %6181 = vst [vmem:[%s8730_s19 + $0x78] sm:$0xff] %v6155_v2   ;;  %v5356_v14 = vmax.f32 %v5320_v54, 0.0  ;;  %v5391_v5 = vmin.f32 %v5355_v24, 127.0  ;;  %v7271_v25 = vand.u32 2147483647, %v5246_v34  ;;  %v6977_v7 = vcvt.f32.s32 %v5166_v53 }
 0x2a8   : > { %v6998_v35 = vsel %vm6992_vm10, %v6997_v52, %v5168_v47  ;;  %v7277_v27 = vor.u32 %v7276_v26, %v7275_v1  ;;  %v7258_v40 = vcvt.s32.f32 %v7257_v59  ;;  %v6975_v37 = vand.u32 2147483647, %v5166_v53 }
 0x2a9   : > { %v5392_v29 = vmin.f32 %v5356_v14, 127.0  ;;  %v5247_v51 = vmul.f32 %v8946_v38, %v6998_v35  ;;  %vm7272_vm11 = vcmp.lt.f32.partialorder %v7271_v25, 8388608.0  ;;  %v6978_v44 = vcvt.s32.f32 %v6977_v7 }
 0x2aa   : > { %v7278_v4 = vsel %vm7272_vm11, %v7277_v27, %v5246_v34  ;;  %v6980_v21 = vand.u32 2147483648, %v5166_v53  ;;  %v7259_v36 = vand.u32 2147483647, %v7258_v40  ;;  %v7260_v22 = vand.u32 2147483648, %v5244_v50 }
 0x2ab   : > { %v6150_v23 = vpack.c.bf16 %v5392_v29, %v5391_v5  ;;  %v7281_v39 = vcvt.f32.s32 %v5247_v51  ;;  %v7279_v8 = vand.u32 2147483647, %v5247_v51  ;;  %v6979_v46 = vand.u32 2147483647, %v6978_v44 }
 0x2ac   : > { %v7284_v31 = vand.u32 2147483648, %v5247_v51  ;;  %v5325_v45 = vadd.f32 %v8972_v42, %v7278_v4  ;;  %vm6976_vm12 = vcmp.lt.f32.partialorder %v6975_v37, 8388608.0  ;;  %v7255_v32 = vand.u32 2147483647, %v5244_v50 }
 0x2ad   : > { %6180 = vst [vmem:[%s8730_s19 + $0x70] sm:$0xff] %v6150_v23   ;;  %v7282_v3 = vcvt.s32.f32 %v7281_v39  ;;  %v6981_v28 = vor.u32 %v6980_v21, %v6979_v46  ;;  %vm7280_vm13 = vcmp.lt.f32.partialorder %v7279_v8, 8388608.0  ;;  %v7261_v30 = vor.u32 %v7260_v22, %v7259_v36 }
 0x2ae   : > { %v5361_v17 = vmax.f32 %v5325_v45, 0.0  ;;  %vm7256_vm14 = vcmp.lt.f32.partialorder %v7255_v32, 8388608.0 }
 0x2af   : > { %v7283_v49 = vand.u32 2147483647, %v7282_v3  ;;  %v6982_v63 = vsel %vm6976_vm12, %v6981_v28, %v5166_v53  ;;  %v7262_v10 = vsel %vm7256_vm14, %v7261_v30, %v5244_v50 }
 0x2b0   : > { %v5245_v34 = vmul.f32 %v8946_v38, %v6982_v63  ;;  %v5397_v19 = vmin.f32 %v5361_v17, 127.0  ;;  %v5323_v55 = vadd.f32 %v8972_v42, %v7262_v10 }
 0x2b1   : > { %v7285_v62 = vor.u32 %v7284_v31, %v7283_v49 }
 0x2b2   : > { %v7265_v47 = vcvt.f32.s32 %v5245_v34  ;;  %v7263_v0 = vand.u32 2147483647, %v5245_v34  ;;  %v7268_v61 = vand.u32 2147483648, %v5245_v34  ;;  %v5359_v18 = vmax.f32 %v5323_v55, 0.0 }
 0x2b3   : > { %v7286_v60 = vsel %vm7280_vm13, %v7285_v62, %v5247_v51 }
 0x2b4   : > { %v5326_v9 = vadd.f32 %v8972_v42, %v7286_v60  ;;  %v7266_v20 = vcvt.s32.f32 %v7265_v47  ;;  %vm7264_vm15 = vcmp.lt.f32.partialorder %v7263_v0, 8388608.0  ;;  %v5395_v15 = vmin.f32 %v5359_v18, 127.0 }
 0x2b6   : > { %v5362_v48 = vmax.f32 %v5326_v9, 0.0  ;;  %v7267_v13 = vand.u32 2147483647, %v7266_v20 }
 0x2b8   : > { %v5398_v41 = vmin.f32 %v5362_v48, 127.0  ;;  %v7269_v12 = vor.u32 %v7268_v61, %v7267_v13 }
 0x2ba   : > { %v6165_v38 = vpack.c.bf16 %v5398_v41, %v5397_v19  ;;  %v7270_v24 = vsel %vm7264_vm15, %v7269_v12, %v5245_v34 }
 0x2bb   : > { %v5324_v58 = vadd.f32 %v8972_v42, %v7270_v24 }
 0x2bc   : > { %6183 = vst [vmem:[%s8730_s19 + $0x88] sm:$0xff] %v6165_v38  }
 0x2bd   : > { %v5360_v33 = vmax.f32 %v5324_v58, 0.0 }
 0x2bf   : > { %v5396_v11 = vmin.f32 %v5360_v33, 127.0 }
 0x2c1   : > { %v6160_v6 = vpack.c.bf16 %v5396_v11, %v5395_v15 }
 0x2c3   : > { %6182 = vst [vmem:[%s8730_s19 + $0x80] sm:$0xff] %v6160_v6  }
 0x2c4   : > { %7514 = shalt.err (!%p7511_p3)
}
 0x2c5   : > { %s7515_s16 = scalar_lea.hbm %s9085_s11, 2304  ;;  %s7519_s19 = scalar_lea.hbm %s9137_s5, 4608 }
 0x2c6   : > { %p7516_p4 = scmp.ne.s32.totalorder %s9085_s11, %s7515_s16  ;;  %p7520_p9 = scmp.lt.s32.totalorder %s9085_s11, %s9137_s5 }
 0x2c7   : > { %p7521_p10 = scmp.lt.s32.totalorder %s7519_s19, %s7515_s16 }
 0x2c8   : > { %p7517_p7 = pnand %p7516_p4, %p7637_p5 }
 0x2c9   : > { %p7522_p11 = por %p7521_p10, %p7520_p9 }
 0x2ca   : > { %p7518_p8 = pneg %p7517_p7 }
 0x2cc   : > { %p7523_p12 = pnand %p7522_p11, %p7518_p8 }
 0x2ce   : > { %7526 = shalt.err (!%p7523_p12)
}
 0x2cf   : > { %s7564_s27 = smov 64   ;;  %s7565_s6 = smov 4  }
 0x2d0   : > { %7288 = dma.vmem_to_hbm [thread:$0]  (%p7637_p5), %s9087_s8, 2304, %s9085_s11, %s9092_s12, %s7564_s27, %s7564_s27, %s7565_s6  }
 0x2d1 PF: > { %p7294_p13 = scmp.ge.s32.totalorder %s7561_s23, 2  ;;  %s5608_s7 = sand.u32 1, %s7549_s20  }
 0x2d2   : > { %s5609_s9 = scalar_lea.sflag [#allocation5], %s5608_s7 }
 0x2d3   : > { %p7291_p0 = pnand %p7294_p13, %p7641_p6 }
 0x2d5   : > { %p7292_p1 = pneg %p7291_p0 }
 0x2d7   : > { %7544 = dma.done.wait (%p7292_p1), %s5609_s9, 2304  }
 0x2d8   : > { %7546 = vsyncadd (%p7292_p1), %s5609_s9, 4294964992  ;;  %p16_p2 = scmp.ge.s32.totalorder %s7624_s25, 4   ;;  %s9210_s20 = smov %s7553_s21 }
 0x2d9   : > { %s9211_s21 = smov %s7557_s22  ;;  %s9212_s22 = smov %s7635_s28 }
 0x2da   : > { %s9213_s23 = smov %s7624_s25  ;;  %18 = sbr.rel (!%p16_p2) target bundleno = 5 (0x5), region = 83 }
 0x2df   :  { %5614 = vsyncpa [#allocation5], 1 }
 0x2e0   :  { %5616 = vsyncpa [#allocation5 + $0x1], 1 }

</bundles_post_ra>
